<compile_context>
chip_gen: v5e
topology: v5e:2x2
jax: 0.10.0
libtpu: 0.0.40
codegen_flags: <defaults>
</compile_context>

<pallas_src>
import functools

import jax
import jax.numpy as jnp
from jax.experimental import pallas as pl
from jax.experimental.pallas import tpu as pltpu

_BN_EPS = 1e-3
_M_TILE_TARGET = 1024              # safe for v7x's 64 MiB VMEM even at C=128
_VMEM_LIMIT = 48 * 1024 * 1024     # explicit scoped-VMEM limit (v7x-safe)
_ACT_DTYPE = jnp.bfloat16

_COMPILER_PARAMS = pltpu.CompilerParams(
    dimension_semantics=("parallel",),
    vmem_limit_bytes=_VMEM_LIMIT,
)


def _pick_m_tile(m, target=_M_TILE_TARGET):
    """Largest row tile <= target that is a multiple of 16 and divides M."""
    if m <= target:
        return m
    t = (target // 16) * 16
    while t >= 16:
        if m % t == 0:
            return t
        t -= 16
    return m


# ----------------------------------------------------------------------------
# Pallas kernels
# ----------------------------------------------------------------------------
def _conv_kernel(p_ref, w_ref, sh_ref, *rest, has_scale, has_residual, relu):
    """out = act(dot(p, w) [*scale] + shift [+ residual]).

    p_ref:  [MT, T*Cin]  (bf16)   packed conv patches
    w_ref:  [T*Cin, Cout] (bf16)  packed conv weight
    sh_ref: [1, Cout] (f32)       bias folded into BN shift
    optional s_ref: [1, Cout] (f32) BN scale
    optional r_ref: [MT, Cout] (bf16) residual
    """
    rest = list(rest)
    s_ref = rest.pop(0) if has_scale else None
    r_ref = rest.pop(0) if has_residual else None
    (o_ref,) = rest

    acc = jnp.dot(p_ref[...], w_ref[...], preferred_element_type=jnp.float32)
    if has_scale:
        y = acc * s_ref[...] + sh_ref[...]
    else:
        y = acc + sh_ref[...]
    if has_residual:
        y = y + r_ref[...].astype(jnp.float32)
    if relu:
        y = jnp.maximum(y, 0.0)
    o_ref[...] = y.astype(o_ref.dtype)


def _down_kernel(cp_ref, w_ref, pp_ref, sc_ref, shc_ref, sp_ref, shp_ref,
                 o_ref, *, cc):
    """Downsampler: 3x3/s2 conv branch + 2x2 max-pool branch, each BN+ReLU'd,
    written into a single fused output ref [MT, Cc+Cin]."""
    acc = jnp.dot(cp_ref[...], w_ref[...], preferred_element_type=jnp.float32)
    yc = jnp.maximum(acc * sc_ref[...] + shc_ref[...], 0.0)

    pool = pp_ref[0].astype(jnp.float32)
    for t in range(1, 4):
        pool = jnp.maximum(pool, pp_ref[t].astype(jnp.float32))
    yp = jnp.maximum(pool * sp_ref[...] + shp_ref[...], 0.0)

    o_ref[:, :cc] = yc.astype(o_ref.dtype)
    o_ref[:, cc:] = yp.astype(o_ref.dtype)


# ----------------------------------------------------------------------------
# Kernel wrappers
# ----------------------------------------------------------------------------
def conv_fused(packed, w, shift, scale=None, residual=None, relu=True,
               out_dtype=_ACT_DTYPE):
    M, K = packed.shape
    Cout = w.shape[1]
    mt = _pick_m_tile(M)
    grid = (M // mt,)

    in_specs = [
        pl.BlockSpec((mt, K), lambda i: (i, 0)),
        pl.BlockSpec((K, Cout), lambda i: (0, 0)),
        pl.BlockSpec((1, Cout), lambda i: (0, 0)),
    ]
    args = [packed, w, shift]
    if scale is not None:
        in_specs.append(pl.BlockSpec((1, Cout), lambda i: (0, 0)))
        args.append(scale)
    if residual is not None:
        in_specs.append(pl.BlockSpec((mt, Cout), lambda i: (i, 0)))
        args.append(residual)

    kern = functools.partial(_conv_kernel, has_scale=scale is not None,
                             has_residual=residual is not None, relu=relu)
    bytes_accessed = (packed.size * packed.dtype.itemsize
                      + w.size * w.dtype.itemsize
                      + M * Cout * 2
                      + (residual.size * residual.dtype.itemsize
                         if residual is not None else 0))
    cost = pl.CostEstimate(flops=2 * M * K * Cout, transcendentals=0,
                           bytes_accessed=bytes_accessed)

    return pl.pallas_call(
        kern,
        out_shape=jax.ShapeDtypeStruct((M, Cout), out_dtype),
        grid=grid,
        in_specs=in_specs,
        out_specs=pl.BlockSpec((mt, Cout), lambda i: (i, 0)),
        compiler_params=_COMPILER_PARAMS,
        cost_estimate=cost,
    )(*args)


# ----------------------------------------------------------------------------
# Patch / weight layout glue (plain JAX, pre-kernel)
# ----------------------------------------------------------------------------
def taps_from_torch_weight(w):
    """[Cout, Cin, kh, kw] -> [kh*kw*Cin, Cout]  (tap-major, Cin-minor)."""
    kh, kw = w.shape[2], w.shape[3]
    return jnp.transpose(w, (2, 3, 1, 0)).reshape(kh * kw * w.shape[1], w.shape[0])


def conv3x3_s2_packed(x):
    """x: NHWC. 3x3 conv, stride 2, pad 1 -> packed patches [M, 9*C]."""
    N, H, W, C = x.shape
    assert H % 2 == 0 and W % 2 == 0, "stride-2 stage needs even spatial dims"
    H2, W2 = H // 2, W // 2
    xp = jnp.pad(x, ((0, 0), (1, 1), (1, 1), (0, 0)))
    taps = []
    for ky in range(3):
        for kx in range(3):
            sl = xp[:, ky:ky + 2 * H2:2, kx:kx + 2 * W2:2, :]
            taps.append(sl.reshape(N * H2 * W2, C))
    return jnp.concatenate(taps, axis=-1), (N, H2, W2)


def pool2x2_patches(x):
    """2x2/s2 max-pool taps: [4, M, C]."""
    N, H, W, C = x.shape
    H2, W2 = H // 2, W // 2
    taps = [x[:, dy::2, dx::2, :].reshape(N * H2 * W2, C)
            for dy in range(2) for dx in range(2)]
    return jnp.stack(taps, 0)


def conv3x1_packed(x, d):
    """(3,1) kernel, pad (d,0), dilation (d,1) -> [M, 3*C]."""
    N, H, W, C = x.shape
    xp = jnp.pad(x, ((0, 0), (d, d), (0, 0), (0, 0)))
    taps = [xp[:, ky * d:ky * d + H, :, :].reshape(N * H * W, C)
            for ky in range(3)]
    return jnp.concatenate(taps, axis=-1)


def conv1x3_packed(x, d):
    """(1,3) kernel, pad (0,d), dilation (1,d) -> [M, 3*C]."""
    N, H, W, C = x.shape
    xp = jnp.pad(x, ((0, 0), (0, 0), (d, d), (0, 0)))
    taps = [xp[:, :, kx * d:kx * d + W, :].reshape(N * H * W, C)
            for kx in range(3)]
    return jnp.concatenate(taps, axis=-1)


# ----------------------------------------------------------------------------
# Blocks
# ----------------------------------------------------------------------------
def downsampler_block(x, p):
    N, H, W, Cin = x.shape
    Cc = p['cc']
    Cout = Cc + Cin
    cpack, (n, H2, W2) = conv3x3_s2_packed(x)
    ppatches = pool2x2_patches(x)
    M = N * H2 * W2
    mt = _pick_m_tile(M)
    K = 9 * Cin

    kern = functools.partial(_down_kernel, cc=Cc)
    bytes_accessed = (cpack.size * 2 + ppatches.size * 2 + p['w'].size * 2
                      + M * Cout * 2)
    cost = pl.CostEstimate(flops=2 * M * K * Cc, transcendentals=0,
                           bytes_accessed=bytes_accessed)

    out = pl.pallas_call(
        kern,
        out_shape=jax.ShapeDtypeStruct((M, Cout), _ACT_DTYPE),
        grid=(M // mt,),
        in_specs=[
            pl.BlockSpec((mt, K), lambda i: (i, 0)),
            pl.BlockSpec((K, Cc), lambda i: (0, 0)),
            pl.BlockSpec((4, mt, Cin), lambda i: (0, i, 0)),
            pl.BlockSpec((1, Cc), lambda i: (0, 0)),
            pl.BlockSpec((1, Cc), lambda i: (0, 0)),
            pl.BlockSpec((1, Cin), lambda i: (0, 0)),
            pl.BlockSpec((1, Cin), lambda i: (0, 0)),
        ],
        out_specs=pl.BlockSpec((mt, Cout), lambda i: (i, 0)),
        compiler_params=_COMPILER_PARAMS,
        cost_estimate=cost,
    )(cpack, p['w'], ppatches, p['scale_c'], p['shift_c'],
      p['scale_p'], p['shift_p'])
    return out.reshape(N, H2, W2, Cout)


def nb1d_block(x, p):
    N, H, W, C = x.shape
    d = p['dilated']
    M = N * H * W
    x_flat = x.reshape(M, C)

    y = conv_fused(conv3x1_packed(x, 1), p['w1'], p['sh1'],
                   relu=True).reshape(N, H, W, C)
    y = conv_fused(conv1x3_packed(y, 1), p['w2'], p['sh2'], scale=p['sc2'],
                   relu=True).reshape(N, H, W, C)
    y = conv_fused(conv3x1_packed(y, d), p['w3'], p['sh3'],
                   relu=True).reshape(N, H, W, C)
    y = conv_fused(conv1x3_packed(y, d), p['w4'], p['sh4'], scale=p['sc4'],
                   residual=x_flat, relu=True)
    # TODO(synk): Dropout2d (p=0.03 / 0.3) is training-mode only; eval
    # semantics (identity) are used here.
    return y.reshape(N, H, W, C)


def encoder_forward(x_nchw, params, predict=False):
    x = jnp.transpose(x_nchw, (0, 2, 3, 1)).astype(_ACT_DTYPE)   # NCHW -> NHWC
    x = downsampler_block(x, params['initial'])
    for lp in params['layers']:
        if lp['kind'] == 'down':
            x = downsampler_block(x, lp)
        else:
            x = nb1d_block(x, lp)
    if predict:
        N, H, W, C = x.shape
        M = N * H * W
        y = conv_fused(x.reshape(M, C), params['out_w'], params['out_b'],
                       relu=False)
        x = y.reshape(N, H, W, -1)
    # NHWC -> NCHW (match PyTorch output), back to f32 at the boundary.
    return jnp.transpose(x, (0, 3, 1, 2)).astype(jnp.float32)


# ----------------------------------------------------------------------------
# Parameter preparation: pack taps, cast weights to bf16, fold bias into shift.
# Done ONCE outside the jitted forward.
# ----------------------------------------------------------------------------
def _prep_down(p):
    cc, cin = p['w'].shape[0], p['w'].shape[1]
    sc = p['scale'][:cc]
    return dict(
        kind='down', cc=cc, cin=cin,
        w=taps_from_torch_weight(p['w']).astype(_ACT_DTYPE),
        scale_c=sc.reshape(1, -1).astype(jnp.float32),
        shift_c=(p['b'] * sc + p['shift'][:cc]).reshape(1, -1).astype(jnp.float32),
        scale_p=p['scale'][cc:].reshape(1, -1).astype(jnp.float32),
        shift_p=p['shift'][cc:].reshape(1, -1).astype(jnp.float32),
    )


def _prep_nb(p):
    return dict(
        kind='nb', dilated=p['dilated'],
        w1=taps_from_torch_weight(p['w3x1_1']).astype(_ACT_DTYPE),
        sh1=p['b3x1_1'].reshape(1, -1).astype(jnp.float32),
        w2=taps_from_torch_weight(p['w1x3_1']).astype(_ACT_DTYPE),
        sc2=p['bn1_scale'].reshape(1, -1).astype(jnp.float32),
        sh2=(p['b1x3_1'] * p['bn1_scale'] + p['bn1_shift']
             ).reshape(1, -1).astype(jnp.float32),
        w3=taps_from_torch_weight(p['w3x1_2']).astype(_ACT_DTYPE),
        sh3=p['b3x1_2'].reshape(1, -1).astype(jnp.float32),
        w4=taps_from_torch_weight(p['w1x3_2']).astype(_ACT_DTYPE),
        sc4=p['bn2_scale'].reshape(1, -1).astype(jnp.float32),
        sh4=(p['b1x3_2'] * p['bn2_scale'] + p['bn2_shift']
             ).reshape(1, -1).astype(jnp.float32),
    )


def prepare_params(raw):
    return dict(
        initial=_prep_down(raw['initial']),
        layers=[_prep_down(lp) if lp['kind'] == 'down' else _prep_nb(lp)
                for lp in raw['layers']],
        out_w=taps_from_torch_weight(raw['out_w']).astype(_ACT_DTYPE),
        out_b=raw['out_b'].reshape(1, -1).astype(jnp.float32),
    )


# ----------------------------------------------------------------------------
# Deterministic raw parameter init (PyTorch Conv2d default-style uniform
# bounds; BatchNorm running stats are synthetic but deterministic).
# ----------------------------------------------------------------------------
def _init_conv(key, cout, cin, kh, kw):
    k1, k2 = jax.random.split(key)
    bound = 1.0 / float((cin * kh * kw) ** 0.5)
    w = jax.random.uniform(k1, (cout, cin, kh, kw), jnp.float32, -bound, bound)
    b = jax.random.uniform(k2, (cout,), jnp.float32, -bound, bound)
    return w, b


def _init_bn_folded(key, c):
    k1, k2, k3, k4 = jax.random.split(key, 4)
    gamma = 1.0 + 0.1 * jax.random.normal(k1, (c,), jnp.float32)
    beta = 0.1 * jax.random.normal(k2, (c,), jnp.float32)
    mean = 0.1 * jax.random.normal(k3, (c,), jnp.float32)
    var = jax.random.uniform(k4, (c,), jnp.float32, 0.5, 1.5)
    scale = gamma / jnp.sqrt(var + _BN_EPS)
    shift = beta - mean * scale
    return scale, shift


def _init_downsampler(key, ninput, noutput):
    k1, k2 = jax.random.split(key)
    w, b = _init_conv(k1, noutput - ninput, ninput, 3, 3)
    scale, shift = _init_bn_folded(k2, noutput)
    return dict(kind='down', w=w, b=b, scale=scale, shift=shift)


def _init_nb1d(key, c, dilated):
    ks = jax.random.split(key, 6)
    w1, b1 = _init_conv(ks[0], c, c, 3, 1)
    w2, b2 = _init_conv(ks[1], c, c, 1, 3)
    s1, sh1 = _init_bn_folded(ks[2], c)
    w3, b3 = _init_conv(ks[3], c, c, 3, 1)
    w4, b4 = _init_conv(ks[4], c, c, 1, 3)
    s2, sh2 = _init_bn_folded(ks[5], c)
    return dict(kind='nb', dilated=dilated,
                w3x1_1=w1, b3x1_1=b1, w1x3_1=w2, b1x3_1=b2,
                bn1_scale=s1, bn1_shift=sh1,
                w3x1_2=w3, b3x1_2=b3, w1x3_2=w4, b1x3_2=b4,
                bn2_scale=s2, bn2_shift=sh2)


def init_encoder_params(key, num_classes):
    keys = iter(jax.random.split(key, 32))
    params = {'initial': _init_downsampler(next(keys), 3, 16)}
    layers = [_init_downsampler(next(keys), 16, 64)]
    for _ in range(5):
        layers.append(_init_nb1d(next(keys), 64, 1))
    layers.append(_init_downsampler(next(keys), 64, 128))
    for _ in range(2):
        for d in (2, 4, 8, 16):
            layers.append(_init_nb1d(next(keys), 128, d))
    params['layers'] = layers
    params['out_w'], params['out_b'] = _init_conv(next(keys), num_classes, 128, 1, 1)
    return params


# ----------------------------------------------------------------------------
if __name__ == "__main__":
    key = jax.random.PRNGKey(0)
    kp, kx = jax.random.split(key)
    raw_params = init_encoder_params(kp, num_classes=5)
    params = prepare_params(raw_params)   # packed/folded once, outside jit

    # Small NCHW input (spatial divisible by 8 for the three stride-2 stages).
    x = jax.random.normal(kx, (2, 3, 32, 32), jnp.float32)

    fwd = jax.jit(lambda inp: encoder_forward(inp, params, predict=False))
    out = fwd(x)
    jax.block_until_ready(out)

    assert out.shape == (2, 128, 4, 4)
    assert bool(jnp.all(jnp.isfinite(out)))
    print("KERNEL_OK")
</pallas_src>

<mosaic_0001>
module attributes {stable_mosaic.version = 11 : i64} {
  func.func @_down_kernel(%arg0: i32, %arg1: memref<512x27xbf16, #tpu.memory_space<vmem>>, %arg2: memref<27x13xbf16, #tpu.memory_space<vmem>>, %arg3: memref<4x512x3xbf16, #tpu.memory_space<vmem>>, %arg4: memref<1x13xf32, #tpu.memory_space<vmem>>, %arg5: memref<1x13xf32, #tpu.memory_space<vmem>>, %arg6: memref<1x3xf32, #tpu.memory_space<vmem>>, %arg7: memref<1x3xf32, #tpu.memory_space<vmem>>, %arg8: memref<512x16xbf16, #tpu.memory_space<vmem>>) attributes {dimension_semantics = [#tpu.dimension_semantics<parallel>], iteration_bounds = array<i64: 1>, scalar_prefetch = 0 : i64, scratch_operands = 0 : i64, tpu.core_type = #tpu.core_type<tc>, window_params = [{transform_indices = @transform_0, window_bounds = array<i64: 512, 27>}, {pipeline_mode = #tpu.pipeline_mode<synchronous>, transform_indices = @transform_1, window_bounds = array<i64: 27, 13>}, {transform_indices = @transform_2, window_bounds = array<i64: 4, 512, 3>}, {pipeline_mode = #tpu.pipeline_mode<synchronous>, transform_indices = @transform_3, window_bounds = array<i64: 1, 13>}, {pipeline_mode = #tpu.pipeline_mode<synchronous>, transform_indices = @transform_4, window_bounds = array<i64: 1, 13>}, {pipeline_mode = #tpu.pipeline_mode<synchronous>, transform_indices = @transform_5, window_bounds = array<i64: 1, 3>}, {pipeline_mode = #tpu.pipeline_mode<synchronous>, transform_indices = @transform_6, window_bounds = array<i64: 1, 3>}, {transform_indices = @transform_7, window_bounds = array<i64: 512, 16>}]} {
    %c0 = arith.constant 0 : index
    %c0_0 = arith.constant 0 : index
    %0 = vector.load %arg1[%c0, %c0_0] : memref<512x27xbf16, #tpu.memory_space<vmem>>, vector<512x27xbf16>
    %c0_1 = arith.constant 0 : index
    %c0_2 = arith.constant 0 : index
    %1 = vector.load %arg2[%c0_1, %c0_2] : memref<27x13xbf16, #tpu.memory_space<vmem>>, vector<27x13xbf16>
    %cst = arith.constant dense<0.000000e+00> : vector<512x13xf32>
    %2 = tpu.matmul %0, %1, %cst {dimension_numbers = #tpu.dot_dimension_numbers<[1], [0], [0], [1], [0, 0, 1, 1], [], []>} : vector<512x27xbf16>, vector<27x13xbf16>, vector<512x13xf32> -> vector<512x13xf32>
    %c0_3 = arith.constant 0 : index
    %c0_4 = arith.constant 0 : index
    %3 = vector.load %arg4[%c0_3, %c0_4] : memref<1x13xf32, #tpu.memory_space<vmem>>, vector<1x13xf32>
    %4 = vector.broadcast %3 : vector<1x13xf32> to vector<512x13xf32>
    %5 = arith.mulf %2, %4 : vector<512x13xf32>
    %c0_5 = arith.constant 0 : index
    %c0_6 = arith.constant 0 : index
    %6 = vector.load %arg5[%c0_5, %c0_6] : memref<1x13xf32, #tpu.memory_space<vmem>>, vector<1x13xf32>
    %7 = vector.broadcast %6 : vector<1x13xf32> to vector<512x13xf32>
    %8 = arith.addf %5, %7 : vector<512x13xf32>
    %cst_7 = arith.constant 0.000000e+00 : f32
    %9 = vector.broadcast %cst_7 : f32 to vector<512x13xf32>
    %10 = arith.maximumf %8, %9 : vector<512x13xf32>
    %c0_8 = arith.constant 0 : index
    %c0_9 = arith.constant 0 : index
    %c0_10 = arith.constant 0 : index
    %11 = vector.load %arg3[%c0_8, %c0_9, %c0_10] : memref<4x512x3xbf16, #tpu.memory_space<vmem>>, vector<1x512x3xbf16>
    %12 = vector.shape_cast %11 : vector<1x512x3xbf16> to vector<512x3xbf16>
    %13 = arith.extf %12 : vector<512x3xbf16> to vector<512x3xf32>
    %c1 = arith.constant 1 : index
    %c0_11 = arith.constant 0 : index
    %c0_12 = arith.constant 0 : index
    %14 = vector.load %arg3[%c1, %c0_11, %c0_12] : memref<4x512x3xbf16, #tpu.memory_space<vmem>>, vector<1x512x3xbf16>
    %15 = vector.shape_cast %14 : vector<1x512x3xbf16> to vector<512x3xbf16>
    %16 = arith.extf %15 : vector<512x3xbf16> to vector<512x3xf32>
    %17 = arith.maximumf %13, %16 : vector<512x3xf32>
    %c2 = arith.constant 2 : index
    %c0_13 = arith.constant 0 : index
    %c0_14 = arith.constant 0 : index
    %18 = vector.load %arg3[%c2, %c0_13, %c0_14] : memref<4x512x3xbf16, #tpu.memory_space<vmem>>, vector<1x512x3xbf16>
    %19 = vector.shape_cast %18 : vector<1x512x3xbf16> to vector<512x3xbf16>
    %20 = arith.extf %19 : vector<512x3xbf16> to vector<512x3xf32>
    %21 = arith.maximumf %17, %20 : vector<512x3xf32>
    %c3 = arith.constant 3 : index
    %c0_15 = arith.constant 0 : index
    %c0_16 = arith.constant 0 : index
    %22 = vector.load %arg3[%c3, %c0_15, %c0_16] : memref<4x512x3xbf16, #tpu.memory_space<vmem>>, vector<1x512x3xbf16>
    %23 = vector.shape_cast %22 : vector<1x512x3xbf16> to vector<512x3xbf16>
    %24 = arith.extf %23 : vector<512x3xbf16> to vector<512x3xf32>
    %25 = arith.maximumf %21, %24 : vector<512x3xf32>
    %c0_17 = arith.constant 0 : index
    %c0_18 = arith.constant 0 : index
    %26 = vector.load %arg6[%c0_17, %c0_18] : memref<1x3xf32, #tpu.memory_space<vmem>>, vector<1x3xf32>
    %27 = vector.broadcast %26 : vector<1x3xf32> to vector<512x3xf32>
    %28 = arith.mulf %25, %27 : vector<512x3xf32>
    %c0_19 = arith.constant 0 : index
    %c0_20 = arith.constant 0 : index
    %29 = vector.load %arg7[%c0_19, %c0_20] : memref<1x3xf32, #tpu.memory_space<vmem>>, vector<1x3xf32>
    %30 = vector.broadcast %29 : vector<1x3xf32> to vector<512x3xf32>
    %31 = arith.addf %28, %30 : vector<512x3xf32>
    %cst_21 = arith.constant 0.000000e+00 : f32
    %32 = vector.broadcast %cst_21 : f32 to vector<512x3xf32>
    %33 = arith.maximumf %31, %32 : vector<512x3xf32>
    %34 = arith.truncf %10 : vector<512x13xf32> to vector<512x13xbf16>
    %c0_22 = arith.constant 0 : index
    %c0_23 = arith.constant 0 : index
    %35 = vector.load %arg8[%c0_22, %c0_23] : memref<512x16xbf16, #tpu.memory_space<vmem>>, vector<512x13xbf16>
    tpu.vector_store %arg8[%c0_22, %c0_23], %34 {strides = array<i32>} : memref<512x16xbf16, #tpu.memory_space<vmem>>, vector<512x13xbf16>,
    %36 = arith.truncf %33 : vector<512x3xf32> to vector<512x3xbf16>
    %c0_24 = arith.constant 0 : index
    %c13 = arith.constant 13 : index
    %37 = vector.load %arg8[%c0_24, %c13] : memref<512x16xbf16, #tpu.memory_space<vmem>>, vector<512x3xbf16>
    tpu.vector_store %arg8[%c0_24, %c13], %36 {strides = array<i32>} : memref<512x16xbf16, #tpu.memory_space<vmem>>, vector<512x3xbf16>,
    return
  }
  func.func @transform_0(%arg0: i32) -> (i32, i32) {
    %c0_i32 = arith.constant 0 : i32
    %c0_i32_0 = arith.constant 0 : i32
    return %arg0, %c0_i32 : i32, i32
  }
  func.func @transform_1(%arg0: i32) -> (i32, i32) {
    %c0_i32 = arith.constant 0 : i32
    %c0_i32_0 = arith.constant 0 : i32
    %c0_i32_1 = arith.constant 0 : i32
    return %c0_i32, %c0_i32_0 : i32, i32
  }
  func.func @transform_2(%arg0: i32) -> (i32, i32, i32) {
    %c0_i32 = arith.constant 0 : i32
    %c0_i32_0 = arith.constant 0 : i32
    %c0_i32_1 = arith.constant 0 : i32
    return %c0_i32, %arg0, %c0_i32_0 : i32, i32, i32
  }
  func.func @transform_3(%arg0: i32) -> (i32, i32) {
    %c0_i32 = arith.constant 0 : i32
    %c0_i32_0 = arith.constant 0 : i32
    %c0_i32_1 = arith.constant 0 : i32
    return %c0_i32, %c0_i32_0 : i32, i32
  }
  func.func @transform_4(%arg0: i32) -> (i32, i32) {
    %c0_i32 = arith.constant 0 : i32
    %c0_i32_0 = arith.constant 0 : i32
    %c0_i32_1 = arith.constant 0 : i32
    return %c0_i32, %c0_i32_0 : i32, i32
  }
  func.func @transform_5(%arg0: i32) -> (i32, i32) {
    %c0_i32 = arith.constant 0 : i32
    %c0_i32_0 = arith.constant 0 : i32
    %c0_i32_1 = arith.constant 0 : i32
    return %c0_i32, %c0_i32_0 : i32, i32
  }
  func.func @transform_6(%arg0: i32) -> (i32, i32) {
    %c0_i32 = arith.constant 0 : i32
    %c0_i32_0 = arith.constant 0 : i32
    %c0_i32_1 = arith.constant 0 : i32
    return %c0_i32, %c0_i32_0 : i32, i32
  }
  func.func @transform_7(%arg0: i32) -> (i32, i32) {
    %c0_i32 = arith.constant 0 : i32
    %c0_i32_0 = arith.constant 0 : i32
    return %arg0, %c0_i32 : i32, i32
  }
}

module attributes {stable_mosaic.version = 11 : i64} {
  func.func @_down_kernel(%arg0: i32, %arg1: memref<128x144xbf16, #tpu.memory_space<vmem>>, %arg2: memref<144x48xbf16, #tpu.memory_space<vmem>>, %arg3: memref<4x128x16xbf16, #tpu.memory_space<vmem>>, %arg4: memref<1x48xf32, #tpu.memory_space<vmem>>, %arg5: memref<1x48xf32, #tpu.memory_space<vmem>>, %arg6: memref<1x16xf32, #tpu.memory_space<vmem>>, %arg7: memref<1x16xf32, #tpu.memory_space<vmem>>, %arg8: memref<128x64xbf16, #tpu.memory_space<vmem>>) attributes {dimension_semantics = [#tpu.dimension_semantics<parallel>], iteration_bounds = array<i64: 1>, scalar_prefetch = 0 : i64, scratch_operands = 0 : i64, tpu.core_type = #tpu.core_type<tc>, window_params = [{transform_indices = @transform_0, window_bounds = array<i64: 128, 144>}, {pipeline_mode = #tpu.pipeline_mode<synchronous>, transform_indices = @transform_1, window_bounds = array<i64: 144, 48>}, {transform_indices = @transform_2, window_bounds = array<i64: 4, 128, 16>}, {pipeline_mode = #tpu.pipeline_mode<synchronous>, transform_indices = @transform_3, window_bounds = array<i64: 1, 48>}, {pipeline_mode = #tpu.pipeline_mode<synchronous>, transform_indices = @transform_4, window_bounds = array<i64: 1, 48>}, {pipeline_mode = #tpu.pipeline_mode<synchronous>, transform_indices = @transform_5, window_bounds = array<i64: 1, 16>}, {pipeline_mode = #tpu.pipeline_mode<synchronous>, transform_indices = @transform_6, window_bounds = array<i64: 1, 16>}, {transform_indices = @transform_7, window_bounds = array<i64: 128, 64>}]} {
    %c0 = arith.constant 0 : index
    %c0_0 = arith.constant 0 : index
    %0 = vector.load %arg1[%c0, %c0_0] : memref<128x144xbf16, #tpu.memory_space<vmem>>, vector<128x144xbf16>
    %c0_1 = arith.constant 0 : index
    %c0_2 = arith.constant 0 : index
    %1 = vector.load %arg2[%c0_1, %c0_2] : memref<144x48xbf16, #tpu.memory_space<vmem>>, vector<144x48xbf16>
    %cst = arith.constant dense<0.000000e+00> : vector<128x48xf32>
    %2 = tpu.matmul %0, %1, %cst {dimension_numbers = #tpu.dot_dimension_numbers<[1], [0], [0], [1], [0, 0, 1, 1], [], []>} : vector<128x144xbf16>, vector<144x48xbf16>, vector<128x48xf32> -> vector<128x48xf32>
    %c0_3 = arith.constant 0 : index
    %c0_4 = arith.constant 0 : index
    %3 = vector.load %arg4[%c0_3, %c0_4] : memref<1x48xf32, #tpu.memory_space<vmem>>, vector<1x48xf32>
    %4 = vector.broadcast %3 : vector<1x48xf32> to vector<128x48xf32>
    %5 = arith.mulf %2, %4 : vector<128x48xf32>
    %c0_5 = arith.constant 0 : index
    %c0_6 = arith.constant 0 : index
    %6 = vector.load %arg5[%c0_5, %c0_6] : memref<1x48xf32, #tpu.memory_space<vmem>>, vector<1x48xf32>
    %7 = vector.broadcast %6 : vector<1x48xf32> to vector<128x48xf32>
    %8 = arith.addf %5, %7 : vector<128x48xf32>
    %cst_7 = arith.constant 0.000000e+00 : f32
    %9 = vector.broadcast %cst_7 : f32 to vector<128x48xf32>
    %10 = arith.maximumf %8, %9 : vector<128x48xf32>
    %c0_8 = arith.constant 0 : index
    %c0_9 = arith.constant 0 : index
    %c0_10 = arith.constant 0 : index
    %11 = vector.load %arg3[%c0_8, %c0_9, %c0_10] : memref<4x128x16xbf16, #tpu.memory_space<vmem>>, vector<1x128x16xbf16>
    %12 = vector.shape_cast %11 : vector<1x128x16xbf16> to vector<128x16xbf16>
    %13 = arith.extf %12 : vector<128x16xbf16> to vector<128x16xf32>
    %c1 = arith.constant 1 : index
    %c0_11 = arith.constant 0 : index
    %c0_12 = arith.constant 0 : index
    %14 = vector.load %arg3[%c1, %c0_11, %c0_12] : memref<4x128x16xbf16, #tpu.memory_space<vmem>>, vector<1x128x16xbf16>
    %15 = vector.shape_cast %14 : vector<1x128x16xbf16> to vector<128x16xbf16>
    %16 = arith.extf %15 : vector<128x16xbf16> to vector<128x16xf32>
    %17 = arith.maximumf %13, %16 : vector<128x16xf32>
    %c2 = arith.constant 2 : index
    %c0_13 = arith.constant 0 : index
    %c0_14 = arith.constant 0 : index
    %18 = vector.load %arg3[%c2, %c0_13, %c0_14] : memref<4x128x16xbf16, #tpu.memory_space<vmem>>, vector<1x128x16xbf16>
    %19 = vector.shape_cast %18 : vector<1x128x16xbf16> to vector<128x16xbf16>
    %20 = arith.extf %19 : vector<128x16xbf16> to vector<128x16xf32>
    %21 = arith.maximumf %17, %20 : vector<128x16xf32>
    %c3 = arith.constant 3 : index
    %c0_15 = arith.constant 0 : index
    %c0_16 = arith.constant 0 : index
    %22 = vector.load %arg3[%c3, %c0_15, %c0_16] : memref<4x128x16xbf16, #tpu.memory_space<vmem>>, vector<1x128x16xbf16>
    %23 = vector.shape_cast %22 : vector<1x128x16xbf16> to vector<128x16xbf16>
    %24 = arith.extf %23 : vector<128x16xbf16> to vector<128x16xf32>
    %25 = arith.maximumf %21, %24 : vector<128x16xf32>
    %c0_17 = arith.constant 0 : index
    %c0_18 = arith.constant 0 : index
    %26 = vector.load %arg6[%c0_17, %c0_18] : memref<1x16xf32, #tpu.memory_space<vmem>>, vector<1x16xf32>
    %27 = vector.broadcast %26 : vector<1x16xf32> to vector<128x16xf32>
    %28 = arith.mulf %25, %27 : vector<128x16xf32>
    %c0_19 = arith.constant 0 : index
    %c0_20 = arith.constant 0 : index
    %29 = vector.load %arg7[%c0_19, %c0_20] : memref<1x16xf32, #tpu.memory_space<vmem>>, vector<1x16xf32>
    %30 = vector.broadcast %29 : vector<1x16xf32> to vector<128x16xf32>
    %31 = arith.addf %28, %30 : vector<128x16xf32>
    %cst_21 = arith.constant 0.000000e+00 : f32
    %32 = vector.broadcast %cst_21 : f32 to vector<128x16xf32>
    %33 = arith.maximumf %31, %32 : vector<128x16xf32>
    %34 = arith.truncf %10 : vector<128x48xf32> to vector<128x48xbf16>
    %c0_22 = arith.constant 0 : index
    %c0_23 = arith.constant 0 : index
    %35 = vector.load %arg8[%c0_22, %c0_23] : memref<128x64xbf16, #tpu.memory_space<vmem>>, vector<128x48xbf16>
    tpu.vector_store %arg8[%c0_22, %c0_23], %34 {strides = array<i32>} : memref<128x64xbf16, #tpu.memory_space<vmem>>, vector<128x48xbf16>,
    %36 = arith.truncf %33 : vector<128x16xf32> to vector<128x16xbf16>
    %c0_24 = arith.constant 0 : index
    %c48 = arith.constant 48 : index
    %37 = vector.load %arg8[%c0_24, %c48] : memref<128x64xbf16, #tpu.memory_space<vmem>>, vector<128x16xbf16>
    tpu.vector_store %arg8[%c0_24, %c48], %36 {strides = array<i32>} : memref<128x64xbf16, #tpu.memory_space<vmem>>, vector<128x16xbf16>,
    return
  }
  func.func @transform_0(%arg0: i32) -> (i32, i32) {
    %c0_i32 = arith.constant 0 : i32
    %c0_i32_0 = arith.constant 0 : i32
    return %arg0, %c0_i32 : i32, i32
  }
  func.func @transform_1(%arg0: i32) -> (i32, i32) {
    %c0_i32 = arith.constant 0 : i32
    %c0_i32_0 = arith.constant 0 : i32
    %c0_i32_1 = arith.constant 0 : i32
    return %c0_i32, %c0_i32_0 : i32, i32
  }
  func.func @transform_2(%arg0: i32) -> (i32, i32, i32) {
    %c0_i32 = arith.constant 0 : i32
    %c0_i32_0 = arith.constant 0 : i32
    %c0_i32_1 = arith.constant 0 : i32
    return %c0_i32, %arg0, %c0_i32_0 : i32, i32, i32
  }
  func.func @transform_3(%arg0: i32) -> (i32, i32) {
    %c0_i32 = arith.constant 0 : i32
    %c0_i32_0 = arith.constant 0 : i32
    %c0_i32_1 = arith.constant 0 : i32
    return %c0_i32, %c0_i32_0 : i32, i32
  }
  func.func @transform_4(%arg0: i32) -> (i32, i32) {
    %c0_i32 = arith.constant 0 : i32
    %c0_i32_0 = arith.constant 0 : i32
    %c0_i32_1 = arith.constant 0 : i32
    return %c0_i32, %c0_i32_0 : i32, i32
  }
  func.func @transform_5(%arg0: i32) -> (i32, i32) {
    %c0_i32 = arith.constant 0 : i32
    %c0_i32_0 = arith.constant 0 : i32
    %c0_i32_1 = arith.constant 0 : i32
    return %c0_i32, %c0_i32_0 : i32, i32
  }
  func.func @transform_6(%arg0: i32) -> (i32, i32) {
    %c0_i32 = arith.constant 0 : i32
    %c0_i32_0 = arith.constant 0 : i32
    %c0_i32_1 = arith.constant 0 : i32
    return %c0_i32, %c0_i32_0 : i32, i32
  }
  func.func @transform_7(%arg0: i32) -> (i32, i32) {
    %c0_i32 = arith.constant 0 : i32
    %c0_i32_0 = arith.constant 0 : i32
    return %arg0, %c0_i32 : i32, i32
  }
}

module attributes {stable_mosaic.version = 11 : i64} {
  func.func @_conv_kernel(%arg0: i32, %arg1: memref<128x192xbf16, #tpu.memory_space<vmem>>, %arg2: memref<192x64xbf16, #tpu.memory_space<vmem>>, %arg3: memref<1x64xf32, #tpu.memory_space<vmem>>, %arg4: memref<128x64xbf16, #tpu.memory_space<vmem>>) attributes {dimension_semantics = [#tpu.dimension_semantics<parallel>], iteration_bounds = array<i64: 1>, scalar_prefetch = 0 : i64, scratch_operands = 0 : i64, tpu.core_type = #tpu.core_type<tc>, window_params = [{transform_indices = @transform_0, window_bounds = array<i64: 128, 192>}, {pipeline_mode = #tpu.pipeline_mode<synchronous>, transform_indices = @transform_1, window_bounds = array<i64: 192, 64>}, {pipeline_mode = #tpu.pipeline_mode<synchronous>, transform_indices = @transform_2, window_bounds = array<i64: 1, 64>}, {transform_indices = @transform_3, window_bounds = array<i64: 128, 64>}]} {
    %c0 = arith.constant 0 : index
    %c0_0 = arith.constant 0 : index
    %0 = vector.load %arg1[%c0, %c0_0] : memref<128x192xbf16, #tpu.memory_space<vmem>>, vector<128x192xbf16>
    %c0_1 = arith.constant 0 : index
    %c0_2 = arith.constant 0 : index
    %1 = vector.load %arg2[%c0_1, %c0_2] : memref<192x64xbf16, #tpu.memory_space<vmem>>, vector<192x64xbf16>
    %cst = arith.constant dense<0.000000e+00> : vector<128x64xf32>
    %2 = tpu.matmul %0, %1, %cst {dimension_numbers = #tpu.dot_dimension_numbers<[1], [0], [0], [1], [0, 0, 1, 1], [], []>} : vector<128x192xbf16>, vector<192x64xbf16>, vector<128x64xf32> -> vector<128x64xf32>
    %c0_3 = arith.constant 0 : index
    %c0_4 = arith.constant 0 : index
    %3 = vector.load %arg3[%c0_3, %c0_4] : memref<1x64xf32, #tpu.memory_space<vmem>>, vector<1x64xf32>
    %4 = vector.broadcast %3 : vector<1x64xf32> to vector<128x64xf32>
    %5 = arith.addf %2, %4 : vector<128x64xf32>
    %cst_5 = arith.constant 0.000000e+00 : f32
    %6 = vector.broadcast %cst_5 : f32 to vector<128x64xf32>
    %7 = arith.maximumf %5, %6 : vector<128x64xf32>
    %8 = arith.truncf %7 : vector<128x64xf32> to vector<128x64xbf16>
    %c0_6 = arith.constant 0 : index
    %c0_7 = arith.constant 0 : index
    %9 = vector.load %arg4[%c0_6, %c0_7] : memref<128x64xbf16, #tpu.memory_space<vmem>>, vector<128x64xbf16>
    tpu.vector_store %arg4[%c0_6, %c0_7], %8 {strides = array<i32>} : memref<128x64xbf16, #tpu.memory_space<vmem>>, vector<128x64xbf16>,
    return
  }
  func.func @transform_0(%arg0: i32) -> (i32, i32) {
    %c0_i32 = arith.constant 0 : i32
    %c0_i32_0 = arith.constant 0 : i32
    return %arg0, %c0_i32 : i32, i32
  }
  func.func @transform_1(%arg0: i32) -> (i32, i32) {
    %c0_i32 = arith.constant 0 : i32
    %c0_i32_0 = arith.constant 0 : i32
    %c0_i32_1 = arith.constant 0 : i32
    return %c0_i32, %c0_i32_0 : i32, i32
  }
  func.func @transform_2(%arg0: i32) -> (i32, i32) {
    %c0_i32 = arith.constant 0 : i32
    %c0_i32_0 = arith.constant 0 : i32
    %c0_i32_1 = arith.constant 0 : i32
    return %c0_i32, %c0_i32_0 : i32, i32
  }
  func.func @transform_3(%arg0: i32) -> (i32, i32) {
    %c0_i32 = arith.constant 0 : i32
    %c0_i32_0 = arith.constant 0 : i32
    return %arg0, %c0_i32 : i32, i32
  }
}

module attributes {stable_mosaic.version = 11 : i64} {
  func.func @_conv_kernel(%arg0: i32, %arg1: memref<128x192xbf16, #tpu.memory_space<vmem>>, %arg2: memref<192x64xbf16, #tpu.memory_space<vmem>>, %arg3: memref<1x64xf32, #tpu.memory_space<vmem>>, %arg4: memref<1x64xf32, #tpu.memory_space<vmem>>, %arg5: memref<128x64xbf16, #tpu.memory_space<vmem>>) attributes {dimension_semantics = [#tpu.dimension_semantics<parallel>], iteration_bounds = array<i64: 1>, scalar_prefetch = 0 : i64, scratch_operands = 0 : i64, tpu.core_type = #tpu.core_type<tc>, window_params = [{transform_indices = @transform_0, window_bounds = array<i64: 128, 192>}, {pipeline_mode = #tpu.pipeline_mode<synchronous>, transform_indices = @transform_1, window_bounds = array<i64: 192, 64>}, {pipeline_mode = #tpu.pipeline_mode<synchronous>, transform_indices = @transform_2, window_bounds = array<i64: 1, 64>}, {pipeline_mode = #tpu.pipeline_mode<synchronous>, transform_indices = @transform_3, window_bounds = array<i64: 1, 64>}, {transform_indices = @transform_4, window_bounds = array<i64: 128, 64>}]} {
    %c0 = arith.constant 0 : index
    %c0_0 = arith.constant 0 : index
    %0 = vector.load %arg1[%c0, %c0_0] : memref<128x192xbf16, #tpu.memory_space<vmem>>, vector<128x192xbf16>
    %c0_1 = arith.constant 0 : index
    %c0_2 = arith.constant 0 : index
    %1 = vector.load %arg2[%c0_1, %c0_2] : memref<192x64xbf16, #tpu.memory_space<vmem>>, vector<192x64xbf16>
    %cst = arith.constant dense<0.000000e+00> : vector<128x64xf32>
    %2 = tpu.matmul %0, %1, %cst {dimension_numbers = #tpu.dot_dimension_numbers<[1], [0], [0], [1], [0, 0, 1, 1], [], []>} : vector<128x192xbf16>, vector<192x64xbf16>, vector<128x64xf32> -> vector<128x64xf32>
    %c0_3 = arith.constant 0 : index
    %c0_4 = arith.constant 0 : index
    %3 = vector.load %arg4[%c0_3, %c0_4] : memref<1x64xf32, #tpu.memory_space<vmem>>, vector<1x64xf32>
    %4 = vector.broadcast %3 : vector<1x64xf32> to vector<128x64xf32>
    %5 = arith.mulf %2, %4 : vector<128x64xf32>
    %c0_5 = arith.constant 0 : index
    %c0_6 = arith.constant 0 : index
    %6 = vector.load %arg3[%c0_5, %c0_6] : memref<1x64xf32, #tpu.memory_space<vmem>>, vector<1x64xf32>
    %7 = vector.broadcast %6 : vector<1x64xf32> to vector<128x64xf32>
    %8 = arith.addf %5, %7 : vector<128x64xf32>
    %cst_7 = arith.constant 0.000000e+00 : f32
    %9 = vector.broadcast %cst_7 : f32 to vector<128x64xf32>
    %10 = arith.maximumf %8, %9 : vector<128x64xf32>
    %11 = arith.truncf %10 : vector<128x64xf32> to vector<128x64xbf16>
    %c0_8 = arith.constant 0 : index
    %c0_9 = arith.constant 0 : index
    %12 = vector.load %arg5[%c0_8, %c0_9] : memref<128x64xbf16, #tpu.memory_space<vmem>>, vector<128x64xbf16>
    tpu.vector_store %arg5[%c0_8, %c0_9], %11 {strides = array<i32>} : memref<128x64xbf16, #tpu.memory_space<vmem>>, vector<128x64xbf16>,
    return
  }
  func.func @transform_0(%arg0: i32) -> (i32, i32) {
    %c0_i32 = arith.constant 0 : i32
    %c0_i32_0 = arith.constant 0 : i32
    return %arg0, %c0_i32 : i32, i32
  }
  func.func @transform_1(%arg0: i32) -> (i32, i32) {
    %c0_i32 = arith.constant 0 : i32
    %c0_i32_0 = arith.constant 0 : i32
    %c0_i32_1 = arith.constant 0 : i32
    return %c0_i32, %c0_i32_0 : i32, i32
  }
  func.func @transform_2(%arg0: i32) -> (i32, i32) {
    %c0_i32 = arith.constant 0 : i32
    %c0_i32_0 = arith.constant 0 : i32
    %c0_i32_1 = arith.constant 0 : i32
    return %c0_i32, %c0_i32_0 : i32, i32
  }
  func.func @transform_3(%arg0: i32) -> (i32, i32) {
    %c0_i32 = arith.constant 0 : i32
    %c0_i32_0 = arith.constant 0 : i32
    %c0_i32_1 = arith.constant 0 : i32
    return %c0_i32, %c0_i32_0 : i32, i32
  }
  func.func @transform_4(%arg0: i32) -> (i32, i32) {
    %c0_i32 = arith.constant 0 : i32
    %c0_i32_0 = arith.constant 0 : i32
    return %arg0, %c0_i32 : i32, i32
  }
}

module attributes {stable_mosaic.version = 11 : i64} {
  func.func @_conv_kernel(%arg0: i32, %arg1: memref<128x192xbf16, #tpu.memory_space<vmem>>, %arg2: memref<192x64xbf16, #tpu.memory_space<vmem>>, %arg3: memref<1x64xf32, #tpu.memory_space<vmem>>, %arg4: memref<1x64xf32, #tpu.memory_space<vmem>>, %arg5: memref<128x64xbf16, #tpu.memory_space<vmem>>, %arg6: memref<128x64xbf16, #tpu.memory_space<vmem>>) attributes {dimension_semantics = [#tpu.dimension_semantics<parallel>], iteration_bounds = array<i64: 1>, scalar_prefetch = 0 : i64, scratch_operands = 0 : i64, tpu.core_type = #tpu.core_type<tc>, window_params = [{transform_indices = @transform_0, window_bounds = array<i64: 128, 192>}, {pipeline_mode = #tpu.pipeline_mode<synchronous>, transform_indices = @transform_1, window_bounds = array<i64: 192, 64>}, {pipeline_mode = #tpu.pipeline_mode<synchronous>, transform_indices = @transform_2, window_bounds = array<i64: 1, 64>}, {pipeline_mode = #tpu.pipeline_mode<synchronous>, transform_indices = @transform_3, window_bounds = array<i64: 1, 64>}, {transform_indices = @transform_4, window_bounds = array<i64: 128, 64>}, {transform_indices = @transform_5, window_bounds = array<i64: 128, 64>}]} {
    %c0 = arith.constant 0 : index
    %c0_0 = arith.constant 0 : index
    %0 = vector.load %arg1[%c0, %c0_0] : memref<128x192xbf16, #tpu.memory_space<vmem>>, vector<128x192xbf16>
    %c0_1 = arith.constant 0 : index
    %c0_2 = arith.constant 0 : index
    %1 = vector.load %arg2[%c0_1, %c0_2] : memref<192x64xbf16, #tpu.memory_space<vmem>>, vector<192x64xbf16>
    %cst = arith.constant dense<0.000000e+00> : vector<128x64xf32>
    %2 = tpu.matmul %0, %1, %cst {dimension_numbers = #tpu.dot_dimension_numbers<[1], [0], [0], [1], [0, 0, 1, 1], [], []>} : vector<128x192xbf16>, vector<192x64xbf16>, vector<128x64xf32> -> vector<128x64xf32>
    %c0_3 = arith.constant 0 : index
    %c0_4 = arith.constant 0 : index
    %3 = vector.load %arg4[%c0_3, %c0_4] : memref<1x64xf32, #tpu.memory_space<vmem>>, vector<1x64xf32>
    %4 = vector.broadcast %3 : vector<1x64xf32> to vector<128x64xf32>
    %5 = arith.mulf %2, %4 : vector<128x64xf32>
    %c0_5 = arith.constant 0 : index
    %c0_6 = arith.constant 0 : index
    %6 = vector.load %arg3[%c0_5, %c0_6] : memref<1x64xf32, #tpu.memory_space<vmem>>, vector<1x64xf32>
    %7 = vector.broadcast %6 : vector<1x64xf32> to vector<128x64xf32>
    %8 = arith.addf %5, %7 : vector<128x64xf32>
    %c0_7 = arith.constant 0 : index
    %c0_8 = arith.constant 0 : index
    %9 = vector.load %arg5[%c0_7, %c0_8] : memref<128x64xbf16, #tpu.memory_space<vmem>>, vector<128x64xbf16>
    %10 = arith.extf %9 : vector<128x64xbf16> to vector<128x64xf32>
    %11 = arith.addf %8, %10 : vector<128x64xf32>
    %cst_9 = arith.constant 0.000000e+00 : f32
    %12 = vector.broadcast %cst_9 : f32 to vector<128x64xf32>
    %13 = arith.maximumf %11, %12 : vector<128x64xf32>
    %14 = arith.truncf %13 : vector<128x64xf32> to vector<128x64xbf16>
    %c0_10 = arith.constant 0 : index
    %c0_11 = arith.constant 0 : index
    %15 = vector.load %arg6[%c0_10, %c0_11] : memref<128x64xbf16, #tpu.memory_space<vmem>>, vector<128x64xbf16>
    tpu.vector_store %arg6[%c0_10, %c0_11], %14 {strides = array<i32>} : memref<128x64xbf16, #tpu.memory_space<vmem>>, vector<128x64xbf16>,
    return
  }
  func.func @transform_0(%arg0: i32) -> (i32, i32) {
    %c0_i32 = arith.constant 0 : i32
    %c0_i32_0 = arith.constant 0 : i32
    return %arg0, %c0_i32 : i32, i32
  }
  func.func @transform_1(%arg0: i32) -> (i32, i32) {
    %c0_i32 = arith.constant 0 : i32
    %c0_i32_0 = arith.constant 0 : i32
    %c0_i32_1 = arith.constant 0 : i32
    return %c0_i32, %c0_i32_0 : i32, i32
  }
  func.func @transform_2(%arg0: i32) -> (i32, i32) {
    %c0_i32 = arith.constant 0 : i32
    %c0_i32_0 = arith.constant 0 : i32
    %c0_i32_1 = arith.constant 0 : i32
    return %c0_i32, %c0_i32_0 : i32, i32
  }
  func.func @transform_3(%arg0: i32) -> (i32, i32) {
    %c0_i32 = arith.constant 0 : i32
    %c0_i32_0 = arith.constant 0 : i32
    %c0_i32_1 = arith.constant 0 : i32
    return %c0_i32, %c0_i32_0 : i32, i32
  }
  func.func @transform_4(%arg0: i32) -> (i32, i32) {
    %c0_i32 = arith.constant 0 : i32
    %c0_i32_0 = arith.constant 0 : i32
    return %arg0, %c0_i32 : i32, i32
  }
  func.func @transform_5(%arg0: i32) -> (i32, i32) {
    %c0_i32 = arith.constant 0 : i32
    %c0_i32_0 = arith.constant 0 : i32
    return %arg0, %c0_i32 : i32, i32
  }
}

module attributes {stable_mosaic.version = 11 : i64} {
  func.func @_down_kernel(%arg0: i32, %arg1: memref<32x576xbf16, #tpu.memory_space<vmem>>, %arg2: memref<576x64xbf16, #tpu.memory_space<vmem>>, %arg3: memref<4x32x64xbf16, #tpu.memory_space<vmem>>, %arg4: memref<1x64xf32, #tpu.memory_space<vmem>>, %arg5: memref<1x64xf32, #tpu.memory_space<vmem>>, %arg6: memref<1x64xf32, #tpu.memory_space<vmem>>, %arg7: memref<1x64xf32, #tpu.memory_space<vmem>>, %arg8: memref<32x128xbf16, #tpu.memory_space<vmem>>) attributes {dimension_semantics = [#tpu.dimension_semantics<parallel>], iteration_bounds = array<i64: 1>, scalar_prefetch = 0 : i64, scratch_operands = 0 : i64, tpu.core_type = #tpu.core_type<tc>, window_params = [{transform_indices = @transform_0, window_bounds = array<i64: 32, 576>}, {pipeline_mode = #tpu.pipeline_mode<synchronous>, transform_indices = @transform_1, window_bounds = array<i64: 576, 64>}, {transform_indices = @transform_2, window_bounds = array<i64: 4, 32, 64>}, {pipeline_mode = #tpu.pipeline_mode<synchronous>, transform_indices = @transform_3, window_bounds = array<i64: 1, 64>}, {pipeline_mode = #tpu.pipeline_mode<synchronous>, transform_indices = @transform_4, window_bounds = array<i64: 1, 64>}, {pipeline_mode = #tpu.pipeline_mode<synchronous>, transform_indices = @transform_5, window_bounds = array<i64: 1, 64>}, {pipeline_mode = #tpu.pipeline_mode<synchronous>, transform_indices = @transform_6, window_bounds = array<i64: 1, 64>}, {transform_indices = @transform_7, window_bounds = array<i64: 32, 128>}]} {
    %c0 = arith.constant 0 : index
    %c0_0 = arith.constant 0 : index
    %0 = vector.load %arg1[%c0, %c0_0] : memref<32x576xbf16, #tpu.memory_space<vmem>>, vector<32x576xbf16>
    %c0_1 = arith.constant 0 : index
    %c0_2 = arith.constant 0 : index
    %1 = vector.load %arg2[%c0_1, %c0_2] : memref<576x64xbf16, #tpu.memory_space<vmem>>, vector<576x64xbf16>
    %cst = arith.constant dense<0.000000e+00> : vector<32x64xf32>
    %2 = tpu.matmul %0, %1, %cst {dimension_numbers = #tpu.dot_dimension_numbers<[1], [0], [0], [1], [0, 0, 1, 1], [], []>} : vector<32x576xbf16>, vector<576x64xbf16>, vector<32x64xf32> -> vector<32x64xf32>
    %c0_3 = arith.constant 0 : index
    %c0_4 = arith.constant 0 : index
    %3 = vector.load %arg4[%c0_3, %c0_4] : memref<1x64xf32, #tpu.memory_space<vmem>>, vector<1x64xf32>
    %4 = vector.broadcast %3 : vector<1x64xf32> to vector<32x64xf32>
    %5 = arith.mulf %2, %4 : vector<32x64xf32>
    %c0_5 = arith.constant 0 : index
    %c0_6 = arith.constant 0 : index
    %6 = vector.load %arg5[%c0_5, %c0_6] : memref<1x64xf32, #tpu.memory_space<vmem>>, vector<1x64xf32>
    %7 = vector.broadcast %6 : vector<1x64xf32> to vector<32x64xf32>
    %8 = arith.addf %5, %7 : vector<32x64xf32>
    %cst_7 = arith.constant 0.000000e+00 : f32
    %9 = vector.broadcast %cst_7 : f32 to vector<32x64xf32>
    %10 = arith.maximumf %8, %9 : vector<32x64xf32>
    %c0_8 = arith.constant 0 : index
    %c0_9 = arith.constant 0 : index
    %c0_10 = arith.constant 0 : index
    %11 = vector.load %arg3[%c0_8, %c0_9, %c0_10] : memref<4x32x64xbf16, #tpu.memory_space<vmem>>, vector<1x32x64xbf16>
    %12 = vector.shape_cast %11 : vector<1x32x64xbf16> to vector<32x64xbf16>
    %13 = arith.extf %12 : vector<32x64xbf16> to vector<32x64xf32>
    %c1 = arith.constant 1 : index
    %c0_11 = arith.constant 0 : index
    %c0_12 = arith.constant 0 : index
    %14 = vector.load %arg3[%c1, %c0_11, %c0_12] : memref<4x32x64xbf16, #tpu.memory_space<vmem>>, vector<1x32x64xbf16>
    %15 = vector.shape_cast %14 : vector<1x32x64xbf16> to vector<32x64xbf16>
    %16 = arith.extf %15 : vector<32x64xbf16> to vector<32x64xf32>
    %17 = arith.maximumf %13, %16 : vector<32x64xf32>
    %c2 = arith.constant 2 : index
    %c0_13 = arith.constant 0 : index
    %c0_14 = arith.constant 0 : index
    %18 = vector.load %arg3[%c2, %c0_13, %c0_14] : memref<4x32x64xbf16, #tpu.memory_space<vmem>>, vector<1x32x64xbf16>
    %19 = vector.shape_cast %18 : vector<1x32x64xbf16> to vector<32x64xbf16>
    %20 = arith.extf %19 : vector<32x64xbf16> to vector<32x64xf32>
    %21 = arith.maximumf %17, %20 : vector<32x64xf32>
    %c3 = arith.constant 3 : index
    %c0_15 = arith.constant 0 : index
    %c0_16 = arith.constant 0 : index
    %22 = vector.load %arg3[%c3, %c0_15, %c0_16] : memref<4x32x64xbf16, #tpu.memory_space<vmem>>, vector<1x32x64xbf16>
    %23 = vector.shape_cast %22 : vector<1x32x64xbf16> to vector<32x64xbf16>
    %24 = arith.extf %23 : vector<32x64xbf16> to vector<32x64xf32>
    %25 = arith.maximumf %21, %24 : vector<32x64xf32>
    %c0_17 = arith.constant 0 : index
    %c0_18 = arith.constant 0 : index
    %26 = vector.load %arg6[%c0_17, %c0_18] : memref<1x64xf32, #tpu.memory_space<vmem>>, vector<1x64xf32>
    %27 = vector.broadcast %26 : vector<1x64xf32> to vector<32x64xf32>
    %28 = arith.mulf %25, %27 : vector<32x64xf32>
    %c0_19 = arith.constant 0 : index
    %c0_20 = arith.constant 0 : index
    %29 = vector.load %arg7[%c0_19, %c0_20] : memref<1x64xf32, #tpu.memory_space<vmem>>, vector<1x64xf32>
    %30 = vector.broadcast %29 : vector<1x64xf32> to vector<32x64xf32>
    %31 = arith.addf %28, %30 : vector<32x64xf32>
    %cst_21 = arith.constant 0.000000e+00 : f32
    %32 = vector.broadcast %cst_21 : f32 to vector<32x64xf32>
    %33 = arith.maximumf %31, %32 : vector<32x64xf32>
    %34 = arith.truncf %10 : vector<32x64xf32> to vector<32x64xbf16>
    %c0_22 = arith.constant 0 : index
    %c0_23 = arith.constant 0 : index
    %35 = vector.load %arg8[%c0_22, %c0_23] : memref<32x128xbf16, #tpu.memory_space<vmem>>, vector<32x64xbf16>
    tpu.vector_store %arg8[%c0_22, %c0_23], %34 {strides = array<i32>} : memref<32x128xbf16, #tpu.memory_space<vmem>>, vector<32x64xbf16>,
    %36 = arith.truncf %33 : vector<32x64xf32> to vector<32x64xbf16>
    %c0_24 = arith.constant 0 : index
    %c64 = arith.constant 64 : index
    %37 = vector.load %arg8[%c0_24, %c64] : memref<32x128xbf16, #tpu.memory_space<vmem>>, vector<32x64xbf16>
    tpu.vector_store %arg8[%c0_24, %c64], %36 {strides = array<i32>} : memref<32x128xbf16, #tpu.memory_space<vmem>>, vector<32x64xbf16>,
    return
  }
  func.func @transform_0(%arg0: i32) -> (i32, i32) {
    %c0_i32 = arith.constant 0 : i32
    %c0_i32_0 = arith.constant 0 : i32
    return %arg0, %c0_i32 : i32, i32
  }
  func.func @transform_1(%arg0: i32) -> (i32, i32) {
    %c0_i32 = arith.constant 0 : i32
    %c0_i32_0 = arith.constant 0 : i32
    %c0_i32_1 = arith.constant 0 : i32
    return %c0_i32, %c0_i32_0 : i32, i32
  }
  func.func @transform_2(%arg0: i32) -> (i32, i32, i32) {
    %c0_i32 = arith.constant 0 : i32
    %c0_i32_0 = arith.constant 0 : i32
    %c0_i32_1 = arith.constant 0 : i32
    return %c0_i32, %arg0, %c0_i32_0 : i32, i32, i32
  }
  func.func @transform_3(%arg0: i32) -> (i32, i32) {
    %c0_i32 = arith.constant 0 : i32
    %c0_i32_0 = arith.constant 0 : i32
    %c0_i32_1 = arith.constant 0 : i32
    return %c0_i32, %c0_i32_0 : i32, i32
  }
  func.func @transform_4(%arg0: i32) -> (i32, i32) {
    %c0_i32 = arith.constant 0 : i32
    %c0_i32_0 = arith.constant 0 : i32
    %c0_i32_1 = arith.constant 0 : i32
    return %c0_i32, %c0_i32_0 : i32, i32
  }
  func.func @transform_5(%arg0: i32) -> (i32, i32) {
    %c0_i32 = arith.constant 0 : i32
    %c0_i32_0 = arith.constant 0 : i32
    %c0_i32_1 = arith.constant 0 : i32
    return %c0_i32, %c0_i32_0 : i32, i32
  }
  func.func @transform_6(%arg0: i32) -> (i32, i32) {
    %c0_i32 = arith.constant 0 : i32
    %c0_i32_0 = arith.constant 0 : i32
    %c0_i32_1 = arith.constant 0 : i32
    return %c0_i32, %c0_i32_0 : i32, i32
  }
  func.func @transform_7(%arg0: i32) -> (i32, i32) {
    %c0_i32 = arith.constant 0 : i32
    %c0_i32_0 = arith.constant 0 : i32
    return %arg0, %c0_i32 : i32, i32
  }
}

module attributes {stable_mosaic.version = 11 : i64} {
  func.func @_conv_kernel(%arg0: i32, %arg1: memref<32x384xbf16, #tpu.memory_space<vmem>>, %arg2: memref<384x128xbf16, #tpu.memory_space<vmem>>, %arg3: memref<1x128xf32, #tpu.memory_space<vmem>>, %arg4: memref<32x128xbf16, #tpu.memory_space<vmem>>) attributes {dimension_semantics = [#tpu.dimension_semantics<parallel>], iteration_bounds = array<i64: 1>, scalar_prefetch = 0 : i64, scratch_operands = 0 : i64, tpu.core_type = #tpu.core_type<tc>, window_params = [{transform_indices = @transform_0, window_bounds = array<i64: 32, 384>}, {pipeline_mode = #tpu.pipeline_mode<synchronous>, transform_indices = @transform_1, window_bounds = array<i64: 384, 128>}, {pipeline_mode = #tpu.pipeline_mode<synchronous>, transform_indices = @transform_2, window_bounds = array<i64: 1, 128>}, {transform_indices = @transform_3, window_bounds = array<i64: 32, 128>}]} {
    %c0 = arith.constant 0 : index
    %c0_0 = arith.constant 0 : index
    %0 = vector.load %arg1[%c0, %c0_0] : memref<32x384xbf16, #tpu.memory_space<vmem>>, vector<32x384xbf16>
    %c0_1 = arith.constant 0 : index
    %c0_2 = arith.constant 0 : index
    %1 = vector.load %arg2[%c0_1, %c0_2] : memref<384x128xbf16, #tpu.memory_space<vmem>>, vector<384x128xbf16>
    %cst = arith.constant dense<0.000000e+00> : vector<32x128xf32>
    %2 = tpu.matmul %0, %1, %cst {dimension_numbers = #tpu.dot_dimension_numbers<[1], [0], [0], [1], [0, 0, 1, 1], [], []>} : vector<32x384xbf16>, vector<384x128xbf16>, vector<32x128xf32> -> vector<32x128xf32>
    %c0_3 = arith.constant 0 : index
    %c0_4 = arith.constant 0 : index
    %3 = vector.load %arg3[%c0_3, %c0_4] : memref<1x128xf32, #tpu.memory_space<vmem>>, vector<1x128xf32>
    %4 = vector.broadcast %3 : vector<1x128xf32> to vector<32x128xf32>
    %5 = arith.addf %2, %4 : vector<32x128xf32>
    %cst_5 = arith.constant 0.000000e+00 : f32
    %6 = vector.broadcast %cst_5 : f32 to vector<32x128xf32>
    %7 = arith.maximumf %5, %6 : vector<32x128xf32>
    %8 = arith.truncf %7 : vector<32x128xf32> to vector<32x128xbf16>
    %c0_6 = arith.constant 0 : index
    %c0_7 = arith.constant 0 : index
    %9 = vector.load %arg4[%c0_6, %c0_7] : memref<32x128xbf16, #tpu.memory_space<vmem>>, vector<32x128xbf16>
    tpu.vector_store %arg4[%c0_6, %c0_7], %8 {strides = array<i32>} : memref<32x128xbf16, #tpu.memory_space<vmem>>, vector<32x128xbf16>,
    return
  }
  func.func @transform_0(%arg0: i32) -> (i32, i32) {
    %c0_i32 = arith.constant 0 : i32
    %c0_i32_0 = arith.constant 0 : i32
    return %arg0, %c0_i32 : i32, i32
  }
  func.func @transform_1(%arg0: i32) -> (i32, i32) {
    %c0_i32 = arith.constant 0 : i32
    %c0_i32_0 = arith.constant 0 : i32
    %c0_i32_1 = arith.constant 0 : i32
    return %c0_i32, %c0_i32_0 : i32, i32
  }
  func.func @transform_2(%arg0: i32) -> (i32, i32) {
    %c0_i32 = arith.constant 0 : i32
    %c0_i32_0 = arith.constant 0 : i32
    %c0_i32_1 = arith.constant 0 : i32
    return %c0_i32, %c0_i32_0 : i32, i32
  }
  func.func @transform_3(%arg0: i32) -> (i32, i32) {
    %c0_i32 = arith.constant 0 : i32
    %c0_i32_0 = arith.constant 0 : i32
    return %arg0, %c0_i32 : i32, i32
  }
}

module attributes {stable_mosaic.version = 11 : i64} {
  func.func @_conv_kernel(%arg0: i32, %arg1: memref<32x384xbf16, #tpu.memory_space<vmem>>, %arg2: memref<384x128xbf16, #tpu.memory_space<vmem>>, %arg3: memref<1x128xf32, #tpu.memory_space<vmem>>, %arg4: memref<1x128xf32, #tpu.memory_space<vmem>>, %arg5: memref<32x128xbf16, #tpu.memory_space<vmem>>) attributes {dimension_semantics = [#tpu.dimension_semantics<parallel>], iteration_bounds = array<i64: 1>, scalar_prefetch = 0 : i64, scratch_operands = 0 : i64, tpu.core_type = #tpu.core_type<tc>, window_params = [{transform_indices = @transform_0, window_bounds = array<i64: 32, 384>}, {pipeline_mode = #tpu.pipeline_mode<synchronous>, transform_indices = @transform_1, window_bounds = array<i64: 384, 128>}, {pipeline_mode = #tpu.pipeline_mode<synchronous>, transform_indices = @transform_2, window_bounds = array<i64: 1, 128>}, {pipeline_mode = #tpu.pipeline_mode<synchronous>, transform_indices = @transform_3, window_bounds = array<i64: 1, 128>}, {transform_indices = @transform_4, window_bounds = array<i64: 32, 128>}]} {
    %c0 = arith.constant 0 : index
    %c0_0 = arith.constant 0 : index
    %0 = vector.load %arg1[%c0, %c0_0] : memref<32x384xbf16, #tpu.memory_space<vmem>>, vector<32x384xbf16>
    %c0_1 = arith.constant 0 : index
    %c0_2 = arith.constant 0 : index
    %1 = vector.load %arg2[%c0_1, %c0_2] : memref<384x128xbf16, #tpu.memory_space<vmem>>, vector<384x128xbf16>
    %cst = arith.constant dense<0.000000e+00> : vector<32x128xf32>
    %2 = tpu.matmul %0, %1, %cst {dimension_numbers = #tpu.dot_dimension_numbers<[1], [0], [0], [1], [0, 0, 1, 1], [], []>} : vector<32x384xbf16>, vector<384x128xbf16>, vector<32x128xf32> -> vector<32x128xf32>
    %c0_3 = arith.constant 0 : index
    %c0_4 = arith.constant 0 : index
    %3 = vector.load %arg4[%c0_3, %c0_4] : memref<1x128xf32, #tpu.memory_space<vmem>>, vector<1x128xf32>
    %4 = vector.broadcast %3 : vector<1x128xf32> to vector<32x128xf32>
    %5 = arith.mulf %2, %4 : vector<32x128xf32>
    %c0_5 = arith.constant 0 : index
    %c0_6 = arith.constant 0 : index
    %6 = vector.load %arg3[%c0_5, %c0_6] : memref<1x128xf32, #tpu.memory_space<vmem>>, vector<1x128xf32>
    %7 = vector.broadcast %6 : vector<1x128xf32> to vector<32x128xf32>
    %8 = arith.addf %5, %7 : vector<32x128xf32>
    %cst_7 = arith.constant 0.000000e+00 : f32
    %9 = vector.broadcast %cst_7 : f32 to vector<32x128xf32>
    %10 = arith.maximumf %8, %9 : vector<32x128xf32>
    %11 = arith.truncf %10 : vector<32x128xf32> to vector<32x128xbf16>
    %c0_8 = arith.constant 0 : index
    %c0_9 = arith.constant 0 : index
    %12 = vector.load %arg5[%c0_8, %c0_9] : memref<32x128xbf16, #tpu.memory_space<vmem>>, vector<32x128xbf16>
    tpu.vector_store %arg5[%c0_8, %c0_9], %11 {strides = array<i32>} : memref<32x128xbf16, #tpu.memory_space<vmem>>, vector<32x128xbf16>,
    return
  }
  func.func @transform_0(%arg0: i32) -> (i32, i32) {
    %c0_i32 = arith.constant 0 : i32
    %c0_i32_0 = arith.constant 0 : i32
    return %arg0, %c0_i32 : i32, i32
  }
  func.func @transform_1(%arg0: i32) -> (i32, i32) {
    %c0_i32 = arith.constant 0 : i32
    %c0_i32_0 = arith.constant 0 : i32
    %c0_i32_1 = arith.constant 0 : i32
    return %c0_i32, %c0_i32_0 : i32, i32
  }
  func.func @transform_2(%arg0: i32) -> (i32, i32) {
    %c0_i32 = arith.constant 0 : i32
    %c0_i32_0 = arith.constant 0 : i32
    %c0_i32_1 = arith.constant 0 : i32
    return %c0_i32, %c0_i32_0 : i32, i32
  }
  func.func @transform_3(%arg0: i32) -> (i32, i32) {
    %c0_i32 = arith.constant 0 : i32
    %c0_i32_0 = arith.constant 0 : i32
    %c0_i32_1 = arith.constant 0 : i32
    return %c0_i32, %c0_i32_0 : i32, i32
  }
  func.func @transform_4(%arg0: i32) -> (i32, i32) {
    %c0_i32 = arith.constant 0 : i32
    %c0_i32_0 = arith.constant 0 : i32
    return %arg0, %c0_i32 : i32, i32
  }
}

module attributes {stable_mosaic.version = 11 : i64} {
  func.func @_conv_kernel(%arg0: i32, %arg1: memref<32x384xbf16, #tpu.memory_space<vmem>>, %arg2: memref<384x128xbf16, #tpu.memory_space<vmem>>, %arg3: memref<1x128xf32, #tpu.memory_space<vmem>>, %arg4: memref<1x128xf32, #tpu.memory_space<vmem>>, %arg5: memref<32x128xbf16, #tpu.memory_space<vmem>>, %arg6: memref<32x128xbf16, #tpu.memory_space<vmem>>) attributes {dimension_semantics = [#tpu.dimension_semantics<parallel>], iteration_bounds = array<i64: 1>, scalar_prefetch = 0 : i64, scratch_operands = 0 : i64, tpu.core_type = #tpu.core_type<tc>, window_params = [{transform_indices = @transform_0, window_bounds = array<i64: 32, 384>}, {pipeline_mode = #tpu.pipeline_mode<synchronous>, transform_indices = @transform_1, window_bounds = array<i64: 384, 128>}, {pipeline_mode = #tpu.pipeline_mode<synchronous>, transform_indices = @transform_2, window_bounds = array<i64: 1, 128>}, {pipeline_mode = #tpu.pipeline_mode<synchronous>, transform_indices = @transform_3, window_bounds = array<i64: 1, 128>}, {transform_indices = @transform_4, window_bounds = array<i64: 32, 128>}, {transform_indices = @transform_5, window_bounds = array<i64: 32, 128>}]} {
    %c0 = arith.constant 0 : index
    %c0_0 = arith.constant 0 : index
    %0 = vector.load %arg1[%c0, %c0_0] : memref<32x384xbf16, #tpu.memory_space<vmem>>, vector<32x384xbf16>
    %c0_1 = arith.constant 0 : index
    %c0_2 = arith.constant 0 : index
    %1 = vector.load %arg2[%c0_1, %c0_2] : memref<384x128xbf16, #tpu.memory_space<vmem>>, vector<384x128xbf16>
    %cst = arith.constant dense<0.000000e+00> : vector<32x128xf32>
    %2 = tpu.matmul %0, %1, %cst {dimension_numbers = #tpu.dot_dimension_numbers<[1], [0], [0], [1], [0, 0, 1, 1], [], []>} : vector<32x384xbf16>, vector<384x128xbf16>, vector<32x128xf32> -> vector<32x128xf32>
    %c0_3 = arith.constant 0 : index
    %c0_4 = arith.constant 0 : index
    %3 = vector.load %arg4[%c0_3, %c0_4] : memref<1x128xf32, #tpu.memory_space<vmem>>, vector<1x128xf32>
    %4 = vector.broadcast %3 : vector<1x128xf32> to vector<32x128xf32>
    %5 = arith.mulf %2, %4 : vector<32x128xf32>
    %c0_5 = arith.constant 0 : index
    %c0_6 = arith.constant 0 : index
    %6 = vector.load %arg3[%c0_5, %c0_6] : memref<1x128xf32, #tpu.memory_space<vmem>>, vector<1x128xf32>
    %7 = vector.broadcast %6 : vector<1x128xf32> to vector<32x128xf32>
    %8 = arith.addf %5, %7 : vector<32x128xf32>
    %c0_7 = arith.constant 0 : index
    %c0_8 = arith.constant 0 : index
    %9 = vector.load %arg5[%c0_7, %c0_8] : memref<32x128xbf16, #tpu.memory_space<vmem>>, vector<32x128xbf16>
    %10 = arith.extf %9 : vector<32x128xbf16> to vector<32x128xf32>
    %11 = arith.addf %8, %10 : vector<32x128xf32>
    %cst_9 = arith.constant 0.000000e+00 : f32
    %12 = vector.broadcast %cst_9 : f32 to vector<32x128xf32>
    %13 = arith.maximumf %11, %12 : vector<32x128xf32>
    %14 = arith.truncf %13 : vector<32x128xf32> to vector<32x128xbf16>
    %c0_10 = arith.constant 0 : index
    %c0_11 = arith.constant 0 : index
    %15 = vector.load %arg6[%c0_10, %c0_11] : memref<32x128xbf16, #tpu.memory_space<vmem>>, vector<32x128xbf16>
    tpu.vector_store %arg6[%c0_10, %c0_11], %14 {strides = array<i32>} : memref<32x128xbf16, #tpu.memory_space<vmem>>, vector<32x128xbf16>,
    return
  }
  func.func @transform_0(%arg0: i32) -> (i32, i32) {
    %c0_i32 = arith.constant 0 : i32
    %c0_i32_0 = arith.constant 0 : i32
    return %arg0, %c0_i32 : i32, i32
  }
  func.func @transform_1(%arg0: i32) -> (i32, i32) {
    %c0_i32 = arith.constant 0 : i32
    %c0_i32_0 = arith.constant 0 : i32
    %c0_i32_1 = arith.constant 0 : i32
    return %c0_i32, %c0_i32_0 : i32, i32
  }
  func.func @transform_2(%arg0: i32) -> (i32, i32) {
    %c0_i32 = arith.constant 0 : i32
    %c0_i32_0 = arith.constant 0 : i32
    %c0_i32_1 = arith.constant 0 : i32
    return %c0_i32, %c0_i32_0 : i32, i32
  }
  func.func @transform_3(%arg0: i32) -> (i32, i32) {
    %c0_i32 = arith.constant 0 : i32
    %c0_i32_0 = arith.constant 0 : i32
    %c0_i32_1 = arith.constant 0 : i32
    return %c0_i32, %c0_i32_0 : i32, i32
  }
  func.func @transform_4(%arg0: i32) -> (i32, i32) {
    %c0_i32 = arith.constant 0 : i32
    %c0_i32_0 = arith.constant 0 : i32
    return %arg0, %c0_i32 : i32, i32
  }
  func.func @transform_5(%arg0: i32) -> (i32, i32) {
    %c0_i32 = arith.constant 0 : i32
    %c0_i32_0 = arith.constant 0 : i32
    return %arg0, %c0_i32 : i32, i32
  }
}

</mosaic_0001>

<bundles_post_ra>
// kernel: _lambda_.56
= control target key start
LH: loop header
LB: loop body
LE: loop exit
PB: predicated region body
PF: predicated region fallthrough
CT: control target
= control target key end

     0   :  { %vm187_vm0 = vcmask 130048   ;;  %s1089_s23 = smov 48   ;;  %vm617_vm1 = vcmask 388096   ;;  %vm714_vm2 = vcmask 519552   ;;  %s1696_s1 = inlined_call_operand.vmem [shape: bf16[144,48], index: 1, kind: input, shape index: {}]   ;;  %s1697_s0 = inlined_call_operand.vmem [shape: bf16[128,144], index: 0, kind: input, shape index: {}]   ;;  %s1698_s5 = inlined_call_operand.vmem [shape: f32[1,16], index: 5, kind: input, shape index: {}]   ;;  %s1699_s6 = inlined_call_operand.vmem [shape: f32[1,16], index: 6, kind: input, shape index: {}]   ;;  %s1700_s2 = inlined_call_operand.vmem [shape: bf16[4,128,16], index: 2, kind: input, shape index: {}]   ;;  %s1701_s3 = inlined_call_operand.vmem [shape: f32[1,48], index: 3, kind: input, shape index: {}]   ;;  %s1702_s4 = inlined_call_operand.vmem [shape: f32[1,48], index: 4, kind: input, shape index: {}]   ;;  %s1703_s7 = inlined_call_operand.vmem [shape: bf16[128,64], index: 7, kind: output, shape index: {}]  }
   0x1   :  { %v914_v0 = vld [vmem:[%s1696_s1 + $0x38] sm:$0xff]  ;;  %v915_v1 = vld [vmem:[%s1696_s1 + $0x40] sm:$0xff]  ;;  %v739_v3 = vld [vmem:[%s1697_s0 + $0x8] sm:$0xf0] }
   0x2   :  { %v891_v2 = vld [vmem:[%s1697_s0 + $0x4] sm:$0xf]  ;;  %212 = vmatpush.bf16.msra.mxu0 %v914_v0  ;;  %1075 = vmatpush.bf16.msra.mxu2 %v914_v0  ;;  %v913_v5 = vld [vmem:[%s1696_s1 + $0x30] sm:$0xff]  ;;  %v912_v6 = vld [vmem:[%s1696_s1 + $0x28] sm:$0xff] }
   0x3   :  { %v742_v4 = vor.u32 %v891_v2, %v739_v3  ;;  %268 = vmatpush.bf16.msra.mxu1 %v915_v1  ;;  %1083 = vmatpush.bf16.msra.mxu3 %v915_v1  ;;  %v901_v7 = vld [vmem:[%s1697_s0 + $0x54] sm:$0xf]  ;;  %v779_v8 = vld [vmem:[%s1697_s0 + $0x58] sm:$0xf0]  ;;  %v911_v10 = vld [vmem:[%s1696_s1 + $0x20] sm:$0xff] }
   0x4   :  { %v782_v9 = vor.u32 %v901_v7, %v779_v8  ;;  %v910_v11 = vld [vmem:[%s1696_s1 + $0x18] sm:$0xff]  ;;  %v893_v12 = vld [vmem:[%s1697_s0 + $0x14] sm:$0xf]  ;;  %v908_v16 = vld [vmem:[%s1696_s1 + $0x8] sm:$0xff] }
   0x5   :  { %v747_v13 = vld [vmem:[%s1697_s0 + $0x18] sm:$0xf0]  ;;  %v909_v15 = vld [vmem:[%s1696_s1 + $0x10] sm:$0xff]  ;;  %v903_v17 = vld [vmem:[%s1697_s0 + $0x64] sm:$0xf] }
   0x6   :  { %835 = vmatmul.msk.bf16.vlgmr.msra.gmra.mxu1 %vm187_vm0, %v742_v4  ;;  %213 = vmatpush.bf16.msra.mxu0 %v913_v5  ;;  %v750_v14 = vor.u32 %v893_v12, %v747_v13  ;;  %v787_v18 = vld [vmem:[%s1697_s0 + $0x68] sm:$0xf0]  ;;  %v907_v20 = vld [vmem:[%s1696_s1] sm:$0xff]  ;;  %v892_v22 = vld [vmem:[%s1697_s0 + $0x4] sm:$0xf0] }
   0x7   :  { %1076 = vmatpush.bf16.msra.mxu2 %v913_v5  ;;  %840 = vmatmul.msk.bf16.vlgmr.msra.gmra.mxu3 %vm187_vm0, %v782_v9  ;;  %v790_v19 = vor.u32 %v903_v17, %v787_v18  ;;  %v737_v21 = vld [vmem:[%s1697_s0] sm:$0xf]  ;;  %v900_v24 = vld [vmem:[%s1697_s0 + $0x44] sm:$0xf0]  ;;  %v895_v31 = vld [vmem:[%s1697_s0 + $0x24] sm:$0xf] }
   0x8   :  { %v769_v23 = vld [vmem:[%s1697_s0 + $0x40] sm:$0xf]  ;;  %v738_v25 = vor.u32 %v892_v22, %v737_v21  ;;  %v755_v32 = vld [vmem:[%s1697_s0 + $0x28] sm:$0xf0]  ;;  %v905_v44 = vld [vmem:[%s1697_s0 + $0x74] sm:$0xf] }
   0x9   :  { %v917_v26 = vld [vmem:[%s1700_s2] sm:$0xff]   ;;  %v770_v28 = vor.u32 %v900_v24, %v769_v23  ;;  %v758_v37 = vor.u32 %v895_v31, %v755_v32  ;;  %v1044_v42 = vld [vmem:[%s1700_s2 + $0x8] sm:$0xff]   ;;  %v795_v45 = vld [vmem:[%s1697_s0 + $0x78] sm:$0xf0] }
   0xa   :  { %214 = vmatpush.bf16.msra.mxu0 %v912_v6  ;;  %v1051_v27 = vld [vmem:[%s1700_s2 + $0x40] sm:$0xff]   ;;  %v918_v29 = vunpack.c.l.bf16 %v917_v26  ;;  %v1052_v43 = vld [vmem:[%s1700_s2 + $0x48] sm:$0xff]   ;;  %v919_v46 = vunpack.c.h.bf16 %v917_v26  ;;  %v798_v50 = vor.u32 %v905_v44, %v795_v45  ;;  %v922_v52 = vunpack.c.l.bf16 %v1044_v42  ;;  %v745_v58 = vld [vmem:[%s1697_s0 + $0x10] sm:$0xf] }
   0xb   :  { %1077 = vmatpush.bf16.msra.mxu2 %v912_v6  ;;  %v950_v30 = vunpack.c.l.bf16 %v1051_v27  ;;  %v1059_v33 = vld [vmem:[%s1700_s2 + $0x80] sm:$0xff]   ;;  %v951_v47 = vunpack.c.h.bf16 %v1051_v27  ;;  %v954_v53 = vunpack.c.l.bf16 %v1052_v43  ;;  %v1060_v54 = vld [vmem:[%s1700_s2 + $0x88] sm:$0xff]   ;;  %v894_v62 = vld [vmem:[%s1697_s0 + $0x14] sm:$0xf0]  ;;  %v955_v21 = vunpack.c.h.bf16 %v1052_v43 }
   0xc   :  { %v982_v35 = vunpack.c.l.bf16 %v1059_v33  ;;  %v1067_v36 = vld [vmem:[%s1700_s2 + $0xc0] sm:$0xff]   ;;  %v983_v48 = vunpack.c.h.bf16 %v1059_v33  ;;  %v986_v56 = vunpack.c.l.bf16 %v1060_v54  ;;  %v1068_v61 = vld [vmem:[%s1700_s2 + $0xc8] sm:$0xff]   ;;  %v777_v63 = vld [vmem:[%s1697_s0 + $0x50] sm:$0xf] }
   0xd   :  { %v431_v34 = vmax.f32 %v918_v29, %v950_v30  ;;  %v1014_v39 = vunpack.c.l.bf16 %v1067_v36  ;;  %v1218_v41 = vld [vmem:[%s1698_s5] ss:$0 sm:$0xff]  ;;  %v1015_v55 = vunpack.c.h.bf16 %v1067_v36  ;;  %v432_v57 = vmax.f32 %v919_v46, %v951_v47  ;;  %v902_v0 = vld [vmem:[%s1697_s0 + $0x54] sm:$0xf0]  ;;  %v897_v3 = vld [vmem:[%s1697_s0 + $0x34] sm:$0xf] }
   0xe   :  { %215 = vmatpush.bf16.msra.mxu0 %v911_v10  ;;  %v1236_v49 = vld [vmem:[%s1699_s6] ss:$0 sm:$0xff]  ;;  %v433_v60 = vmax.f32 %v922_v52, %v954_v53  ;;  %v1018_v1 = vunpack.c.l.bf16 %v1068_v61  ;;  %v763_v4 = vld [vmem:[%s1697_s0 + $0x38] sm:$0xf0]  ;;  %v1273_v8 = vld [vmem:[%s1697_s0 + $0x24] sm:$0xf0]  ;;  %v778_v12 = vor.u32 %v902_v0, %v777_v63  ;;  %v987_v30 = vunpack.c.h.bf16 %v1060_v54 }
   0xf   :  { %1078 = vmatpush.bf16.msra.mxu2 %v911_v10  ;;  %v480_v38 = vmax.f32 %v431_v34, %v982_v35  ;;  %v481_v2 = vmax.f32 %v432_v57, %v983_v48  ;;  %v1268_v7 = vld [vmem:[%s1697_s0 + $0x20] sm:$0xf]  ;;  %v1283_v13 = vld [vmem:[%s1697_s0 + $0x64] sm:$0xf0]  ;;  %v1054_v17 = vld [vmem:[%s1700_s2 + $0x58] sm:$0xff]   ;;  %v766_v24 = vor.u32 %v897_v3, %v763_v4 }
  0x10   :  { %v482_v6 = vmax.f32 %v433_v60, %v986_v56  ;;  %v1278_v9 = vld [vmem:[%s1697_s0 + $0x60] sm:$0xf]  ;;  %v1294_v18 = vld [vmem:[%s1697_s0 + $0x44] sm:$0xf]  ;;  %v962_v27 = vunpack.c.l.bf16 %v1054_v17  ;;  %v963_v47 = vunpack.c.h.bf16 %v1054_v17  ;;  %v1341_v56 = vld [vmem:[%s1700_s2 + $0x10] sm:$0xff]  }
  0x11   :  { %v529_v40 = vmax.f32 %v480_v38, %v1014_v39  ;;  %v530_v10 = vmax.f32 %v481_v2, %v1015_v55  ;;  %v786_v29 = vor.u32 %v1283_v13, %v1278_v9  ;;  %v1019_v38 = vunpack.c.h.bf16 %v1068_v61  ;;  %v1321_v43 = vld [vmem:[%s1700_s2 + $0x20] sm:$0xff]   ;;  %v1053_v61 = vld [vmem:[%s1700_s2 + $0x50] sm:$0xff]   ;;  %v1436_v13 = vld [vmem:[%s1700_s2 + $0xb8] sm:$0xff]  }
  0x12   :  { %216 = vmatpush.bf16.msra.mxu0 %v910_v11  ;;  %v1326_v48 = vld [vmem:[%s1700_s2 + $0x60] sm:$0xff]   ;;  %v935_v60 = vunpack.c.h.bf16 %v1321_v43  ;;  %v1355_v2 = vld [vmem:[%s1700_s2 + $0x90] sm:$0xff]  }
  0x13   :  { %1079 = vmatpush.bf16.msra.mxu2 %v910_v11  ;;  %v549_v51 = vmul.f32 %v1218_v41, %v529_v40  ;;  %v746_v11 = vor.u32 %v894_v62, %v745_v58  ;;  %v550_v22 = vmul.f32 %v1218_v41, %v530_v10  ;;  %v967_v63 = vunpack.c.h.bf16 %v1326_v48  ;;  %v1365_v10 = vld [vmem:[%s1700_s2 + $0xd0] sm:$0xff]  }
  0x15   :  { %v569_v59 = vadd.f32 %v1236_v49, %v549_v51  ;;  %v570_v31 = vadd.f32 %v1236_v49, %v550_v22  ;;  %v1336_v51 = vld [vmem:[%s1700_s2 + $0xe0] sm:$0xff]   ;;  %v991_v22 = vunpack.c.h.bf16 %v1355_v2 }
  0x16   :  { %836 = vmatmul.msk.bf16.gmra.mxu1 %vm187_vm0, %v750_v14  ;;  %217 = vmatpush.bf16.msra.mxu0 %v909_v15 }
  0x17   :  { %1080 = vmatpush.bf16.msra.mxu2 %v909_v15  ;;  %841 = vmatmul.msk.bf16.gmra.mxu3 %vm187_vm0, %v790_v19  ;;  %v585_v5 = vmax.f32 %v569_v59, 0.0  ;;  %v531_v15 = vmax.f32 %v482_v6, %v1018_v1  ;;  %v1299_v19 = vld [vmem:[%s1697_s0 + $0x48] sm:$0xf0]  ;;  %v586_v39 = vmax.f32 %v570_v31, 0.0  ;;  %v1031_v1 = vunpack.c.h.bf16 %v1336_v51 }
  0x18   :  { %v774_v33 = vor.u32 %v1294_v18, %v1299_v19  ;;  %v927_v6 = vunpack.c.h.bf16 %v1341_v56  ;;  %v1390_v31 = vld [vmem:[%s1700_s2 + $0xe8] sm:$0xff]  }
  0x19   :  { %v634_v14 = vpack.c.bf16 %v585_v5, %v585_v5  ;;  %v551_v26 = vmul.f32 %v1218_v41, %v531_v15  ;;  %v635_v52 = vpack.c.bf16 %v586_v39, %v586_v39  ;;  %v926_v5 = vunpack.c.l.bf16 %v1341_v56 }
  0x1a   :  { %218 = vmatpush.bf16.msra.mxu0 %v908_v16  ;;  %v959_v15 = vunpack.c.h.bf16 %v1053_v61 }
  0x1b   :  { %1081 = vmatpush.bf16.msra.mxu2 %v908_v16  ;;  %v1046_v16 = vld [vmem:[%s1700_s2 + $0x18] sm:$0xff]   ;;  %666 = vrot.lane.b32.xlu0 %v634_v14, %s1089_s23  ;;  %v571_v34 = vadd.f32 %v1236_v49, %v551_v26  ;;  %v958_v14 = vunpack.c.l.bf16 %v1053_v61 }
  0x1c   :  { %v930_v23 = vunpack.c.l.bf16 %v1046_v16  ;;  %v931_v46 = vunpack.c.h.bf16 %v1046_v16  ;;  %v1371_v16 = vld [vmem:[%s1700_s2 + $0x28] sm:$0xff]  }
  0x1d   :  { %v587_v44 = vmax.f32 %v571_v34, 0.0 }
  0x1e   :  { %219 = vmatpush.bf16.msra.mxu0 %v907_v20  ;;  %v437_v35 = vmax.f32 %v930_v23, %v962_v27  ;;  %v438_v59 = vmax.f32 %v931_v46, %v963_v47  ;;  %v1379_v23 = vld [vmem:[%s1700_s2 + $0x68] sm:$0xff]   ;;  %v435_v27 = vmax.f32 %v926_v5, %v958_v14  ;;  %v1073_v46 = vld [vmem:[%s1700_s2 + $0xf0] sm:$0xff]  }
  0x1f   :  { %1082 = vmatpush.bf16.msra.mxu2 %v907_v20  ;;  %v923_v20 = vunpack.c.h.bf16 %v1044_v42  ;;  %v636_v57 = vpack.c.bf16 %v587_v44, %v587_v44  ;;  %v1057_v44 = vld [vmem:[%s1700_s2 + $0x70] sm:$0xff]   ;;  %v1039_v9 = vunpack.c.h.bf16 %v1073_v46 }
  0x21   :  { %220 = vmatmul.bf16.vlgmr.msra.gmra.mxu0 %v738_v25  ;;  %v754_v25 = vor.u32 %v1273_v8, %v1268_v7  ;;  %v434_v32 = vmax.f32 %v923_v20, %v955_v21  ;;  %670 = vrot.lane.b32.xlu1 %v636_v57, %s1089_s23  ;;  %v990_v21 = vunpack.c.l.bf16 %v1355_v2  ;;  %v436_v2 = vmax.f32 %v927_v6, %v959_v15  ;;  %v1426_v6 = vld [vmem:[%s1700_s2 + $0x38] sm:$0xff]  }
  0x22   :  { %240 = vmatmul.bf16.vlgmr.msra.gmra.mxu2 %v770_v28  ;;  %v1062_v28 = vld [vmem:[%s1700_s2 + $0x98] sm:$0xff]  }
  0x23   :  { %v994_v36 = vunpack.c.l.bf16 %v1062_v28  ;;  %v483_v40 = vmax.f32 %v434_v32, %v987_v30  ;;  %v995_v54 = vunpack.c.h.bf16 %v1062_v28  ;;  %668 = vrot.lane.b32.xlu0 %v635_v52, %s1089_s23  ;;  %v1022_v28 = vunpack.c.l.bf16 %v1365_v10  ;;  %v1385_v30 = vld [vmem:[%s1700_s2 + $0xa8] sm:$0xff]   ;;  %v1431_v7 = vld [vmem:[%s1700_s2 + $0x78] sm:$0xff]  }
  0x25   :  { %v486_v45 = vmax.f32 %v437_v35, %v994_v36  ;;  %v532_v53 = vmax.f32 %v483_v40, %v1019_v38  ;;  %v487_v4 = vmax.f32 %v438_v59, %v995_v54  ;;  %v1023_v35 = vunpack.c.h.bf16 %v1365_v10 }
  0x26   :  { %837 = vmatmul.msk.bf16.gmra.mxu1 %vm187_vm0, %v758_v37  ;;  %v1070_v37 = vld [vmem:[%s1700_s2 + $0xd8] sm:$0xff]   ;;  %v938_v36 = vunpack.c.l.bf16 %v1371_v16  ;;  %v484_v40 = vmax.f32 %v435_v27, %v990_v21  ;;  %v1034_v54 = vunpack.c.l.bf16 %v1390_v31  ;;  %v975_v10 = vunpack.c.h.bf16 %v1057_v44 }
  0x27   :  { %842 = vmatmul.msk.bf16.gmra.mxu3 %vm187_vm0, %v798_v50  ;;  %v1026_v42 = vunpack.c.l.bf16 %v1070_v37  ;;  %v1331_v50 = vld [vmem:[%s1700_s2 + $0xa0] sm:$0xff]   ;;  %v1027_v55 = vunpack.c.h.bf16 %v1070_v37  ;;  %v552_v62 = vmul.f32 %v1218_v41, %v532_v53  ;;  %v1049_v37 = vld [vmem:[%s1700_s2 + $0x30] sm:$0xff]   ;;  %v1002_v53 = vunpack.c.l.bf16 %v1385_v30 }
  0x28   :  { %v999_v0 = vunpack.c.h.bf16 %v1331_v50  ;;  %v533_v56 = vmax.f32 %v484_v40, %v1022_v28  ;;  %v943_v5 = vunpack.c.h.bf16 %v1049_v37  ;;  %v947_v28 = vunpack.c.h.bf16 %v1426_v6 }
  0x29   :  { %v535_v58 = vmax.f32 %v486_v45, %v1026_v42  ;;  %v536_v20 = vmax.f32 %v487_v4, %v1027_v55  ;;  %v970_v42 = vunpack.c.l.bf16 %v1379_v23  ;;  %v1065_v45 = vld [vmem:[%s1700_s2 + $0xb0] sm:$0xff]  }
  0x2a   :  { %v1006_v61 = vunpack.c.l.bf16 %v1065_v45  ;;  %v1007_v15 = vunpack.c.h.bf16 %v1065_v45 }
  0x2b   :  { %v555_v3 = vmul.f32 %v1218_v41, %v535_v58  ;;  %v556_v34 = vmul.f32 %v1218_v41, %v536_v20  ;;  %v441_v57 = vmax.f32 %v938_v36, %v970_v42  ;;  %v942_v58 = vunpack.c.l.bf16 %v1049_v37 }
  0x2c   :  { %v1011_v37 = vunpack.c.h.bf16 %v1436_v13 }
  0x2d   :  { %v575_v17 = vadd.f32 %v1236_v49, %v555_v3  ;;  %v576_v52 = vadd.f32 %v1236_v49, %v556_v34 }
  0x2f   :  { %v591_v32 = vmax.f32 %v575_v17, 0.0  ;;  %v592_v59 = vmax.f32 %v576_v52, 0.0  ;;  %v485_v17 = vmax.f32 %v436_v2, %v991_v22  ;;  %v998_v52 = vunpack.c.l.bf16 %v1331_v50  ;;  %v906_v50 = vld [vmem:[%s1697_s0 + $0x74] sm:$0xf0] }
  0x31   :  { %225 = vmatmul.bf16.gmra.mxu0 %v746_v11  ;;  %v572_v11 = vadd.f32 %v1236_v49, %v552_v62  ;;  %v640_v47 = vpack.c.bf16 %v591_v32, %v591_v32  ;;  %v1038_v62 = vunpack.c.l.bf16 %v1073_v46  ;;  %v641_v3 = vpack.c.bf16 %v592_v59, %v592_v59 }
  0x32   :  { %245 = vmatmul.bf16.gmra.mxu2 %v778_v12  ;;  %v440_v12 = vmax.f32 %v935_v60, %v967_v63  ;;  %v974_v60 = vunpack.c.l.bf16 %v1057_v44  ;;  %v534_v22 = vmax.f32 %v485_v17, %v1023_v35  ;;  %v979_v32 = vunpack.c.h.bf16 %v1431_v7 }
  0x33   :  { %678 = vrot.lane.b32.xlu0 %v640_v47, %s1089_s23  ;;  %v966_v44 = vunpack.c.l.bf16 %v1326_v48  ;;  %v793_v48 = vld [vmem:[%s1697_s0 + $0x70] sm:$0xf] }
  0x34   :  { %v489_v26 = vmax.f32 %v440_v12, %v999_v0  ;;  %v553_v0 = vmul.f32 %v1218_v41, %v533_v56  ;;  %v443_v4 = vmax.f32 %v942_v58, %v974_v60  ;;  %v554_v35 = vmul.f32 %v1218_v41, %v534_v22 }
  0x35   :  { %v446_v40 = vmax.f32 %v947_v28, %v979_v32  ;;  %v1010_v32 = vunpack.c.l.bf16 %v1436_v13 }
  0x36   :  { %838 = vmatmul.msk.bf16.gmra.mxu1 %vm187_vm0, %v766_v24  ;;  %v588_v24 = vmax.f32 %v572_v11, 0.0  ;;  %v538_v39 = vmax.f32 %v489_v26, %v1031_v1  ;;  %v490_v1 = vmax.f32 %v441_v57, %v1002_v53  ;;  %v573_v12 = vadd.f32 %v1236_v49, %v553_v0  ;;  %v761_v53 = vld [vmem:[%s1697_s0 + $0x30] sm:$0xf] }
  0x37   :  { %v492_v8 = vmax.f32 %v443_v4, %v1006_v61  ;;  %v574_v19 = vadd.f32 %v1236_v49, %v554_v35  ;;  %v495_v47 = vmax.f32 %v446_v40, %v1011_v37 }
  0x38   :  { %v637_v38 = vpack.c.bf16 %v588_v24, %v588_v24  ;;  %v558_v55 = vmul.f32 %v1218_v41, %v538_v39  ;;  %v539_v14 = vmax.f32 %v490_v1, %v1034_v54  ;;  %v589_v20 = vmax.f32 %v573_v12, 0.0  ;;  %v1442_v24 = vld [vmem:[%s1700_s2 + $0xf8] sm:$0xff]  }
  0x39   :  { %v541_v26 = vmax.f32 %v492_v8, %v1038_v62  ;;  %v1043_v42 = vunpack.c.h.bf16 %v1442_v24  ;;  %v898_v54 = vld [vmem:[%s1697_s0 + $0x34] sm:$0xf0]  ;;  %v1042_v35 = vunpack.c.l.bf16 %v1442_v24  ;;  %v1505_v24 = vld [vmem:[%s1701_s3] ss:$0 sm:$0xff] }
  0x3a   :  { %672 = vrot.lane.b32.xlu1 %v637_v38, %s1089_s23  ;;  %v578_v63 = vadd.f32 %v1236_v49, %v558_v55  ;;  %v559_v21 = vmul.f32 %v1218_v41, %v539_v14  ;;  %v638_v34 = vpack.c.bf16 %v589_v20, %v589_v20  ;;  %v590_v55 = vmax.f32 %v574_v19, 0.0 }
  0x3b   :  { %v561_v38 = vmul.f32 %v1218_v41, %v541_v26  ;;  %v544_v60 = vmax.f32 %v495_v47, %v1043_v42 }
  0x3c   :  { %v594_v11 = vmax.f32 %v578_v63, 0.0  ;;  %v579_v36 = vadd.f32 %v1236_v49, %v559_v21  ;;  %674 = vrot.lane.b32.xlu2 %v638_v34, %s1089_s23  ;;  %v639_v61 = vpack.c.bf16 %v590_v55, %v590_v55  ;;  %v762_v63 = vor.u32 %v898_v54, %v761_v53 }
  0x3d   :  { %v581_v45 = vadd.f32 %v1236_v49, %v561_v38  ;;  %v564_v1 = vmul.f32 %v1218_v41, %v544_v60  ;;  %v1035_v21 = vunpack.c.h.bf16 %v1390_v31 }
  0x3e   :  { %v595_v18 = vmax.f32 %v579_v36, 0.0 }
  0x3f   :  { %v597_v58 = vmax.f32 %v581_v45, 0.0  ;;  %v584_v4 = vadd.f32 %v1236_v49, %v564_v1 }
  0x40   :  { %v644_v57 = vpack.c.bf16 %v595_v18, %v595_v18 }
  0x41   :  { %230 = vmatmul.bf16.gmra.mxu0 %v754_v25  ;;  %v444_v25 = vmax.f32 %v943_v5, %v975_v10  ;;  %v646_v0 = vpack.c.bf16 %v597_v58, %v597_v58  ;;  %v600_v10 = vmax.f32 %v584_v4, 0.0 }
  0x42   :  { %250 = vmatmul.bf16.gmra.mxu2 %v786_v29  ;;  %v643_v29 = vpack.c.bf16 %v594_v11, %v594_v11  ;;  %680 = vrot.lane.b32.xlu1 %v641_v3, %s1089_s23 }
  0x43   :  { %v493_v27 = vmax.f32 %v444_v25, %v1007_v15  ;;  %v649_v14 = vpack.c.bf16 %v600_v10, %v600_v10  ;;  %v939_v25 = vunpack.c.h.bf16 %v1371_v16  ;;  %v971_v15 = vunpack.c.h.bf16 %v1379_v23 }
  0x44   :  { %684 = vrot.lane.b32.xlu0 %v643_v29, %s1089_s23  ;;  %676 = vrot.lane.b32.xlu2 %v639_v61, %s1089_s23  ;;  %v1003_v29 = vunpack.c.h.bf16 %v1385_v30  ;;  %v978_v16 = vunpack.c.l.bf16 %v1431_v7 }
  0x45   :  { %v542_v39 = vmax.f32 %v493_v27, %v1039_v9  ;;  %v442_v9 = vmax.f32 %v939_v25, %v971_v15  ;;  %v946_v27 = vunpack.c.l.bf16 %v1426_v6 }
  0x46   :  { %839 = vmatmul.msk.bf16.gmra.mxu1 %vm187_vm0, %v774_v33  ;;  %v934_v33 = vunpack.c.l.bf16 %v1321_v43  ;;  %v1030_v43 = vunpack.c.l.bf16 %v1336_v51  ;;  %v794_v51 = vor.u32 %v906_v50, %v793_v48 }
  0x47   :  { %v562_v46 = vmul.f32 %v1218_v41, %v542_v39  ;;  %v491_v20 = vmax.f32 %v442_v9, %v1003_v29  ;;  %v445_v28 = vmax.f32 %v946_v27, %v978_v16 }
  0x48   :  { %v439_v56 = vmax.f32 %v934_v33, %v966_v44 }
  0x49   :  { %v582_v59 = vadd.f32 %v1236_v49, %v562_v46  ;;  %v540_v22 = vmax.f32 %v491_v20, %v1035_v21  ;;  %v494_v36 = vmax.f32 %v445_v28, %v1010_v32 }
  0x4a   :  { %v488_v62 = vmax.f32 %v439_v56, %v998_v52  ;;  %686 = vrot.lane.b32.xlu1 %v644_v57, %s1089_s23 }
  0x4b   :  { %v598_v3 = vmax.f32 %v582_v59, 0.0  ;;  %v560_v26 = vmul.f32 %v1218_v41, %v540_v22  ;;  %v543_v37 = vmax.f32 %v494_v36, %v1042_v35 }
  0x4c   :  { %v537_v2 = vmax.f32 %v488_v62, %v1030_v43  ;;  %690 = vrot.lane.b32.xlu0 %v646_v0, %s1089_s23 }
  0x4d   :  { %v647_v12 = vpack.c.bf16 %v598_v3, %v598_v3  ;;  %v580_v23 = vadd.f32 %v1236_v49, %v560_v26  ;;  %v563_v31 = vmul.f32 %v1218_v41, %v543_v37 }
  0x4e   :  { %v557_v5 = vmul.f32 %v1218_v41, %v537_v2  ;;  %v1510_v41 = vld [vmem:[%s1702_s4] ss:$0 sm:$0xff] }
  0x4f   :  { %v596_v34 = vmax.f32 %v580_v23, 0.0  ;;  %v583_v38 = vadd.f32 %v1236_v49, %v563_v31 }
  0x50   :  { %v577_v11 = vadd.f32 %v1236_v49, %v557_v5 }
  0x51   :  { %235 = vmatmul.bf16.gmra.mxu0 %v762_v63  ;;  %v645_v30 = vpack.c.bf16 %v596_v34, %v596_v34  ;;  %v599_v6 = vmax.f32 %v583_v38, 0.0 }
  0x52   :  { %255 = vmatmul.bf16.gmra.mxu2 %v794_v51  ;;  %v593_v17 = vmax.f32 %v577_v11, 0.0  ;;  %692 = vrot.lane.b32.xlu1 %v647_v12, %s1089_s23 }
  0x53   :  { %v648_v39 = vpack.c.bf16 %v599_v6, %v599_v6 }
  0x54   :  { %v642_v8 = vpack.c.bf16 %v593_v17, %v593_v17  ;;  %696 = vrot.lane.b32.xlu0 %v649_v14, %s1089_s23 }
  0x56   :  { %682 = vrot.lane.b32.xlu2 %v642_v8, %s1089_s23 }
  0x5e   :  { %688 = vrot.lane.b32.xlu2 %v645_v30, %s1089_s23 }
  0x66   :  { %694 = vrot.lane.b32.xlu2 %v648_v39, %s1089_s23 }
  0x83   :  { %v270_v7 = vpop.f32.mrf.mxu1 }
  0x8a   :  { %v295_v57 = vpop.f32.mrf.mxu3 }
  0x8b   :  { %v272_v40 = vpop.f32.mrf.mxu1 }
  0x8d   :  { %v667_v47 = vpop.permute.xlu0 %666 }
  0x92   :  { %v297_v10 = vpop.f32.mrf.mxu3 }
  0x93   :  { %v275_v42 = vpop.f32.mrf.mxu1  ;;  %v671_v56 = vpop.permute.xlu1 %670 }
  0x95   :  { %v669_v63 = vpop.permute.xlu0 %668 }
  0x96   :  { %v1525_v43 = vpop.permute.xlu2 %674 }
  0x9a   :  { %v300_v36 = vpop.f32.mrf.mxu3 }
  0x9b   :  { %v277_v13 = vpop.f32.mrf.mxu1 }
  0x9e   :  { %v221_v18 = vpop.f32.mrf.mxu0  ;;  %v1542_v3 = vpop.permute.xlu2 %676 }
  0x9f   :  { %v271_v19 = vadd.f32 %v270_v7, %v221_v18 }
  0xa1   :  { %v314_v49 = vmul.f32 %v1505_v24, %v271_v19 }
  0xa3   :  { %v334_v33 = vadd.f32 %v1510_v41, %v314_v49  ;;  %v280_v44 = vpop.f32.mrf.mxu1 }
  0xa5   :  { %v350_v45 = vmax.f32 %v334_v33, 0.0  ;;  %v1514_v46 = vpop.f32.mrf.mxu2  ;;  %v1560_v22 = vpop.permute.xlu0 %678 }
  0xa6   :  { %v223_v52 = vpop.f32.mrf.mxu0 }
  0xa7   :  { %v601_v53 = vpack.c.bf16 %v350_v45, %v350_v45  ;;  %v273_v54 = vadd.f32 %v272_v40, %v223_v52 }
  0xa9   :  { %v315_v55 = vmul.f32 %v1505_v24, %v273_v54  ;;  %618 = vst.msk [vmem:[%s1703_s7] sm:$0xf] %vm617_vm1, %v601_v53  ;;  %v302_v54 = vpop.f32.mrf.mxu3 }
  0xaa   :  { %715 = vst.msk [vmem:[%s1703_s7] sm:$0xf] %vm714_vm2, %v667_v47 }
  0xab   :  { %v335_v48 = vadd.f32 %v1510_v41, %v315_v55  ;;  %v282_v50 = vpop.f32.mrf.mxu1 }
  0xac   :  { %v673_v1 = vpop.permute.xlu1 %672 }
  0xad   :  { %v351_v58 = vmax.f32 %v335_v48, 0.0  ;;  %v1528_v59 = vpop.f32.mrf.mxu2 }
  0xae   :  { %v226_v60 = vpop.f32.mrf.mxu0 }
  0xaf   :  { %v602_v61 = vpack.c.bf16 %v351_v58, %v351_v58  ;;  %v276_v62 = vadd.f32 %v275_v42, %v226_v60 }
  0xb0   :  { %v683_v32 = vpop.permute.xlu2 %682 }
  0xb1   :  { %v316_v0 = vmul.f32 %v1505_v24, %v276_v62  ;;  %619 = vst.msk [vmem:[%s1703_s7 + $0x4] sm:$0xf] %vm617_vm1, %v602_v61 }
  0xb2   :  { %716 = vst.msk [vmem:[%s1703_s7 + $0x4] sm:$0xf] %vm714_vm2, %v669_v63 }
  0xb3   :  { %v336_v51 = vadd.f32 %v1510_v41, %v316_v0  ;;  %v1540_v2 = vpop.f32.mrf.mxu1 }
  0xb4   :  { %v1550_v15 = vpop.permute.xlu1 %680 }
  0xb5   :  { %v352_v4 = vmax.f32 %v336_v51, 0.0  ;;  %v246_v5 = vpop.f32.mrf.mxu2 }
  0xb6   :  { %v296_v11 = vadd.f32 %v295_v57, %v246_v5  ;;  %v228_v12 = vpop.f32.mrf.mxu0 }
  0xb7   :  { %v603_v14 = vpack.c.bf16 %v352_v4, %v352_v4  ;;  %v278_v17 = vadd.f32 %v277_v13, %v228_v12 }
  0xb8   :  { %v324_v8 = vmul.f32 %v1505_v24, %v296_v11 }
  0xb9   :  { %v317_v25 = vmul.f32 %v1505_v24, %v278_v17  ;;  %620 = vst.msk [vmem:[%s1703_s7 + $0x8] sm:$0xf] %vm617_vm1, %v603_v14  ;;  %v305_v17 = vpop.f32.mrf.mxu3 }
  0xba   :  { %v344_v9 = vadd.f32 %v1510_v41, %v324_v8  ;;  %717 = vst.msk [vmem:[%s1703_s7 + $0x8] sm:$0xf] %vm714_vm2, %v671_v56 }
  0xbb   :  { %v337_v29 = vadd.f32 %v1510_v41, %v317_v25  ;;  %v1558_v20 = vpop.f32.mrf.mxu1 }
  0xbc   :  { %v360_v21 = vmax.f32 %v344_v9, 0.0  ;;  %v687_v31 = vpop.permute.xlu1 %686 }
  0xbd   :  { %v353_v26 = vmax.f32 %v337_v29, 0.0  ;;  %v248_v27 = vpop.f32.mrf.mxu2 }
  0xbe   :  { %v611_v16 = vpack.c.bf16 %v360_v21, %v360_v21  ;;  %v298_v23 = vadd.f32 %v297_v10, %v248_v27  ;;  %v231_v28 = vpop.f32.mrf.mxu0 }
  0xbf   :  { %v604_v34 = vpack.c.bf16 %v353_v26, %v353_v26  ;;  %v281_v35 = vadd.f32 %v280_v44, %v231_v28  ;;  %v685_v44 = vpop.permute.xlu0 %684 }
  0xc0   :  { %v325_v30 = vmul.f32 %v1505_v24, %v298_v23  ;;  %628 = vst.msk [vmem:[%s1703_s7 + $0x28] sm:$0xf] %vm617_vm1, %v611_v16 }
  0xc1   :  { %v318_v37 = vmul.f32 %v1505_v24, %v281_v35  ;;  %621 = vst.msk [vmem:[%s1703_s7 + $0xc] sm:$0xf] %vm617_vm1, %v604_v34 }
  0xc2   :  { %v345_v38 = vadd.f32 %v1510_v41, %v325_v30  ;;  %718 = vst.msk [vmem:[%s1703_s7 + $0xc] sm:$0xf] %vm714_vm2, %v673_v1  ;;  %v307_v30 = vpop.f32.mrf.mxu3 }
  0xc3   :  { %v338_v6 = vadd.f32 %v1510_v41, %v318_v37  ;;  %v290_v39 = vpop.f32.mrf.mxu1  ;;  %725 = vst.msk [vmem:[%s1703_s7 + $0x28] sm:$0xf] %vm714_vm2, %v687_v31 }
  0xc4   :  { %v361_v7 = vmax.f32 %v345_v38, 0.0  ;;  %v291_v40 = vadd.f32 %v290_v39, %v1514_v46  ;;  %v689_v46 = vpop.permute.xlu2 %688 }
  0xc5   :  { %v354_v42 = vmax.f32 %v338_v6, 0.0  ;;  %v251_v13 = vpop.f32.mrf.mxu2 }
  0xc6   :  { %v612_v18 = vpack.c.bf16 %v361_v7, %v361_v7  ;;  %v322_v19 = vmul.f32 %v1505_v24, %v291_v40  ;;  %v301_v49 = vadd.f32 %v300_v36, %v251_v13  ;;  %v233_v33 = vpop.f32.mrf.mxu0 }
  0xc7   :  { %v605_v45 = vpack.c.bf16 %v354_v42, %v354_v42  ;;  %v283_v47 = vadd.f32 %v282_v50, %v233_v33  ;;  %v691_v11 = vpop.permute.xlu0 %690 }
  0xc8   :  { %629 = vst.msk [vmem:[%s1703_s7 + $0x2c] sm:$0xf] %vm617_vm1, %v612_v18  ;;  %v342_v52 = vadd.f32 %v1510_v41, %v322_v19  ;;  %v326_v53 = vmul.f32 %v1505_v24, %v301_v49 }
  0xc9   :  { %622 = vst.msk [vmem:[%s1703_s7 + $0x10] sm:$0xf] %vm617_vm1, %v605_v45  ;;  %v319_v55 = vmul.f32 %v1505_v24, %v283_v47 }
  0xca   :  { %v358_v56 = vmax.f32 %v342_v52, 0.0  ;;  %v346_v48 = vadd.f32 %v1510_v41, %v326_v53  ;;  %719 = vst.msk [vmem:[%s1703_s7 + $0x10] sm:$0xf] %vm714_vm2, %v1525_v43 }
  0xcb   :  { %v339_v50 = vadd.f32 %v1510_v41, %v319_v55  ;;  %v292_v57 = vpop.f32.mrf.mxu1  ;;  %726 = vst.msk [vmem:[%s1703_s7 + $0x2c] sm:$0xf] %vm714_vm2, %v689_v46 }
  0xcc   :  { %v609_v58 = vpack.c.bf16 %v358_v56, %v358_v56  ;;  %v362_v60 = vmax.f32 %v346_v48, 0.0  ;;  %v293_v61 = vadd.f32 %v292_v57, %v1528_v59  ;;  %v695_v7 = vpop.permute.xlu2 %694 }
  0xcd   :  { %v355_v62 = vmax.f32 %v339_v50, 0.0  ;;  %v253_v63 = vpop.f32.mrf.mxu2 }
  0xce   :  { %626 = vst.msk [vmem:[%s1703_s7 + $0x20] sm:$0xf] %vm617_vm1, %v609_v58  ;;  %v613_v43 = vpack.c.bf16 %v362_v60, %v362_v60  ;;  %v323_v0 = vmul.f32 %v1505_v24, %v293_v61  ;;  %v303_v1 = vadd.f32 %v302_v54, %v253_v63  ;;  %v236_v51 = vpop.f32.mrf.mxu0 }
  0xcf   :  { %v606_v4 = vpack.c.bf16 %v355_v62, %v355_v62  ;;  %v286_v5 = vadd.f32 %v1540_v2, %v236_v51  ;;  %723 = vst.msk [vmem:[%s1703_s7 + $0x20] sm:$0xf] %vm714_vm2, %v683_v32  ;;  %v693_v32 = vpop.permute.xlu1 %692  ;;  %v697_v13 = vpop.permute.xlu0 %696 }
  0xd0   :  { %630 = vst.msk [vmem:[%s1703_s7 + $0x30] sm:$0xf] %vm617_vm1, %v613_v43  ;;  %v343_v59 = vadd.f32 %v1510_v41, %v323_v0  ;;  %v327_v10 = vmul.f32 %v1505_v24, %v303_v1 }
  0xd1   :  { %623 = vst.msk [vmem:[%s1703_s7 + $0x14] sm:$0xf] %vm617_vm1, %v606_v4  ;;  %v320_v2 = vmul.f32 %v1505_v24, %v286_v5 }
  0xd2   :  { %v359_v12 = vmax.f32 %v343_v59, 0.0  ;;  %v347_v14 = vadd.f32 %v1510_v41, %v327_v10  ;;  %720 = vst.msk [vmem:[%s1703_s7 + $0x14] sm:$0xf] %vm714_vm2, %v1542_v3 }
  0xd3   :  { %v340_v8 = vadd.f32 %v1510_v41, %v320_v2  ;;  %727 = vst.msk [vmem:[%s1703_s7 + $0x30] sm:$0xf] %vm714_vm2, %v691_v11 }
  0xd4   :  { %v610_v25 = vpack.c.bf16 %v359_v12, %v359_v12  ;;  %v363_v9 = vmax.f32 %v347_v14, 0.0 }
  0xd5   :  { %v356_v29 = vmax.f32 %v340_v8, 0.0  ;;  %v256_v21 = vpop.f32.mrf.mxu2 }
  0xd6   :  { %627 = vst.msk [vmem:[%s1703_s7 + $0x24] sm:$0xf] %vm617_vm1, %v610_v25  ;;  %v614_v26 = vpack.c.bf16 %v363_v9, %v363_v9  ;;  %v306_v27 = vadd.f32 %v305_v17, %v256_v21  ;;  %v238_v3 = vpop.f32.mrf.mxu0 }
  0xd7   :  { %v607_v16 = vpack.c.bf16 %v356_v29, %v356_v29  ;;  %v288_v23 = vadd.f32 %v1558_v20, %v238_v3  ;;  %724 = vst.msk [vmem:[%s1703_s7 + $0x24] sm:$0xf] %vm714_vm2, %v685_v44 }
  0xd8   :  { %631 = vst.msk [vmem:[%s1703_s7 + $0x34] sm:$0xf] %vm617_vm1, %v614_v26  ;;  %v328_v28 = vmul.f32 %v1505_v24, %v306_v27 }
  0xd9   :  { %624 = vst.msk [vmem:[%s1703_s7 + $0x18] sm:$0xf] %vm617_vm1, %v607_v16  ;;  %v321_v20 = vmul.f32 %v1505_v24, %v288_v23 }
  0xda   :  { %721 = vst.msk [vmem:[%s1703_s7 + $0x18] sm:$0xf] %vm714_vm2, %v1560_v22  ;;  %v348_v34 = vadd.f32 %v1510_v41, %v328_v28 }
  0xdb   :  { %v341_v36 = vadd.f32 %v1510_v41, %v321_v20  ;;  %728 = vst.msk [vmem:[%s1703_s7 + $0x34] sm:$0xf] %vm714_vm2, %v693_v32 }
  0xdc   :  { %v364_v35 = vmax.f32 %v348_v34, 0.0 }
  0xdd   :  { %v357_v37 = vmax.f32 %v341_v36, 0.0  ;;  %v258_v31 = vpop.f32.mrf.mxu2 }
  0xde   :  { %v615_v38 = vpack.c.bf16 %v364_v35, %v364_v35  ;;  %v308_v6 = vadd.f32 %v307_v30, %v258_v31 }
  0xdf   :  { %v608_v39 = vpack.c.bf16 %v357_v37, %v357_v37 }
  0xe0   :  { %632 = vst.msk [vmem:[%s1703_s7 + $0x38] sm:$0xf] %vm617_vm1, %v615_v38  ;;  %v329_v22 = vmul.f32 %v1505_v24, %v308_v6 }
  0xe1   :  { %625 = vst.msk [vmem:[%s1703_s7 + $0x1c] sm:$0xf] %vm617_vm1, %v608_v39 }
  0xe2   :  { %722 = vst.msk [vmem:[%s1703_s7 + $0x1c] sm:$0xf] %vm714_vm2, %v1550_v15  ;;  %v349_v40 = vadd.f32 %v1510_v41, %v329_v22 }
  0xe3   :  { %729 = vst.msk [vmem:[%s1703_s7 + $0x38] sm:$0xf] %vm714_vm2, %v695_v7 }
  0xe4   :  { %v365_v24 = vmax.f32 %v349_v40, 0.0 }
  0xe6   :  { %v616_v42 = vpack.c.bf16 %v365_v24, %v365_v24 }
  0xe8   :  { %633 = vst.msk [vmem:[%s1703_s7 + $0x3c] sm:$0xf] %vm617_vm1, %v616_v42 }
  0xe9   :  { %730 = vst.msk [vmem:[%s1703_s7 + $0x3c] sm:$0xf] %vm714_vm2, %v697_v13 }

// kernel: _lambda_.55
= control target key start
LH: loop header
LB: loop body
LE: loop exit
PB: predicated region body
PF: predicated region fallthrough
CT: control target
= control target key end

     0   :  { %vm363_vm0 = vcmask 1044480   ;;  %vm364_vm1 = vcmask 1045504   ;;  %v3215_v2 = vmov 65535   ;;  %vm266_vm2 = vcmask 220160   ;;  %s3216_s9 = smov 13   ;;  %s5156_s1 = inlined_call_operand.vmem [shape: bf16[27,13], index: 1, kind: input, shape index: {}]   ;;  %s5157_s2 = inlined_call_operand.vmem [shape: bf16[4,512,3], index: 2, kind: input, shape index: {}]   ;;  %s5158_s5 = inlined_call_operand.vmem [shape: f32[1,3], index: 5, kind: input, shape index: {}]   ;;  %s5159_s0 = inlined_call_operand.vmem [shape: bf16[512,27], index: 0, kind: input, shape index: {}]   ;;  %s5160_s6 = inlined_call_operand.vmem [shape: f32[1,3], index: 6, kind: input, shape index: {}]   ;;  %s5161_s3 = inlined_call_operand.vmem [shape: f32[1,13], index: 3, kind: input, shape index: {}]   ;;  %s5162_s4 = inlined_call_operand.vmem [shape: f32[1,13], index: 4, kind: input, shape index: {}]   ;;  %s5163_s7 = inlined_call_operand.vmem [shape: bf16[512,16], index: 7, kind: output, shape index: {}]  }
   0x1   :  { %v2298_v0 = vld [vmem:[%s5156_s1 + $0x8] sm:$0xf]  ;;  %v2557_v1 = vld [vmem:[%s5156_s1 + $0x8] sm:$0x30]  ;;  %v365_v3 = vsel %vm363_vm0, 4294967295, %v3215_v2  ;;  %v2559_v6 = vld [vmem:[%s5157_s2] sm:$0xff]  }
   0x2   :  { %v2299_v4 = vor.u32 %v2557_v1, %v2298_v0  ;;  %v366_v5 = vsel %vm364_vm1, %v365_v3, 0  ;;  %v3101_v7 = vld [vmem:[%s5157_s2 + $0x100] sm:$0xff]   ;;  %v2560_v10 = vunpack.c.l.bf16 %v2559_v6  ;;  %v2561_v11 = vunpack.c.h.bf16 %v2559_v6  ;;  %v3070_v19 = vld [vmem:[%s5157_s2 + $0x8] sm:$0xff]   ;;  %v3072_v37 = vld [vmem:[%s5157_s2 + $0x18] sm:$0xff]  }
   0x3   :  { %v3133_v8 = vld [vmem:[%s5157_s2 + $0x200] sm:$0xff]   ;;  %v2688_v12 = vunpack.c.l.bf16 %v3101_v7  ;;  %v2689_v15 = vunpack.c.h.bf16 %v3101_v7  ;;  %v2564_v22 = vunpack.c.l.bf16 %v3070_v19  ;;  %v2565_v23 = vunpack.c.h.bf16 %v3070_v19  ;;  %v3102_v24 = vld [vmem:[%s5157_s2 + $0x108] sm:$0xff]   ;;  %v3104_v38 = vld [vmem:[%s5157_s2 + $0x118] sm:$0xff]  }
   0x4   :  { %v368_v9 = vand.u32 %v2299_v4, %v366_v5  ;;  %v3165_v13 = vld [vmem:[%s5157_s2 + $0x300] sm:$0xff]   ;;  %v2816_v16 = vunpack.c.l.bf16 %v3133_v8  ;;  %v2817_v17 = vunpack.c.h.bf16 %v3133_v8  ;;  %v3134_v25 = vld [vmem:[%s5157_s2 + $0x208] sm:$0xff]   ;;  %v2692_v28 = vunpack.c.l.bf16 %v3102_v24  ;;  %v3136_v44 = vld [vmem:[%s5157_s2 + $0x218] sm:$0xff]  }
   0x5   :  { %v2556_v14 = vld [vmem:[%s5156_s1] sm:$0xff]  ;;  %v2944_v18 = vunpack.c.l.bf16 %v3165_v13  ;;  %v996_v20 = vmax.f32 %v2560_v10, %v2688_v12  ;;  %v2945_v21 = vunpack.c.h.bf16 %v3165_v13  ;;  %v3166_v26 = vld [vmem:[%s5157_s2 + $0x308] sm:$0xff]   ;;  %v2693_v29 = vunpack.c.h.bf16 %v3102_v24  ;;  %v3168_v45 = vld [vmem:[%s5157_s2 + $0x318] sm:$0xff]  }
   0x6   :  { %376 = vmatpush.bf16.msra.mxu0 %v368_v9  ;;  %3197 = vmatpush.bf16.msra.mxu1 %v368_v9  ;;  %v2524_v27 = vld [vmem:[%s5159_s0] sm:$0xff]  ;;  %v2820_v30 = vunpack.c.l.bf16 %v3134_v25  ;;  %v2821_v31 = vunpack.c.h.bf16 %v3134_v25  ;;  %v2948_v34 = vunpack.c.l.bf16 %v3166_v26  ;;  %v2949_v35 = vunpack.c.h.bf16 %v3166_v26 }
   0x7   :  { %3198 = vmatpush.bf16.msra.mxu2 %v368_v9  ;;  %3199 = vmatpush.bf16.msra.mxu3 %v368_v9  ;;  %v1189_v32 = vmax.f32 %v996_v20, %v2816_v16  ;;  %v3296_v33 = vld [vmem:[%s5158_s5] ss:$0 sm:$0xff]  ;;  %v997_v36 = vmax.f32 %v2561_v11, %v2689_v15  ;;  %v998_v40 = vmax.f32 %v2564_v22, %v2692_v28  ;;  %v2572_v42 = vunpack.c.l.bf16 %v3072_v37 }
   0x8   :  { %v2532_v39 = vld [vmem:[%s5159_s0 + $0x40] sm:$0xff]  ;;  %v999_v41 = vmax.f32 %v2565_v23, %v2693_v29  ;;  %v2700_v43 = vunpack.c.l.bf16 %v3104_v38  ;;  %v2828_v51 = vunpack.c.l.bf16 %v3136_v44  ;;  %v2956_v52 = vunpack.c.l.bf16 %v3168_v45 }
   0x9   :  { %v2540_v46 = vld [vmem:[%s5159_s0 + $0x80] sm:$0xff]  ;;  %v1382_v47 = vmax.f32 %v1189_v32, %v2944_v18  ;;  %v1190_v49 = vmax.f32 %v997_v36, %v2817_v17  ;;  %v1191_v53 = vmax.f32 %v998_v40, %v2820_v30  ;;  %v2573_v56 = vunpack.c.h.bf16 %v3072_v37  ;;  %v3103_v30 = vld [vmem:[%s5157_s2 + $0x110] sm:$0xff]  }
   0xa   :  { %377 = vmatpush.bf16.msra.mxu0 %v2556_v14  ;;  %3200 = vmatpush.bf16.msra.mxu1 %v2556_v14  ;;  %v3319_v48 = vld [vmem:[%s5160_s6] ss:$0 sm:$0xff]  ;;  %v1192_v54 = vmax.f32 %v999_v41, %v2821_v31  ;;  %v1002_v55 = vmax.f32 %v2572_v42, %v2700_v43  ;;  %v2701_v60 = vunpack.c.h.bf16 %v3104_v38  ;;  %v2829_v61 = vunpack.c.h.bf16 %v3136_v44  ;;  %v3373_v31 = vld [vmem:[%s5157_s2 + $0x210] sm:$0xff]   ;;  %v3387_v42 = vld [vmem:[%s5157_s2 + $0x28] sm:$0xff]  }
   0xb   :  { %v2548_v50 = vld [vmem:[%s5159_s0 + $0xc0] sm:$0xff]  ;;  %3201 = vmatpush.bf16.msra.mxu2 %v2556_v14  ;;  %3202 = vmatpush.bf16.msra.mxu3 %v2556_v14  ;;  %v1450_v58 = vmul.f32 %v3296_v33, %v1382_v47  ;;  %v1383_v59 = vmax.f32 %v1190_v49, %v2945_v21  ;;  %v1384_v63 = vmax.f32 %v1191_v53, %v2948_v34  ;;  %v2957_v2 = vunpack.c.h.bf16 %v3168_v45  ;;  %v3363_v21 = vld [vmem:[%s5157_s2 + $0x10] sm:$0xff]   ;;  %v3394_v47 = vld [vmem:[%s5157_s2 + $0x128] sm:$0xff]  }
   0xc   :  { %v3327_v57 = vld [vmem:[%s5157_s2 + $0x20] sm:$0xff]   ;;  %v1385_v0 = vmax.f32 %v1192_v54, %v2949_v35  ;;  %v1195_v1 = vmax.f32 %v1002_v55, %v2828_v51  ;;  %v1003_v6 = vmax.f32 %v2573_v56, %v2701_v60  ;;  %v2568_v35 = vunpack.c.l.bf16 %v3363_v21  ;;  %v3382_v37 = vld [vmem:[%s5157_s2 + $0x310] sm:$0xff]   ;;  %v3399_v49 = vld [vmem:[%s5157_s2 + $0x228] sm:$0xff]  }
   0xd   :  { %v3333_v62 = vld [vmem:[%s5157_s2 + $0x120] sm:$0xff]   ;;  %2300 = vmatmul.msk.bf16.vlgmr.msra.gmra.mxu0 %vm266_vm2, %v2524_v27  ;;  %2308 = vmatmul.msk.bf16.vlgmr.msra.gmra.mxu1 %vm266_vm2, %v2532_v39  ;;  %v1518_v4 = vadd.f32 %v3319_v48, %v1450_v58  ;;  %v1451_v5 = vmul.f32 %v3296_v33, %v1383_v59  ;;  %v2577_v7 = vunpack.c.h.bf16 %v3327_v57  ;;  %v1452_v8 = vmul.f32 %v3296_v33, %v1384_v63  ;;  %v3075_v55 = vld [vmem:[%s5157_s2 + $0x30] sm:$0xff]  }
   0xe   :  { %v3340_v3 = vld [vmem:[%s5157_s2 + $0x220] sm:$0xff]   ;;  %2316 = vmatmul.msk.bf16.vlgmr.msra.gmra.mxu2 %vm266_vm2, %v2540_v46  ;;  %2324 = vmatmul.msk.bf16.vlgmr.msra.gmra.mxu3 %vm266_vm2, %v2548_v50  ;;  %v1453_v9 = vmul.f32 %v3296_v33, %v1385_v0  ;;  %v1388_v10 = vmax.f32 %v1195_v1, %v2956_v52  ;;  %v2705_v11 = vunpack.c.h.bf16 %v3333_v62  ;;  %v1196_v15 = vmax.f32 %v1003_v6, %v2829_v61  ;;  %v3404_v50 = vld [vmem:[%s5157_s2 + $0x328] sm:$0xff]   ;;  %v3107_v56 = vld [vmem:[%s5157_s2 + $0x130] sm:$0xff]  }
   0xf   :  { %v3353_v12 = vld [vmem:[%s5157_s2 + $0x320] sm:$0xff]   ;;  %v1582_v13 = vmax.f32 %v1518_v4, 0.0  ;;  %v1519_v14 = vadd.f32 %v3319_v48, %v1451_v5  ;;  %v2833_v16 = vunpack.c.h.bf16 %v3340_v3  ;;  %v1520_v17 = vadd.f32 %v3319_v48, %v1452_v8  ;;  %v3139_v63 = vld [vmem:[%s5157_s2 + $0x230] sm:$0xff]   ;;  %v2525_v1 = vld [vmem:[%s5159_s0 + $0x8] sm:$0xff] }
  0x10   :  { %v1521_v18 = vadd.f32 %v3319_v48, %v1453_v9  ;;  %v1456_v19 = vmul.f32 %v3296_v33, %v1388_v10  ;;  %v1005_v20 = vmax.f32 %v2577_v7, %v2705_v11  ;;  %v1389_v24 = vmax.f32 %v1196_v15, %v2957_v2  ;;  %v3171_v0 = vld [vmem:[%s5157_s2 + $0x330] sm:$0xff]   ;;  %v2533_v2 = vld [vmem:[%s5159_s0 + $0x48] sm:$0xff] }
  0x11   :  { %v1775_v22 = vpack.c.bf16 %v1582_v13, %v1582_v13  ;;  %v1583_v23 = vmax.f32 %v1519_v14, 0.0  ;;  %v2961_v25 = vunpack.c.h.bf16 %v3353_v12  ;;  %v1584_v26 = vmax.f32 %v1520_v17, 0.0  ;;  %v2541_v8 = vld [vmem:[%s5159_s0 + $0x88] sm:$0xff] }
  0x12   :  { %v1585_v27 = vmax.f32 %v1521_v18, 0.0  ;;  %v1524_v28 = vadd.f32 %v3319_v48, %v1456_v19  ;;  %v1198_v29 = vmax.f32 %v1005_v20, %v2833_v16  ;;  %v1457_v34 = vmul.f32 %v3296_v33, %v1389_v24  ;;  %v2549_v10 = vld [vmem:[%s5159_s0 + $0xc8] sm:$0xff]  ;;  %v3453_v24 = vld [vmem:[%s5157_s2 + $0x138] sm:$0xff]  }
  0x13   :  { %1903 = vrot.lane.b32.xlu0 %v1775_v22, %s3216_s9  ;;  %v1776_v32 = vpack.c.bf16 %v1583_v23, %v1583_v23  ;;  %v2569_v36 = vunpack.c.h.bf16 %v3363_v21  ;;  %v1777_v38 = vpack.c.bf16 %v1584_v26, %v1584_v26  ;;  %v2696_v44 = vunpack.c.l.bf16 %v3103_v30  ;;  %v3448_v23 = vld [vmem:[%s5157_s2 + $0x38] sm:$0xff]  }
  0x14   :  { %v1778_v39 = vpack.c.bf16 %v1585_v27, %v1585_v27  ;;  %v1588_v40 = vmax.f32 %v1524_v28, 0.0  ;;  %v1391_v41 = vmax.f32 %v1198_v29, %v2961_v25  ;;  %v1525_v43 = vadd.f32 %v3319_v48, %v1457_v34  ;;  %v3462_v29 = vld [vmem:[%s5157_s2 + $0x238] sm:$0xff]  }
  0x15   :  { %v2697_v45 = vunpack.c.h.bf16 %v3103_v30  ;;  %v2824_v46 = vunpack.c.l.bf16 %v3373_v31  ;;  %1907 = vrot.lane.b32.xlu1 %v1777_v38, %s3216_s9  ;;  %v2825_v53 = vunpack.c.h.bf16 %v3373_v31  ;;  %v2952_v54 = vunpack.c.l.bf16 %v3382_v37 }
  0x16   :  { %v3407_v51 = vpack.c.bf16 %v1588_v40, %v1588_v40  ;;  %v1459_v52 = vmul.f32 %v3296_v33, %v1391_v41  ;;  %v1589_v58 = vmax.f32 %v1525_v43, 0.0  ;;  %v1000_v59 = vmax.f32 %v2568_v35, %v2696_v44  ;;  %v3470_v35 = vld [vmem:[%s5157_s2 + $0x338] sm:$0xff]  }
  0x17   :  { %v2953_v60 = vunpack.c.h.bf16 %v3382_v37  ;;  %v2580_v61 = vunpack.c.l.bf16 %v3387_v42  ;;  %v2708_v5 = vunpack.c.l.bf16 %v3394_v47  ;;  %v2836_v6 = vunpack.c.l.bf16 %v3399_v49 }
  0x18   :  { %v1527_v4 = vadd.f32 %v3319_v48, %v1459_v52  ;;  %v2964_v7 = vunpack.c.l.bf16 %v3404_v50  ;;  %v3439_v9 = vpack.c.bf16 %v1589_v58, %v1589_v58  ;;  %v1193_v11 = vmax.f32 %v1000_v59, %v2824_v46 }
  0x19   :  { %v2584_v13 = vunpack.c.l.bf16 %v3075_v55  ;;  %v2712_v14 = vunpack.c.l.bf16 %v3107_v56  ;;  %v1006_v16 = vmax.f32 %v2580_v61, %v2708_v5  ;;  %v2840_v17 = vunpack.c.l.bf16 %v3139_v63 }
  0x1a   :  { %v1591_v15 = vmax.f32 %v1527_v4, 0.0  ;;  %v2968_v18 = vunpack.c.l.bf16 %v3171_v0  ;;  %v1386_v19 = vmax.f32 %v1193_v11, %v2952_v54  ;;  %v1001_v21 = vmax.f32 %v2569_v36, %v2697_v45 }
  0x1b   :  { %1905 = vrot.lane.b32.xlu0 %v1776_v32, %s3216_s9  ;;  %v1008_v20 = vmax.f32 %v2584_v13, %v2712_v14  ;;  %v2585_v22 = vunpack.c.h.bf16 %v3075_v55  ;;  %v1199_v26 = vmax.f32 %v1006_v16, %v2836_v6  ;;  %v2713_v27 = vunpack.c.h.bf16 %v3107_v56  ;;  %v3511_v14 = vld [vmem:[%s5157_s2 + $0x340] sm:$0xff]  }
  0x1c   :  { %v3457_v25 = vpack.c.bf16 %v1591_v15, %v1591_v15  ;;  %v2841_v28 = vunpack.c.h.bf16 %v3139_v63  ;;  %v1454_v30 = vmul.f32 %v3296_v33, %v1386_v19  ;;  %v1194_v32 = vmax.f32 %v1001_v21, %v2825_v53  ;;  %v3110_v19 = vld [vmem:[%s5157_s2 + $0x148] sm:$0xff]  }
  0x1d   :  { %2301 = vmatmul.msk.bf16.gmra.mxu0 %vm266_vm2, %v2525_v1  ;;  %2309 = vmatmul.msk.bf16.gmra.mxu1 %vm266_vm2, %v2533_v2  ;;  %v1201_v31 = vmax.f32 %v1008_v20, %v2840_v17  ;;  %v2969_v34 = vunpack.c.h.bf16 %v3171_v0  ;;  %v1392_v36 = vmax.f32 %v1199_v26, %v2964_v7  ;;  %v1009_v37 = vmax.f32 %v2585_v22, %v2713_v27  ;;  %v3487_v0 = vld [vmem:[%s5157_s2 + $0x40] sm:$0xff]   ;;  %v3142_v20 = vld [vmem:[%s5157_s2 + $0x248] sm:$0xff]  }
  0x1e   :  { %2317 = vmatmul.msk.bf16.gmra.mxu2 %vm266_vm2, %v2541_v8  ;;  %2325 = vmatmul.msk.bf16.gmra.mxu3 %vm266_vm2, %v2549_v10  ;;  %v2589_v38 = vunpack.c.h.bf16 %v3448_v23  ;;  %v2717_v40 = vunpack.c.h.bf16 %v3453_v24  ;;  %v1522_v41 = vadd.f32 %v3319_v48, %v1454_v30  ;;  %v1387_v44 = vmax.f32 %v1194_v32, %v2953_v60  ;;  %v3498_v8 = vld [vmem:[%s5157_s2 + $0x140] sm:$0xff]   ;;  %v3533_v27 = vld [vmem:[%s5157_s2 + $0x348] sm:$0xff]   ;;  %v2534_v30 = vld [vmem:[%s5159_s0 + $0x50] sm:$0xff] }
  0x1f   :  { %1909 = vrot.lane.b32.xlu1 %v1778_v39, %s3216_s9  ;;  %v1394_v43 = vmax.f32 %v1201_v31, %v2968_v18  ;;  %v2845_v45 = vunpack.c.h.bf16 %v3462_v29  ;;  %v1460_v46 = vmul.f32 %v3296_v33, %v1392_v36  ;;  %v1202_v52 = vmax.f32 %v1009_v37, %v2841_v28  ;;  %v2526_v28 = vld [vmem:[%s5159_s0 + $0x10] sm:$0xff] }
  0x20   :  { %v1011_v53 = vmax.f32 %v2589_v38, %v2717_v40  ;;  %v2973_v54 = vunpack.c.h.bf16 %v3470_v35  ;;  %v1586_v55 = vmax.f32 %v1522_v41, 0.0  ;;  %v1455_v56 = vmul.f32 %v3296_v33, %v1387_v44  ;;  %v2542_v37 = vld [vmem:[%s5159_s0 + $0x90] sm:$0xff] }
  0x21   :  { %v1462_v39 = vmul.f32 %v3296_v33, %v1394_v43  ;;  %v2576_v58 = vunpack.c.l.bf16 %v3327_v57  ;;  %v1528_v59 = vadd.f32 %v3319_v48, %v1460_v46  ;;  %v1395_v61 = vmax.f32 %v1202_v52, %v2969_v34  ;;  %v2550_v46 = vld [vmem:[%s5159_s0 + $0xd0] sm:$0xff] }
  0x22   :  { %v1204_v63 = vmax.f32 %v1011_v53, %v2845_v45  ;;  %v2704_v60 = vunpack.c.l.bf16 %v3333_v62  ;;  %v1779_v1 = vpack.c.bf16 %v1586_v55, %v1586_v55  ;;  %v1523_v4 = vadd.f32 %v3319_v48, %v1455_v56 }
  0x23   :  { %1915 = vrot.lane.b32.xlu0 %v3407_v51, %s3216_s9  ;;  %v1530_v2 = vadd.f32 %v3319_v48, %v1462_v39  ;;  %v2832_v57 = vunpack.c.l.bf16 %v3340_v3  ;;  %v1592_v5 = vmax.f32 %v1528_v59, 0.0  ;;  %v1463_v6 = vmul.f32 %v3296_v33, %v1395_v61  ;;  %v3503_v51 = vld [vmem:[%s5157_s2 + $0x240] sm:$0xff]  }
  0x24   :  { %v1397_v7 = vmax.f32 %v1204_v63, %v2973_v54  ;;  %v1004_v62 = vmax.f32 %v2576_v58, %v2704_v60  ;;  %1911 = vrot.lane.b32.xlu2 %v1779_v1, %s3216_s9  ;;  %v1587_v11 = vmax.f32 %v1523_v4, 0.0  ;;  %v2960_v3 = vunpack.c.l.bf16 %v3353_v12  ;;  %v3078_v12 = vld [vmem:[%s5157_s2 + $0x48] sm:$0xff]  }
  0x25   :  { %v1594_v10 = vmax.f32 %v1530_v2, 0.0  ;;  %v2592_v13 = vunpack.c.l.bf16 %v3487_v0  ;;  %v1785_v15 = vpack.c.bf16 %v1592_v5, %v1592_v5  ;;  %v1531_v16 = vadd.f32 %v3319_v48, %v1463_v6  ;;  %v3574_v2 = vld [vmem:[%s5157_s2 + $0x150] sm:$0xff]  }
  0x26   :  { %v1465_v17 = vmul.f32 %v3296_v33, %v1397_v7  ;;  %v1197_v18 = vmax.f32 %v1004_v62, %v2832_v57  ;;  %v2720_v22 = vunpack.c.l.bf16 %v3498_v8  ;;  %v2848_v26 = vunpack.c.l.bf16 %v3503_v51  ;;  %v3587_v6 = vld [vmem:[%s5157_s2 + $0x350] sm:$0xff]  }
  0x27   :  { %1917 = vrot.lane.b32.xlu1 %v3439_v9, %s3216_s9  ;;  %v3526_v21 = vpack.c.bf16 %v1594_v10, %v1594_v10  ;;  %v1780_v9 = vpack.c.bf16 %v1587_v11, %v1587_v11  ;;  %v1595_v31 = vmax.f32 %v1531_v16, 0.0  ;;  %v2976_v36 = vunpack.c.l.bf16 %v3511_v14 }
  0x28   :  { %v1533_v32 = vadd.f32 %v3319_v48, %v1465_v17  ;;  %v1390_v34 = vmax.f32 %v1197_v18, %v2960_v3  ;;  %v1012_v38 = vmax.f32 %v2592_v13, %v2720_v22  ;;  %v2596_v40 = vunpack.c.l.bf16 %v3078_v12 }
  0x29   :  { %v2724_v41 = vunpack.c.l.bf16 %v3110_v19  ;;  %v2852_v43 = vunpack.c.l.bf16 %v3142_v20  ;;  %v3546_v44 = vpack.c.bf16 %v1595_v31, %v1595_v31  ;;  %v2980_v53 = vunpack.c.l.bf16 %v3533_v27 }
  0x2a   :  { %v1597_v45 = vmax.f32 %v1533_v32, 0.0  ;;  %v1458_v52 = vmul.f32 %v3296_v33, %v1390_v34  ;;  %v1205_v54 = vmax.f32 %v1012_v38, %v2848_v26  ;;  %v2581_v39 = vunpack.c.h.bf16 %v3387_v42  ;;  %v3622_v38 = vld [vmem:[%s5157_s2 + $0x358] sm:$0xff]  }
  0x2b   :  { %1921 = vrot.lane.b32.xlu0 %v3457_v25, %s3216_s9  ;;  %v1014_v55 = vmax.f32 %v2596_v40, %v2724_v41  ;;  %v2709_v56 = vunpack.c.h.bf16 %v3394_v47  ;;  %v2837_v61 = vunpack.c.h.bf16 %v3399_v49  ;;  %v2965_v63 = vunpack.c.h.bf16 %v3404_v50  ;;  %v3567_v25 = vld [vmem:[%s5157_s2 + $0x50] sm:$0xff]  }
  0x2c   :  { %v3559_v58 = vpack.c.bf16 %v1597_v45, %v1597_v45  ;;  %v1526_v59 = vadd.f32 %v3319_v48, %v1458_v52  ;;  %1913 = vrot.lane.b32.xlu2 %v1780_v9, %s3216_s9  ;;  %v1398_v42 = vmax.f32 %v1205_v54, %v2976_v36  ;;  %v2597_v1 = vunpack.c.h.bf16 %v3078_v12  ;;  %v3579_v49 = vld [vmem:[%s5157_s2 + $0x250] sm:$0xff]   ;;  %v3113_v54 = vld [vmem:[%s5157_s2 + $0x160] sm:$0xff]  }
  0x2d   :  { %2302 = vmatmul.msk.bf16.gmra.mxu0 %vm266_vm2, %v2526_v28  ;;  %2310 = vmatmul.msk.bf16.gmra.mxu1 %vm266_vm2, %v2534_v30  ;;  %v1207_v47 = vmax.f32 %v1014_v55, %v2852_v43  ;;  %v1007_v60 = vmax.f32 %v2581_v39, %v2709_v56  ;;  %v2725_v4 = vunpack.c.h.bf16 %v3110_v19  ;;  %v2853_v57 = vunpack.c.h.bf16 %v3142_v20  ;;  %v3640_v55 = vld [vmem:[%s5157_s2 + $0x260] sm:$0xff]  }
  0x2e   :  { %2318 = vmatmul.msk.bf16.gmra.mxu2 %vm266_vm2, %v2542_v37  ;;  %2326 = vmatmul.msk.bf16.gmra.mxu3 %vm266_vm2, %v2550_v46  ;;  %v1590_v50 = vmax.f32 %v1526_v59, 0.0  ;;  %v2981_v5 = vunpack.c.h.bf16 %v3533_v27  ;;  %v1466_v7 = vmul.f32 %v3296_v33, %v1398_v42  ;;  %v2601_v11 = vunpack.c.h.bf16 %v3567_v25  ;;  %v3601_v27 = vld [vmem:[%s5157_s2 + $0x58] sm:$0xff]  }
  0x2f   :  { %1923 = vrot.lane.b32.xlu1 %v1785_v15, %s3216_s9  ;;  %v1400_v62 = vmax.f32 %v1207_v47, %v2980_v53  ;;  %v1200_v10 = vmax.f32 %v1007_v60, %v2837_v61  ;;  %v1015_v13 = vmax.f32 %v2597_v1, %v2725_v4  ;;  %v2729_v15 = vunpack.c.h.bf16 %v3574_v2  ;;  %v3081_v53 = vld [vmem:[%s5157_s2 + $0x60] sm:$0xff]   ;;  %v2527_v61 = vld [vmem:[%s5159_s0 + $0x18] sm:$0xff] }
  0x30   :  { %v1783_v3 = vpack.c.bf16 %v1590_v50, %v1590_v50  ;;  %v2857_v16 = vunpack.c.h.bf16 %v3579_v49  ;;  %v1534_v17 = vadd.f32 %v3319_v48, %v1466_v7  ;;  %v2985_v19 = vunpack.c.h.bf16 %v3587_v6  ;;  %v3655_v50 = vld [vmem:[%s5157_s2 + $0x360] sm:$0xff]   ;;  %v2543_v4 = vld [vmem:[%s5159_s0 + $0x98] sm:$0xff] }
  0x31   :  { %v1468_v18 = vmul.f32 %v3296_v33, %v1400_v62  ;;  %v1393_v12 = vmax.f32 %v1200_v10, %v2965_v63  ;;  %v1208_v20 = vmax.f32 %v1015_v13, %v2853_v57  ;;  %v1017_v9 = vmax.f32 %v2601_v11, %v2729_v15  ;;  %v2535_v63 = vld [vmem:[%s5159_s0 + $0x58] sm:$0xff] }
  0x32   :  { %v2588_v22 = vunpack.c.l.bf16 %v3448_v23  ;;  %v2716_v26 = vunpack.c.l.bf16 %v3453_v24  ;;  %v1598_v28 = vmax.f32 %v1534_v17, 0.0  ;;  %v2844_v32 = vunpack.c.l.bf16 %v3462_v29  ;;  %v3611_v23 = vld [vmem:[%s5157_s2 + $0x158] sm:$0xff]  }
  0x33   :  { %1927 = vrot.lane.b32.xlu0 %v3526_v21, %s3216_s9  ;;  %v1536_v30 = vadd.f32 %v3319_v48, %v1468_v18  ;;  %v1461_v31 = vmul.f32 %v3296_v33, %v1393_v12  ;;  %v1401_v24 = vmax.f32 %v1208_v20, %v2981_v5  ;;  %v1210_v34 = vmax.f32 %v1017_v9, %v2857_v16  ;;  %v3617_v21 = vld [vmem:[%s5157_s2 + $0x258] sm:$0xff]  }
  0x34   :  { %v1010_v36 = vmax.f32 %v2588_v22, %v2716_v26  ;;  %v2972_v37 = vunpack.c.l.bf16 %v3470_v35  ;;  %1919 = vrot.lane.b32.xlu2 %v1783_v3, %s3216_s9  ;;  %v1791_v29 = vpack.c.bf16 %v1598_v28, %v1598_v28  ;;  %v2604_v43 = vunpack.c.l.bf16 %v3601_v27  ;;  %v2551_v3 = vld [vmem:[%s5159_s0 + $0xd8] sm:$0xff] }
  0x35   :  { %v1600_v40 = vmax.f32 %v1536_v30, 0.0  ;;  %v1529_v41 = vadd.f32 %v3319_v48, %v1461_v31  ;;  %v1469_v35 = vmul.f32 %v3296_v33, %v1401_v24  ;;  %v1403_v45 = vmax.f32 %v1210_v34, %v2985_v19 }
  0x36   :  { %v1203_v46 = vmax.f32 %v1010_v36, %v2844_v32  ;;  %v2732_v52 = vunpack.c.l.bf16 %v3611_v23  ;;  %v2860_v56 = vunpack.c.l.bf16 %v3617_v21  ;;  %v2988_v59 = vunpack.c.l.bf16 %v3622_v38 }
  0x37   :  { %1929 = vrot.lane.b32.xlu1 %v3546_v44, %s3216_s9  ;;  %v1793_v44 = vpack.c.bf16 %v1600_v40, %v1600_v40  ;;  %v1593_v39 = vmax.f32 %v1529_v41, 0.0  ;;  %v1537_v42 = vadd.f32 %v3319_v48, %v1469_v35  ;;  %v1471_v47 = vmul.f32 %v3296_v33, %v1403_v45 }
  0x38   :  { %v1396_v60 = vmax.f32 %v1203_v46, %v2972_v37  ;;  %v1018_v1 = vmax.f32 %v2604_v43, %v2732_v52  ;;  %v2608_v5 = vunpack.c.l.bf16 %v3081_v53  ;;  %v2736_v7 = vunpack.c.l.bf16 %v3113_v54  ;;  %v3695_v37 = vld [vmem:[%s5157_s2 + $0x268] sm:$0xff]  }
  0x39   :  { %v1786_v57 = vpack.c.bf16 %v1593_v39, %v1593_v39  ;;  %v2864_v62 = vunpack.c.l.bf16 %v3640_v55  ;;  %v1601_v10 = vmax.f32 %v1537_v42, 0.0  ;;  %v1539_v11 = vadd.f32 %v3319_v48, %v1471_v47  ;;  %v3716_v47 = vld [vmem:[%s5157_s2 + $0x70] sm:$0xff]  }
  0x3a   :  { %v1464_v13 = vmul.f32 %v3296_v33, %v1396_v60  ;;  %v1211_v15 = vmax.f32 %v1018_v1, %v2860_v56  ;;  %v1020_v16 = vmax.f32 %v2608_v5, %v2736_v7  ;;  %v2992_v17 = vunpack.c.l.bf16 %v3655_v50  ;;  %v3721_v60 = vld [vmem:[%s5157_s2 + $0x170] sm:$0xff]  }
  0x3b   :  { %1933 = vrot.lane.b32.xlu0 %v3559_v58, %s3216_s9  ;;  %v2593_v18 = vunpack.c.h.bf16 %v3487_v0  ;;  %v2721_v12 = vunpack.c.h.bf16 %v3498_v8  ;;  %v1794_v19 = vpack.c.bf16 %v1601_v10, %v1601_v10  ;;  %v2849_v26 = vunpack.c.h.bf16 %v3503_v51  ;;  %v3681_v8 = vld [vmem:[%s5157_s2 + $0x68] sm:$0xff]   ;;  %v3736_v10 = vld [vmem:[%s5157_s2 + $0x370] sm:$0xff]  }
  0x3c   :  { %v1532_v20 = vadd.f32 %v3319_v48, %v1464_v13  ;;  %v1404_v9 = vmax.f32 %v1211_v15, %v2988_v59  ;;  %1925 = vrot.lane.b32.xlu2 %v1786_v57, %s3216_s9  ;;  %v1213_v58 = vmax.f32 %v1020_v16, %v2864_v62  ;;  %v2977_v0 = vunpack.c.h.bf16 %v3511_v14  ;;  %v3689_v51 = vld [vmem:[%s5157_s2 + $0x168] sm:$0xff]  }
  0x3d   :  { %2303 = vmatmul.msk.bf16.gmra.mxu0 %vm266_vm2, %v2527_v61  ;;  %2311 = vmatmul.msk.bf16.gmra.mxu1 %vm266_vm2, %v2535_v63  ;;  %v1013_v22 = vmax.f32 %v2593_v18, %v2721_v12  ;;  %v1603_v28 = vmax.f32 %v1539_v11, 0.0  ;;  %v2609_v32 = vunpack.c.h.bf16 %v3081_v53  ;;  %v2737_v34 = vunpack.c.h.bf16 %v3113_v54  ;;  %v3741_v11 = vld [vmem:[%s5157_s2 + $0x78] sm:$0xff]  }
  0x3e   :  { %2319 = vmatmul.msk.bf16.gmra.mxu2 %vm266_vm2, %v2543_v4  ;;  %2327 = vmatmul.msk.bf16.gmra.mxu3 %vm266_vm2, %v2551_v3  ;;  %v1596_v30 = vmax.f32 %v1532_v20, 0.0  ;;  %v1472_v31 = vmul.f32 %v3296_v33, %v1404_v9  ;;  %v1406_v14 = vmax.f32 %v1213_v58, %v2992_v17  ;;  %v2865_v36 = vunpack.c.h.bf16 %v3640_v55  ;;  %v3754_v12 = vld [vmem:[%s5157_s2 + $0x278] sm:$0xff]   ;;  %v2528_v20 = vld [vmem:[%s5159_s0 + $0x20] sm:$0xff] }
  0x3f   :  { %1935 = vrot.lane.b32.xlu1 %v1791_v29, %s3216_s9  ;;  %v1206_v24 = vmax.f32 %v1013_v22, %v2849_v26  ;;  %v3700_v29 = vld [vmem:[%s5157_s2 + $0x368] sm:$0xff]   ;;  %v2993_v43 = vunpack.c.h.bf16 %v3655_v50  ;;  %v2613_v35 = vunpack.c.h.bf16 %v3681_v8  ;;  %v1021_v52 = vmax.f32 %v2609_v32, %v2737_v34  ;;  %v2536_v9 = vld [vmem:[%s5159_s0 + $0x60] sm:$0xff] }
  0x40   :  { %v1789_v40 = vpack.c.bf16 %v1596_v30, %v1596_v30  ;;  %v1540_v41 = vadd.f32 %v3319_v48, %v1472_v31  ;;  %v1474_v45 = vmul.f32 %v3296_v33, %v1406_v14  ;;  %v2741_v53 = vunpack.c.h.bf16 %v3689_v51 }
  0x41   :  { %v1399_v46 = vmax.f32 %v1206_v24, %v2977_v0  ;;  %v2869_v55 = vunpack.c.h.bf16 %v3695_v37  ;;  %v2997_v39 = vunpack.c.h.bf16 %v3700_v29  ;;  %v2600_v56 = vunpack.c.l.bf16 %v3567_v25  ;;  %v3726_v25 = vld [vmem:[%s5157_s2 + $0x270] sm:$0xff]   ;;  %v2552_v24 = vld [vmem:[%s5159_s0 + $0xe0] sm:$0xff] }
  0x42   :  { %v1604_v54 = vmax.f32 %v1540_v41, 0.0  ;;  %v1542_v59 = vadd.f32 %v3319_v48, %v1474_v45  ;;  %v1214_v63 = vmax.f32 %v1021_v52, %v2865_v36  ;;  %v1023_v42 = vmax.f32 %v2613_v35, %v2741_v53 }
  0x43   :  { %1939 = vrot.lane.b32.xlu0 %v1793_v44, %s3216_s9  ;;  %v1467_v61 = vmul.f32 %v3296_v33, %v1399_v46  ;;  %v1796_v44 = vpack.c.bf16 %v1603_v28, %v1603_v28  ;;  %v2728_v50 = vunpack.c.l.bf16 %v3574_v2  ;;  %v2856_v4 = vunpack.c.l.bf16 %v3579_v49  ;;  %v2544_v28 = vld [vmem:[%s5159_s0 + $0xa0] sm:$0xff] }
  0x44   :  { %v1797_v1 = vpack.c.bf16 %v1604_v54, %v1604_v54  ;;  %1931 = vrot.lane.b32.xlu2 %v1789_v40, %s3216_s9  ;;  %v1407_v5 = vmax.f32 %v1214_v63, %v2993_v43  ;;  %v1216_v7 = vmax.f32 %v1023_v42, %v2869_v55  ;;  %v2984_v62 = vunpack.c.l.bf16 %v3587_v6  ;;  %v3116_v6 = vld [vmem:[%s5157_s2 + $0x178] sm:$0xff]   ;;  %v3798_v42 = vld [vmem:[%s5157_s2 + $0x80] sm:$0xff]  }
  0x45   :  { %v1535_v57 = vadd.f32 %v3319_v48, %v1467_v61  ;;  %v1016_v2 = vmax.f32 %v2600_v56, %v2728_v50  ;;  %v2616_v49 = vunpack.c.l.bf16 %v3716_v47  ;;  %v2744_v3 = vunpack.c.l.bf16 %v3721_v60 }
  0x46   :  { %v2872_v13 = vunpack.c.l.bf16 %v3726_v25  ;;  %v1606_v15 = vmax.f32 %v1542_v59, 0.0  ;;  %v1475_v17 = vmul.f32 %v3296_v33, %v1407_v5  ;;  %v1409_v18 = vmax.f32 %v1216_v7, %v2997_v39 }
  0x47   :  { %1941 = vrot.lane.b32.xlu1 %v1794_v19, %s3216_s9  ;;  %v1599_v16 = vmax.f32 %v1535_v57, 0.0  ;;  %v3759_v19 = vld [vmem:[%s5157_s2 + $0x378] sm:$0xff]   ;;  %v1209_v58 = vmax.f32 %v1016_v2, %v2856_v4  ;;  %v1024_v22 = vmax.f32 %v2616_v49, %v2744_v3  ;;  %v3000_v26 = vunpack.c.l.bf16 %v3736_v10  ;;  %v3809_v57 = vld [vmem:[%s5157_s2 + $0x280] sm:$0xff]  }
  0x48   :  { %v2620_v0 = vunpack.c.l.bf16 %v3741_v11  ;;  %v1543_v31 = vadd.f32 %v3319_v48, %v1475_v17  ;;  %v1477_v32 = vmul.f32 %v3296_v33, %v1409_v18  ;;  %v2748_v14 = vunpack.c.l.bf16 %v3116_v6  ;;  %v3816_v2 = vld [vmem:[%s5157_s2 + $0x380] sm:$0xff]  }
  0x49   :  { %v1792_v30 = vpack.c.bf16 %v1599_v16, %v1599_v16  ;;  %v1402_v34 = vmax.f32 %v1209_v58, %v2984_v62  ;;  %v1217_v36 = vmax.f32 %v1024_v22, %v2872_v13  ;;  %v2876_v40 = vunpack.c.l.bf16 %v3754_v12  ;;  %v3828_v58 = vld [vmem:[%s5157_s2 + $0x88] sm:$0xff]  }
  0x4a   :  { %v3004_v41 = vunpack.c.l.bf16 %v3759_v19  ;;  %v1607_v43 = vmax.f32 %v1543_v31, 0.0  ;;  %v1545_v35 = vadd.f32 %v3319_v48, %v1477_v32  ;;  %v1026_v45 = vmax.f32 %v2620_v0, %v2748_v14 }
  0x4b   :  { %1945 = vrot.lane.b32.xlu0 %v1796_v44, %s3216_s9  ;;  %v2605_v46 = vunpack.c.h.bf16 %v3601_v27  ;;  %v1470_v52 = vmul.f32 %v3296_v33, %v1402_v34  ;;  %v1410_v53 = vmax.f32 %v1217_v36, %v3000_v26  ;;  %v2733_v54 = vunpack.c.h.bf16 %v3611_v23  ;;  %v3843_v34 = vld [vmem:[%s5157_s2 + $0x288] sm:$0xff]  }
  0x4c   :  { %v2861_v55 = vunpack.c.h.bf16 %v3617_v21  ;;  %v1799_v39 = vpack.c.bf16 %v1606_v15, %v1606_v15  ;;  %1937 = vrot.lane.b32.xlu2 %v1792_v30, %s3216_s9  ;;  %v1800_v56 = vpack.c.bf16 %v1607_v43, %v1607_v43  ;;  %v1219_v59 = vmax.f32 %v1026_v45, %v2876_v40  ;;  %v3836_v30 = vld [vmem:[%s5157_s2 + $0x188] sm:$0xff]  }
  0x4d   :  { %2304 = vmatmul.msk.bf16.gmra.mxu0 %vm266_vm2, %v2528_v20  ;;  %2312 = vmatmul.msk.bf16.gmra.mxu1 %vm266_vm2, %v2536_v9  ;;  %v2989_v27 = vunpack.c.h.bf16 %v3622_v38  ;;  %v1538_v61 = vadd.f32 %v3319_v48, %v1470_v52  ;;  %v1478_v63 = vmul.f32 %v3296_v33, %v1410_v53  ;;  %v1019_v23 = vmax.f32 %v2605_v46, %v2733_v54  ;;  %v3803_v38 = vld [vmem:[%s5157_s2 + $0x180] sm:$0xff]   ;;  %v3119_v52 = vld [vmem:[%s5157_s2 + $0x190] sm:$0xff]   ;;  %v2529_v53 = vld [vmem:[%s5159_s0 + $0x28] sm:$0xff] }
  0x4e   :  { %2320 = vmatmul.msk.bf16.gmra.mxu2 %vm266_vm2, %v2544_v28  ;;  %2328 = vmatmul.msk.bf16.gmra.mxu3 %vm266_vm2, %v2552_v24  ;;  %v2621_v21 = vunpack.c.h.bf16 %v3741_v11  ;;  %v1609_v44 = vmax.f32 %v1545_v35, 0.0  ;;  %v2749_v50 = vunpack.c.h.bf16 %v3116_v6  ;;  %v2877_v4 = vunpack.c.h.bf16 %v3754_v12  ;;  %v2537_v54 = vld [vmem:[%s5159_s0 + $0x68] sm:$0xff] }
  0x4f   :  { %1947 = vrot.lane.b32.xlu1 %v1797_v1, %s3216_s9  ;;  %v1412_v1 = vmax.f32 %v1219_v59, %v3004_v41  ;;  %v1602_v5 = vmax.f32 %v1538_v61, 0.0  ;;  %v1546_v7 = vadd.f32 %v3319_v48, %v1478_v63  ;;  %v1212_v62 = vmax.f32 %v1019_v23, %v2861_v55  ;;  %v2545_v61 = vld [vmem:[%s5159_s0 + $0xa8] sm:$0xff] }
  0x50   :  { %v3005_v11 = vunpack.c.h.bf16 %v3759_v19  ;;  %v1027_v3 = vmax.f32 %v2621_v21, %v2749_v50  ;;  %v2625_v13 = vunpack.c.h.bf16 %v3798_v42  ;;  %v2753_v6 = vunpack.c.h.bf16 %v3803_v38  ;;  %v2553_v50 = vld [vmem:[%s5159_s0 + $0xe8] sm:$0xff] }
  0x51   :  { %v1480_v49 = vmul.f32 %v3296_v33, %v1412_v1  ;;  %v1795_v15 = vpack.c.bf16 %v1602_v5, %v1602_v5  ;;  %v1610_v16 = vmax.f32 %v1546_v7, 0.0  ;;  %v1405_v17 = vmax.f32 %v1212_v62, %v2989_v27  ;;  %v3878_v27 = vld [vmem:[%s5157_s2 + $0x390] sm:$0xff]  }
  0x52   :  { %v2881_v18 = vunpack.c.h.bf16 %v3809_v57  ;;  %v1220_v19 = vmax.f32 %v1027_v3, %v2877_v4  ;;  %v1029_v20 = vmax.f32 %v2625_v13, %v2753_v6  ;;  %v3009_v9 = vunpack.c.h.bf16 %v3816_v2 }
  0x53   :  { %1951 = vrot.lane.b32.xlu0 %v1799_v39, %s3216_s9  ;;  %v1548_v12 = vadd.f32 %v3319_v48, %v1480_v49  ;;  %v1802_v22 = vpack.c.bf16 %v1609_v44, %v1609_v44  ;;  %v1473_v26 = vmul.f32 %v3296_v33, %v1405_v17  ;;  %v2612_v0 = vunpack.c.l.bf16 %v3681_v8  ;;  %v3848_v8 = vld [vmem:[%s5157_s2 + $0x388] sm:$0xff]  }
  0x54   :  { %v2740_v28 = vunpack.c.l.bf16 %v3689_v51  ;;  %1943 = vrot.lane.b32.xlu2 %v1795_v15, %s3216_s9  ;;  %v1803_v31 = vpack.c.bf16 %v1610_v16, %v1610_v16  ;;  %v1413_v32 = vmax.f32 %v1220_v19, %v3005_v11  ;;  %v1222_v14 = vmax.f32 %v1029_v20, %v2881_v18 }
  0x55   :  { %v2868_v24 = vunpack.c.l.bf16 %v3695_v37  ;;  %v1541_v51 = vadd.f32 %v3319_v48, %v1473_v26  ;;  %v2996_v40 = vunpack.c.l.bf16 %v3700_v29  ;;  %v2628_v41 = vunpack.c.l.bf16 %v3828_v58  ;;  %v3087_v37 = vld [vmem:[%s5157_s2 + $0x90] sm:$0xff]  }
  0x56   :  { %v1022_v36 = vmax.f32 %v2612_v0, %v2740_v28  ;;  %v1612_v43 = vmax.f32 %v1548_v12, 0.0  ;;  %v1481_v35 = vmul.f32 %v3296_v33, %v1413_v32  ;;  %v1415_v45 = vmax.f32 %v1222_v14, %v3009_v9  ;;  %v3865_v29 = vld [vmem:[%s5157_s2 + $0x290] sm:$0xff]  }
  0x57   :  { %1953 = vrot.lane.b32.xlu1 %v1800_v56, %s3216_s9  ;;  %v2756_v46 = vunpack.c.l.bf16 %v3836_v30  ;;  %v1605_v55 = vmax.f32 %v1541_v51, 0.0  ;;  %v2884_v56 = vunpack.c.l.bf16 %v3843_v34  ;;  %v3012_v59 = vunpack.c.l.bf16 %v3848_v8  ;;  %v3919_v51 = vld [vmem:[%s5157_s2 + $0x298] sm:$0xff]  }
  0x58   :  { %v1215_v39 = vmax.f32 %v1022_v36, %v2868_v24  ;;  %v1549_v63 = vadd.f32 %v3319_v48, %v1481_v35  ;;  %v1483_v23 = vmul.f32 %v3296_v33, %v1415_v45  ;;  %v2632_v44 = vunpack.c.l.bf16 %v3087_v37  ;;  %v3932_v35 = vld [vmem:[%s5158_s5] ss:$0 sm:$0xff] }
  0x59   :  { %v1030_v21 = vmax.f32 %v2628_v41, %v2756_v46  ;;  %v1798_v1 = vpack.c.bf16 %v1605_v55, %v1605_v55  ;;  %v2760_v5 = vunpack.c.l.bf16 %v3119_v52  ;;  %v2888_v7 = vunpack.c.l.bf16 %v3865_v29  ;;  %v3942_v55 = vld [vmem:[%s5160_s6] ss:$0 sm:$0xff] }
  0x5a   :  { %v1408_v4 = vmax.f32 %v1215_v39, %v2996_v40  ;;  %v1613_v62 = vmax.f32 %v1549_v63, 0.0  ;;  %v1551_v11 = vadd.f32 %v3319_v48, %v1483_v23  ;;  %v3016_v3 = vunpack.c.l.bf16 %v3878_v27  ;;  %v3955_v63 = vld [vmem:[%s5157_s2 + $0x1a0] sm:$0xff]  }
  0x5b   :  { %1957 = vrot.lane.b32.xlu0 %v1802_v22, %s3216_s9  ;;  %v1223_v49 = vmax.f32 %v1030_v21, %v2884_v56  ;;  %v1032_v6 = vmax.f32 %v2632_v44, %v2760_v5  ;;  %v2617_v15 = vunpack.c.h.bf16 %v3716_v47  ;;  %v2745_v16 = vunpack.c.h.bf16 %v3721_v60  ;;  %v3907_v60 = vld [vmem:[%s5157_s2 + $0x98] sm:$0xff]  }
  0x5c   :  { %v1476_v13 = vmul.f32 %v3296_v33, %v1408_v4  ;;  %v1805_v17 = vpack.c.bf16 %v1612_v43, %v1612_v43  ;;  %1949 = vrot.lane.b32.xlu2 %v1798_v1, %s3216_s9  ;;  %v1806_v18 = vpack.c.bf16 %v1613_v62, %v1613_v62  ;;  %v2873_v19 = vunpack.c.h.bf16 %v3726_v25  ;;  %v3971_v62 = vld [vmem:[%s5157_s2 + $0x3a0] sm:$0xff]  }
  0x5d   :  { %2305 = vmatmul.msk.bf16.gmra.mxu0 %vm266_vm2, %v2529_v53  ;;  %2313 = vmatmul.msk.bf16.gmra.mxu1 %vm266_vm2, %v2537_v54  ;;  %v1416_v12 = vmax.f32 %v1223_v49, %v3012_v59  ;;  %v1225_v9 = vmax.f32 %v1032_v6, %v2888_v7  ;;  %v1025_v22 = vmax.f32 %v2617_v15, %v2745_v16  ;;  %v3001_v47 = vunpack.c.h.bf16 %v3736_v10  ;;  %v2538_v6 = vld [vmem:[%s5159_s0 + $0x70] sm:$0xff] }
  0x5e   :  { %2321 = vmatmul.msk.bf16.gmra.mxu2 %vm266_vm2, %v2545_v61  ;;  %2329 = vmatmul.msk.bf16.gmra.mxu3 %vm266_vm2, %v2553_v50  ;;  %v1544_v20 = vadd.f32 %v3319_v48, %v1476_v13  ;;  %v1615_v26 = vmax.f32 %v1551_v11, 0.0  ;;  %v2633_v28 = vunpack.c.h.bf16 %v3087_v37  ;;  %v2761_v25 = vunpack.c.h.bf16 %v3119_v52  ;;  %v3950_v61 = vld [vmem:[%s5157_s2 + $0xa0] sm:$0xff]   ;;  %v2530_v13 = vld [vmem:[%s5159_s0 + $0x30] sm:$0xff] }
  0x5f   :  { %1959 = vrot.lane.b32.xlu1 %v1803_v31, %s3216_s9  ;;  %v1484_v0 = vmul.f32 %v3296_v33, %v1416_v12  ;;  %v3913_v31 = vld [vmem:[%s5157_s2 + $0x198] sm:$0xff]   ;;  %v1418_v14 = vmax.f32 %v1225_v9, %v3016_v3  ;;  %v1218_v24 = vmax.f32 %v1025_v22, %v2873_v19  ;;  %v2889_v10 = vunpack.c.h.bf16 %v3865_v29  ;;  %v3090_v3 = vld [vmem:[%s5157_s2 + $0xa8] sm:$0xff]   ;;  %v2546_v19 = vld [vmem:[%s5159_s0 + $0xb0] sm:$0xff] }
  0x60   :  { %v1608_v32 = vmax.f32 %v1544_v20, 0.0  ;;  %v3924_v33 = vld [vmem:[%s5157_s2 + $0x398] sm:$0xff]   ;;  %v1033_v40 = vmax.f32 %v2633_v28, %v2761_v25  ;;  %v3017_v41 = vunpack.c.h.bf16 %v3878_v27  ;;  %v2637_v37 = vunpack.c.h.bf16 %v3907_v60  ;;  %v3154_v12 = vld [vmem:[%s5157_s2 + $0x2a8] sm:$0xff]   ;;  %v2554_v25 = vld [vmem:[%s5159_s0 + $0xf0] sm:$0xff] }
  0x61   :  { %v1552_v36 = vadd.f32 %v3319_v48, %v1484_v0  ;;  %v1486_v45 = vmul.f32 %v3932_v35, %v1418_v14  ;;  %v1411_v46 = vmax.f32 %v1218_v24, %v3001_v47  ;;  %v2765_v52 = vunpack.c.h.bf16 %v3913_v31 }
  0x62   :  { %v1801_v43 = vpack.c.bf16 %v1608_v32, %v1608_v32  ;;  %v1226_v48 = vmax.f32 %v1033_v40, %v2889_v10  ;;  %v2893_v53 = vunpack.c.h.bf16 %v3919_v51  ;;  %v3021_v54 = vunpack.c.h.bf16 %v3924_v33 }
  0x63   :  { %1963 = vrot.lane.b32.xlu0 %v1805_v17, %s3216_s9  ;;  %v1616_v29 = vmax.f32 %v1552_v36, 0.0  ;;  %v1554_v39 = vadd.f32 %v3942_v55, %v1486_v45  ;;  %v1479_v56 = vmul.f32 %v3932_v35, %v1411_v46  ;;  %v1035_v59 = vmax.f32 %v2637_v37, %v2765_v52 }
  0x64   :  { %v2624_v27 = vunpack.c.l.bf16 %v3798_v42  ;;  %v1808_v23 = vpack.c.bf16 %v1615_v26, %v1615_v26  ;;  %1955 = vrot.lane.b32.xlu2 %v1801_v43, %s3216_s9  ;;  %v1419_v21 = vmax.f32 %v1226_v48, %v3017_v41  ;;  %v2752_v44 = vunpack.c.l.bf16 %v3803_v38  ;;  %v3963_v42 = vld [vmem:[%s5157_s2 + $0x2a0] sm:$0xff]   ;;  %v4000_v26 = vld [vmem:[%s5157_s2 + $0x3a8] sm:$0xff]  }
  0x65   :  { %v2880_v1 = vunpack.c.l.bf16 %v3809_v57  ;;  %v1809_v50 = vpack.c.bf16 %v1616_v29, %v1616_v29  ;;  %v1547_v4 = vadd.f32 %v3942_v55, %v1479_v56  ;;  %v1228_v5 = vmax.f32 %v1035_v59, %v2893_v53 }
  0x66   :  { %v3008_v7 = vunpack.c.l.bf16 %v3816_v2  ;;  %v1487_v38 = vmul.f32 %v3932_v35, %v1419_v21  ;;  %v1028_v57 = vmax.f32 %v2624_v27, %v2752_v44  ;;  %v2640_v11 = vunpack.c.l.bf16 %v3950_v61  ;;  %v3122_v2 = vld [vmem:[%s5157_s2 + $0x1a8] sm:$0xff]   ;;  %v4030_v21 = vld [vmem:[%s5157_s2 + $0x1b0] sm:$0xff]  }
  0x67   :  { %1965 = vrot.lane.b32.xlu1 %v1806_v18, %s3216_s9  ;;  %v2768_v49 = vunpack.c.l.bf16 %v3955_v63  ;;  %v1618_v15 = vmax.f32 %v1554_v39, 0.0  ;;  %v1611_v16 = vmax.f32 %v1547_v4, 0.0  ;;  %v1421_v17 = vmax.f32 %v1228_v5, %v3021_v54 }
  0x68   :  { %v2896_v18 = vunpack.c.l.bf16 %v3963_v42  ;;  %v1555_v20 = vadd.f32 %v3942_v55, %v1487_v38  ;;  %v1221_v9 = vmax.f32 %v1028_v57, %v2880_v1  ;;  %v3024_v47 = vunpack.c.l.bf16 %v3971_v62  ;;  %v4042_v57 = vld [vmem:[%s5157_s2 + $0x3b0] sm:$0xff]  }
  0x69   :  { %v1036_v22 = vmax.f32 %v2640_v11, %v2768_v49  ;;  %v1804_v0 = vpack.c.bf16 %v1611_v16, %v1611_v16  ;;  %v1489_v28 = vmul.f32 %v3932_v35, %v1421_v17  ;;  %v2644_v32 = vunpack.c.l.bf16 %v3090_v3 }
  0x6a   :  { %v2772_v14 = vunpack.c.l.bf16 %v3122_v2  ;;  %v1619_v24 = vmax.f32 %v1555_v20, 0.0  ;;  %v1414_v10 = vmax.f32 %v1221_v9, %v3008_v7  ;;  %v2900_v40 = vunpack.c.l.bf16 %v3154_v12 }
  0x6b   :  { %1969 = vrot.lane.b32.xlu0 %v1808_v23, %s3216_s9  ;;  %v1229_v36 = vmax.f32 %v1036_v22, %v2896_v18  ;;  %v1557_v41 = vadd.f32 %v3942_v55, %v1489_v28  ;;  %v3028_v43 = vunpack.c.l.bf16 %v4000_v26  ;;  %v2629_v45 = vunpack.c.h.bf16 %v3828_v58 }
  0x6c   :  { %v1038_v37 = vmax.f32 %v2644_v32, %v2772_v14  ;;  %v1811_v46 = vpack.c.bf16 %v1618_v15, %v1618_v15  ;;  %1961 = vrot.lane.b32.xlu2 %v1804_v0, %s3216_s9  ;;  %v1482_v52 = vmul.f32 %v3932_v35, %v1414_v10  ;;  %v2757_v48 = vunpack.c.h.bf16 %v3836_v30  ;;  %v4025_v30 = vld [vmem:[%s5157_s2 + $0xb0] sm:$0xff]   ;;  %v4063_v32 = vld [vmem:[%s5157_s2 + $0x1b8] sm:$0xff]  }
  0x6d   :  { %2306 = vmatmul.msk.bf16.gmra.mxu0 %vm266_vm2, %v2530_v13  ;;  %2314 = vmatmul.msk.bf16.gmra.mxu1 %vm266_vm2, %v2538_v6  ;;  %v1422_v29 = vmax.f32 %v1229_v36, %v3024_v47  ;;  %v1812_v53 = vpack.c.bf16 %v1619_v24, %v1619_v24  ;;  %v2885_v39 = vunpack.c.h.bf16 %v3843_v34  ;;  %v3013_v58 = vunpack.c.h.bf16 %v3848_v8  ;;  %v4056_v47 = vld [vmem:[%s5157_s2 + $0xb8] sm:$0xff]  }
  0x6e   :  { %2322 = vmatmul.msk.bf16.gmra.mxu2 %vm266_vm2, %v2546_v19  ;;  %2330 = vmatmul.msk.bf16.gmra.mxu3 %vm266_vm2, %v2554_v25  ;;  %v1231_v54 = vmax.f32 %v1038_v37, %v2900_v40  ;;  %v1550_v56 = vadd.f32 %v3942_v55, %v1482_v52  ;;  %v1031_v27 = vmax.f32 %v2629_v45, %v2757_v48  ;;  %v2645_v23 = vunpack.c.h.bf16 %v3090_v3  ;;  %v4068_v14 = vld [vmem:[%s5157_s2 + $0x2b8] sm:$0xff]  }
  0x6f   :  { %1971 = vrot.lane.b32.xlu1 %v1809_v50, %s3216_s9  ;;  %v1490_v59 = vmul.f32 %v3932_v35, %v1422_v29  ;;  %v1621_v44 = vmax.f32 %v1557_v41, 0.0  ;;  %v2773_v1 = vunpack.c.h.bf16 %v3122_v2  ;;  %v2901_v8 = vunpack.c.h.bf16 %v3154_v12  ;;  %v4035_v50 = vld [vmem:[%s5157_s2 + $0x2b0] sm:$0xff]   ;;  %v3093_v41 = vld [vmem:[%s5157_s2 + $0xc0] sm:$0xff]   ;;  %v2531_v37 = vld [vmem:[%s5159_s0 + $0x38] sm:$0xff] }
  0x70   :  { %v1424_v34 = vmax.f32 %v1231_v54, %v3028_v43  ;;  %v1614_v4 = vmax.f32 %v1550_v56, 0.0  ;;  %v1224_v7 = vmax.f32 %v1031_v27, %v2885_v39  ;;  %v3029_v38 = vunpack.c.h.bf16 %v4000_v26  ;;  %v2547_v52 = vld [vmem:[%s5159_s0 + $0xb8] sm:$0xff]  ;;  %v3157_v39 = vld [vmem:[%s5157_s2 + $0x2c0] sm:$0xff]  }
  0x71   :  { %v1558_v5 = vadd.f32 %v3942_v55, %v1490_v59  ;;  %v1039_v49 = vmax.f32 %v2645_v23, %v2773_v1  ;;  %v2649_v3 = vunpack.c.h.bf16 %v4025_v30  ;;  %v2777_v2 = vunpack.c.h.bf16 %v4030_v21  ;;  %v2555_v27 = vld [vmem:[%s5159_s0 + $0xf8] sm:$0xff] }
  0x72   :  { %v1492_v11 = vmul.f32 %v3932_v35, %v1424_v34  ;;  %v1807_v13 = vpack.c.bf16 %v1614_v4, %v1614_v4  ;;  %v1417_v15 = vmax.f32 %v1224_v7, %v3013_v58  ;;  %v2905_v16 = vunpack.c.h.bf16 %v4035_v50  ;;  %v4104_v58 = vld [vmem:[%s5157_s2 + $0x3c0] sm:$0xff]  }
  0x73   :  { %1975 = vrot.lane.b32.xlu0 %v1811_v46, %s3216_s9  ;;  %v1622_v6 = vmax.f32 %v1558_v5, 0.0  ;;  %v1232_v18 = vmax.f32 %v1039_v49, %v2901_v8  ;;  %v1041_v12 = vmax.f32 %v2649_v3, %v2777_v2  ;;  %v3033_v19 = vunpack.c.h.bf16 %v4042_v57  ;;  %v3125_v46 = vld [vmem:[%s5157_s2 + $0x1c0] sm:$0xff]  }
  0x74   :  { %v1560_v17 = vadd.f32 %v3942_v55, %v1492_v11  ;;  %v1814_v20 = vpack.c.bf16 %v1621_v44, %v1621_v44  ;;  %1967 = vrot.lane.b32.xlu2 %v1807_v13, %s3216_s9  ;;  %v1485_v22 = vmul.f32 %v3932_v35, %v1417_v15  ;;  %v2636_v25 = vunpack.c.l.bf16 %v3907_v60  ;;  %v4077_v60 = vld [vmem:[%s5157_s2 + $0x3b8] sm:$0xff]  }
  0x75   :  { %v1815_v9 = vpack.c.bf16 %v1622_v6, %v1622_v6  ;;  %v1425_v0 = vmax.f32 %v1232_v18, %v3029_v38  ;;  %v1234_v28 = vmax.f32 %v1041_v12, %v2905_v16  ;;  %v2764_v10 = vunpack.c.l.bf16 %v3913_v31  ;;  %v2539_v31 = vld [vmem:[%s5159_s0 + $0x78] sm:$0xff] }
  0x76   :  { %v1624_v26 = vmax.f32 %v1560_v17, 0.0  ;;  %v1553_v24 = vadd.f32 %v3942_v55, %v1485_v22  ;;  %v2892_v36 = vunpack.c.l.bf16 %v3919_v51  ;;  %v3020_v40 = vunpack.c.l.bf16 %v3924_v33 }
  0x77   :  { %1977 = vrot.lane.b32.xlu1 %v1812_v53, %s3216_s9  ;;  %v1493_v33 = vmul.f32 %v3932_v35, %v1425_v0  ;;  %v1427_v43 = vmax.f32 %v1234_v28, %v3033_v19  ;;  %v2652_v45 = vunpack.c.l.bf16 %v4056_v47  ;;  %v1034_v48 = vmax.f32 %v2636_v25, %v2764_v10  ;;  %v4143_v10 = vld [vmem:[%s5157_s2 + $0x2c8] sm:$0xff]  }
  0x78   :  { %v1817_v51 = vpack.c.bf16 %v1624_v26, %v1624_v26  ;;  %v1617_v29 = vmax.f32 %v1553_v24, 0.0  ;;  %v2780_v53 = vunpack.c.l.bf16 %v4063_v32  ;;  %v2908_v54 = vunpack.c.l.bf16 %v4068_v14 }
  0x79   :  { %v1561_v56 = vadd.f32 %v3942_v55, %v1493_v33  ;;  %v1495_v59 = vmul.f32 %v3932_v35, %v1427_v43  ;;  %v3036_v23 = vunpack.c.l.bf16 %v4077_v60  ;;  %v2656_v44 = vunpack.c.l.bf16 %v3093_v41 }
  0x7a   :  { %v1810_v34 = vpack.c.bf16 %v1617_v29, %v1617_v29  ;;  %v1227_v1 = vmax.f32 %v1034_v48, %v2892_v36  ;;  %v1042_v8 = vmax.f32 %v2652_v45, %v2780_v53  ;;  %v2784_v4 = vunpack.c.l.bf16 %v3125_v46  ;;  %v4148_v36 = vld [vmem:[%s5157_s2 + $0x3c8] sm:$0xff]  }
  0x7b   :  { %1981 = vrot.lane.b32.xlu0 %v1814_v20, %s3216_s9  ;;  %v1625_v5 = vmax.f32 %v1561_v56, 0.0  ;;  %v1563_v7 = vadd.f32 %v3942_v55, %v1495_v59  ;;  %v2912_v38 = vunpack.c.l.bf16 %v3157_v39  ;;  %v3040_v11 = vunpack.c.l.bf16 %v4104_v58  ;;  %v4165_v59 = vld [vmem:[%s5161_s3] ss:$0 sm:$0xff] }
  0x7c   :  { %1973 = vrot.lane.b32.xlu2 %v1810_v34, %s3216_s9  ;;  %v1420_v49 = vmax.f32 %v1227_v1, %v3020_v40  ;;  %v1235_v3 = vmax.f32 %v1042_v8, %v2908_v54  ;;  %v1044_v2 = vmax.f32 %v2656_v44, %v2784_v4  ;;  %v2641_v13 = vunpack.c.h.bf16 %v3950_v61  ;;  %v4131_v61 = vld [vmem:[%s5157_s2 + $0xc8] sm:$0xff]   ;;  %v4173_v1 = vld [vmem:[%s5157_s2 + $0xd0] sm:$0xff]  }
  0x7d   :  { %2307 = vmatmul.msk.bf16.gmra.mxu0 %vm266_vm2, %v2531_v37  ;;  %2315 = vmatmul.msk.bf16.gmra.mxu1 %vm266_vm2, %v2539_v31  ;;  %v1818_v6 = vpack.c.bf16 %v1625_v5, %v1625_v5  ;;  %v1627_v15 = vmax.f32 %v1563_v7, 0.0  ;;  %v2769_v16 = vunpack.c.h.bf16 %v3955_v63  ;;  %v2897_v17 = vunpack.c.h.bf16 %v3963_v42  ;;  %v4136_v63 = vld [vmem:[%s5157_s2 + $0x1c8] sm:$0xff]   ;;  %v4178_v8 = vld [vmem:[%s5157_s2 + $0x1d0] sm:$0xff]  }
  0x7e   :  { %2323 = vmatmul.msk.bf16.gmra.mxu2 %vm266_vm2, %v2547_v52  ;;  %2331 = vmatmul.msk.bf16.gmra.mxu3 %vm266_vm2, %v2555_v27  ;;  %v4124_v18 = vpop.permute.xlu2 %1911  ;;  %v1488_v12 = vmul.f32 %v3932_v35, %v1420_v49  ;;  %v1428_v19 = vmax.f32 %v1235_v3, %v3036_v23  ;;  %v1237_v20 = vmax.f32 %v1044_v2, %v2912_v38  ;;  %v3025_v22 = vunpack.c.h.bf16 %v3971_v62  ;;  %v4187_v38 = vld [vmem:[%s5162_s4] ss:$0 sm:$0xff] }
  0x7f   :  { %1983 = vrot.lane.b32.xlu1 %v1815_v9, %s3216_s9  ;;  %v1820_v9 = vpack.c.bf16 %v1627_v15, %v1627_v15  ;;  %v1037_v26 = vmax.f32 %v2641_v13, %v2769_v16  ;;  %v2657_v0 = vunpack.c.h.bf16 %v3093_v41  ;;  %v2785_v28 = vunpack.c.h.bf16 %v3125_v46 }
  0x80   :  { %v1556_v42 = vadd.f32 %v3942_v55, %v1488_v12  ;;  %v1496_v25 = vmul.f32 %v3932_v35, %v1428_v19  ;;  %v1430_v24 = vmax.f32 %v1237_v20, %v3040_v11  ;;  %v2913_v62 = vunpack.c.h.bf16 %v3157_v39 }
  0x81   :  { %v1230_v40 = vmax.f32 %v1037_v26, %v2897_v17  ;;  %v1045_v41 = vmax.f32 %v2657_v0, %v2785_v28  ;;  %v3041_v37 = vunpack.c.h.bf16 %v4104_v58  ;;  %v2661_v31 = vunpack.c.h.bf16 %v4131_v61  ;;  %v4207_v0 = vld [vmem:[%s5157_s2 + $0x3d0] sm:$0xff]  }
  0x82   :  { %v1620_v33 = vmax.f32 %v1556_v42, 0.0  ;;  %v1564_v43 = vadd.f32 %v3942_v55, %v1496_v25  ;;  %v1498_v45 = vmul.f32 %v3932_v35, %v1430_v24  ;;  %v2789_v46 = vunpack.c.h.bf16 %v4136_v63 }
  0x83   :  { %1987 = vrot.lane.b32.xlu0 %v1817_v51, %s3216_s9  ;;  %v1423_v52 = vmax.f32 %v1230_v40, %v3025_v22  ;;  %v1238_v29 = vmax.f32 %v1045_v41, %v2913_v62  ;;  %v2917_v48 = vunpack.c.h.bf16 %v4143_v10  ;;  %v3045_v53 = vunpack.c.h.bf16 %v4148_v36  ;;  %v4215_v62 = vld [vmem:[%s5157_s2 + $0xd8] sm:$0xff]  }
  0x84   :  { %v1813_v39 = vpack.c.bf16 %v1620_v33, %v1620_v33  ;;  %v1628_v58 = vmax.f32 %v1564_v43, 0.0  ;;  %v1566_v56 = vadd.f32 %v3942_v55, %v1498_v45  ;;  %v1047_v51 = vmax.f32 %v2661_v31, %v2789_v46 }
  0x85   :  { %v4158_v54 = vpop.permute.xlu0 %1903  ;;  %v1491_v27 = vmul.f32 %v3932_v35, %v1423_v52  ;;  %v1431_v23 = vmax.f32 %v1238_v29, %v3041_v37  ;;  %v2648_v44 = vunpack.c.l.bf16 %v4025_v30  ;;  %v2776_v34 = vunpack.c.l.bf16 %v4030_v21  ;;  %v4231_v29 = vld [vmem:[%s5157_s2 + $0x2d8] sm:$0xff]  }
  0x86   :  { %vm1710_vm3 = vcmask 101376   ;;  %1979 = vrot.lane.b32.xlu2 %v1813_v39, %s3216_s9  ;;  %v1821_v4 = vpack.c.bf16 %v1628_v58, %v1628_v58  ;;  %v1630_v5 = vmax.f32 %v1566_v56, 0.0  ;;  %v4181_v7 = vpop.permute.xlu2 %1913  ;;  %v1240_v30 = vmax.f32 %v1047_v51, %v2917_v48  ;;  %v4236_v48 = vld [vmem:[%s5157_s2 + $0x3d8] sm:$0xff]  }
  0x87   :  { %1989 = vrot.lane.b32.xlu1 %v1818_v6, %s3216_s9  ;;  %v2904_v21 = vunpack.c.l.bf16 %v4035_v50  ;;  %vm2095_vm4 = vcmask 126056   ;;  %v4189_v11 = vpop.permute.xlu1 %1907  ;;  %v1559_v49 = vadd.f32 %v3942_v55, %v1491_v27  ;;  %v1499_v3 = vmul.f32 %v3932_v35, %v1431_v23  ;;  %v4197_v6 = vld [vmem:[%s5157_s2 + $0x2d0] sm:$0xff]  }
  0x88   :  { %v1040_v2 = vmax.f32 %v2648_v44, %v2776_v34  ;;  %v3032_v13 = vunpack.c.l.bf16 %v4042_v57  ;;  %v1823_v16 = vpack.c.bf16 %v1630_v5, %v1630_v5  ;;  %v1433_v17 = vmax.f32 %v1240_v30, %v3045_v53 }
  0x89   :  { %v2664_v12 = vunpack.c.l.bf16 %v4173_v1  ;;  %v2792_v19 = vunpack.c.l.bf16 %v4178_v8  ;;  %v1623_v26 = vmax.f32 %v1559_v49, 0.0  ;;  %v1567_v57 = vadd.f32 %v3942_v55, %v1499_v3 }
  0x8a   :  { %v379_v50 = vpop.f32.mrf.mxu0  ;;  %v419_v15 = vpop.f32.mrf.mxu1  ;;  %v1501_v28 = vmul.f32 %v3932_v35, %v1433_v17  ;;  %v1233_v42 = vmax.f32 %v1040_v2, %v2904_v21  ;;  %v2920_v24 = vunpack.c.l.bf16 %v4197_v6  ;;  %v3048_v52 = vunpack.c.l.bf16 %v4207_v0 }
  0x8b   :  { %v543_v20 = vmul.f32 %v4165_v59, %v379_v50  ;;  %v559_v22 = vmul.f32 %v4165_v59, %v419_v15  ;;  %1993 = vrot.lane.b32.xlu0 %v1820_v9, %s3216_s9  ;;  %v1048_v25 = vmax.f32 %v2664_v12, %v2792_v19  ;;  %v1816_v37 = vpack.c.bf16 %v1623_v26, %v1623_v26  ;;  %v4222_v9 = vld [vmem:[%s5157_s2 + $0x1d8] sm:$0xff]  }
  0x8c   :  { %v1631_v31 = vmax.f32 %v1567_v57, 0.0  ;;  %v1569_v43 = vadd.f32 %v3942_v55, %v1501_v28  ;;  %v1426_v45 = vmax.f32 %v1233_v42, %v3032_v13  ;;  %v2668_v56 = vunpack.c.l.bf16 %v4215_v62 }
  0x8d   :  { %v611_v40 = vadd.f32 %v4187_v38, %v543_v20  ;;  %v627_v41 = vadd.f32 %v4187_v38, %v559_v22  ;;  %v4224_v33 = vpop.permute.xlu0 %1905  ;;  %v1241_v46 = vmax.f32 %v1048_v25, %v2920_v24  ;;  %v2796_v34 = vunpack.c.l.bf16 %v4222_v9 }
  0x8e   :  { %v1824_v58 = vpack.c.bf16 %v1631_v31, %v1631_v31  ;;  %1985 = vrot.lane.b32.xlu2 %v1816_v37, %s3216_s9  ;;  %v1633_v51 = vmax.f32 %v1569_v43, 0.0  ;;  %v4241_v27 = vpop.permute.xlu2 %1919  ;;  %v1494_v23 = vmul.f32 %v3932_v35, %v1426_v45  ;;  %v3052_v3 = vunpack.c.l.bf16 %v4236_v48 }
  0x8f   :  { %v675_v53 = vmax.f32 %v611_v40, 0.0  ;;  %v691_v39 = vmax.f32 %v627_v41, 0.0  ;;  %1995 = vrot.lane.b32.xlu1 %v1821_v4, %s3216_s9  ;;  %v1434_v44 = vmax.f32 %v1241_v46, %v3048_v52  ;;  %v2924_v4 = vunpack.c.l.bf16 %v4231_v29 }
  0x90   :  { %v1826_v15 = vpack.c.bf16 %v1633_v51, %v1633_v51  ;;  %v1562_v17 = vadd.f32 %v3942_v55, %v1494_v23  ;;  %v1050_v22 = vmax.f32 %v2668_v56, %v2796_v34  ;;  %v2653_v57 = vunpack.c.h.bf16 %v4056_v47 }
  0x91   :  { %v1646_v5 = vpack.c.bf16 %v675_v53, %v675_v53  ;;  %v1662_v30 = vpack.c.bf16 %v691_v39, %v691_v39  ;;  %v459_v21 = vpop.f32.mrf.mxu2  ;;  %v4245_v49 = vpop.permute.xlu1 %1909  ;;  %v1502_v12 = vmul.f32 %v3932_v35, %v1434_v44 }
  0x92   :  { %v575_v2 = vmul.f32 %v4165_v59, %v459_v21  ;;  %v381_v13 = vpop.f32.mrf.mxu0  ;;  %v421_v50 = vpop.f32.mrf.mxu1  ;;  %v1626_v42 = vmax.f32 %v1562_v17, 0.0  ;;  %v1243_v41 = vmax.f32 %v1050_v22, %v2924_v4  ;;  %v2669_v17 = vunpack.c.h.bf16 %v4215_v62  ;;  %v4304_v22 = vld [vmem:[%s5157_s2 + $0xe0] sm:$0xff]  }
  0x93   :  { %1711 = vst.msk [vmem:[%s5163_s7] sm:$0xf] %vm1710_vm3, %v1646_v5  ;;  %v544_v19 = vmul.f32 %v4165_v59, %v381_v13  ;;  %v560_v20 = vmul.f32 %v4165_v59, %v421_v50  ;;  %v499_v26 = vpop.f32.mrf.mxu3  ;;  %1999 = vrot.lane.b32.xlu0 %v1823_v16, %s3216_s9  ;;  %v1570_v25 = vadd.f32 %v3942_v55, %v1502_v12  ;;  %v4309_v62 = vld [vmem:[%s5157_s2 + $0x1e0] sm:$0xff]  }
  0x94   :  { %2096 = vst.msk [vmem:[%s5163_s7] sm:$0xf] %vm2095_vm4, %v4158_v54  ;;  %v643_v28 = vadd.f32 %v4187_v38, %v575_v2  ;;  %v591_v24 = vmul.f32 %v4165_v59, %v499_v26  ;;  %v2781_v54 = vunpack.c.h.bf16 %v4063_v32  ;;  %v1819_v16 = vpack.c.bf16 %v1626_v42, %v1626_v42 }
  0x95   :  { %1727 = vst.msk [vmem:[%s5163_s7 + $0x40] sm:$0xf] %vm1710_vm3, %v1662_v30  ;;  %v612_v47 = vadd.f32 %v4187_v38, %v544_v19  ;;  %v628_v40 = vadd.f32 %v4187_v38, %v560_v20  ;;  %v4275_v31 = vpop.permute.xlu0 %1915  ;;  %v1634_v43 = vmax.f32 %v1570_v25, 0.0  ;;  %v1436_v53 = vmax.f32 %v1243_v41, %v3052_v3 }
  0x96   :  { %v707_v37 = vmax.f32 %v643_v28, 0.0  ;;  %v659_v45 = vadd.f32 %v4187_v38, %v591_v24  ;;  %v1043_v39 = vmax.f32 %v2653_v57, %v2781_v54  ;;  %1991 = vrot.lane.b32.xlu2 %v1819_v16, %s3216_s9  ;;  %v4280_v44 = vpop.permute.xlu2 %1925  ;;  %v2909_v32 = vunpack.c.h.bf16 %v4068_v14 }
  0x97   :  { %v676_v46 = vmax.f32 %v612_v47, 0.0  ;;  %v692_v52 = vmax.f32 %v628_v40, 0.0  ;;  %2001 = vrot.lane.b32.xlu1 %v1824_v58, %s3216_s9  ;;  %v1827_v51 = vpack.c.bf16 %v1634_v43, %v1634_v43  ;;  %v1504_v4 = vmul.f32 %v3932_v35, %v1436_v53 }
  0x98   :  { %v1678_v56 = vpack.c.bf16 %v707_v37, %v707_v37  ;;  %v723_v23 = vmax.f32 %v659_v45, 0.0  ;;  %v3037_v58 = vunpack.c.h.bf16 %v4077_v60  ;;  %v1236_v14 = vmax.f32 %v1043_v39, %v2909_v32  ;;  %v4343_v37 = vld [vmem:[%s5157_s2 + $0x3e0] sm:$0xff]  }
  0x99   :  { %v1647_v34 = vpack.c.bf16 %v676_v46, %v676_v46  ;;  %v1663_v5 = vpack.c.bf16 %v692_v52, %v692_v52  ;;  %v461_v30 = vpop.f32.mrf.mxu2  ;;  %v4283_v21 = vpop.permute.xlu1 %1917  ;;  %v1572_v19 = vadd.f32 %v3942_v55, %v1504_v4  ;;  %v2797_v20 = vunpack.c.h.bf16 %v4222_v9 }
  0x9a   :  { %1743 = vst.msk [vmem:[%s5163_s7 + $0x80] sm:$0xf] %vm1710_vm3, %v1678_v56  ;;  %v576_v3 = vmul.f32 %v4165_v59, %v461_v30  ;;  %v384_v2 = vpop.f32.mrf.mxu0  ;;  %v424_v13 = vpop.f32.mrf.mxu1  ;;  %v1694_v50 = vpack.c.bf16 %v723_v23, %v723_v23  ;;  %v1429_v9 = vmax.f32 %v1236_v14, %v3037_v58  ;;  %v2925_v28 = vunpack.c.h.bf16 %v4231_v29 }
  0x9b   :  { %1712 = vst.msk [vmem:[%s5163_s7 + $0x4] sm:$0xf] %vm1710_vm3, %v1647_v34  ;;  %v545_v60 = vmul.f32 %v4165_v59, %v384_v2  ;;  %v561_v12 = vmul.f32 %v4165_v59, %v424_v13  ;;  %v501_v26 = vpop.f32.mrf.mxu3  ;;  %2005 = vrot.lane.b32.xlu0 %v1826_v15, %s3216_s9  ;;  %v3053_v42 = vunpack.c.h.bf16 %v4236_v48  ;;  %v1636_v47 = vmax.f32 %v1572_v19, 0.0  ;;  %v4329_v15 = vld [vmem:[%s5157_s2 + $0x2e0] sm:$0xff]  }
  0x9c   :  { %2097 = vst.msk [vmem:[%s5163_s7 + $0x4] sm:$0xf] %vm2095_vm4, %v4224_v33  ;;  %v644_v57 = vadd.f32 %v4187_v38, %v576_v3  ;;  %v1051_v33 = vmax.f32 %v2669_v17, %v2797_v20  ;;  %v1497_v48 = vmul.f32 %v3932_v35, %v1429_v9  ;;  %v2673_v41 = vunpack.c.h.bf16 %v4304_v22 }
  0x9d   :  { %1728 = vst.msk [vmem:[%s5163_s7 + $0x44] sm:$0xf] %vm1710_vm3, %v1663_v5  ;;  %v613_v25 = vadd.f32 %v4187_v38, %v545_v60  ;;  %v629_v24 = vadd.f32 %v4187_v38, %v561_v12  ;;  %v4331_v29 = vpop.permute.xlu0 %1921  ;;  %v2801_v54 = vunpack.c.h.bf16 %v4309_v62  ;;  %v1829_v45 = vpack.c.bf16 %v1636_v47, %v1636_v47 }
  0x9e   :  { %v708_v40 = vmax.f32 %v644_v57, 0.0  ;;  %1759 = vst.msk [vmem:[%s5163_s7 + $0xc0] sm:$0xf] %vm1710_vm3, %v1694_v50  ;;  %v1244_v46 = vmax.f32 %v1051_v33, %v2925_v28  ;;  %v1565_v53 = vadd.f32 %v3942_v55, %v1497_v48  ;;  %v2929_v56 = vunpack.c.h.bf16 %v4329_v15  ;;  %v4348_v23 = vpop.permute.xlu2 %1931 }
  0x9f   :  { %v677_v16 = vmax.f32 %v613_v25, 0.0  ;;  %v693_v43 = vmax.f32 %v629_v24, 0.0  ;;  %2007 = vrot.lane.b32.xlu1 %v1827_v51, %s3216_s9  ;;  %v1053_v39 = vmax.f32 %v2673_v41, %v2801_v54  ;;  %v3057_v58 = vunpack.c.h.bf16 %v4343_v37 }
  0xa0   :  { %v1679_v52 = vpack.c.bf16 %v708_v40, %v708_v40  ;;  %v1437_v4 = vmax.f32 %v1244_v46, %v3053_v42  ;;  %v1629_v13 = vmax.f32 %v1565_v53, 0.0  ;;  %v592_v14 = vmul.f32 %v4165_v59, %v501_v26 }
  0xa1   :  { %v1648_v32 = vpack.c.bf16 %v677_v16, %v677_v16  ;;  %v1664_v34 = vpack.c.bf16 %v693_v43, %v693_v43  ;;  %v464_v5 = vpop.f32.mrf.mxu2  ;;  %v4350_v30 = vpop.permute.xlu1 %1923  ;;  %v1246_v50 = vmax.f32 %v1053_v39, %v2929_v56  ;;  %v2660_v19 = vunpack.c.l.bf16 %v4131_v61  ;;  %v4393_v43 = vld [vmem:[%s5157_s2 + $0xe8] sm:$0xff]  }
  0xa2   :  { %1744 = vst.msk [vmem:[%s5163_s7 + $0x84] sm:$0xf] %vm1710_vm3, %v1679_v52  ;;  %v577_v51 = vmul.f32 %v4165_v59, %v464_v5  ;;  %v386_v3 = vpop.f32.mrf.mxu0  ;;  %v426_v2 = vpop.f32.mrf.mxu1  ;;  %v1505_v12 = vmul.f32 %v3932_v35, %v1437_v4  ;;  %v1822_v57 = vpack.c.bf16 %v1629_v13, %v1629_v13  ;;  %v2788_v28 = vunpack.c.l.bf16 %v4136_v63  ;;  %v4400_v39 = vld [vmem:[%s5157_s2 + $0x1e8] sm:$0xff]  }
  0xa3   :  { %1713 = vst.msk [vmem:[%s5163_s7 + $0x8] sm:$0xf] %vm1710_vm3, %v1648_v32  ;;  %v546_v17 = vmul.f32 %v4165_v59, %v386_v3  ;;  %v562_v60 = vmul.f32 %v4165_v59, %v426_v2  ;;  %v4367_v20 = vpop.f32.mrf.mxu3  ;;  %2011 = vrot.lane.b32.xlu0 %v1829_v45, %s3216_s9  ;;  %v1439_v9 = vmax.f32 %v1246_v50, %v3057_v58  ;;  %v2916_v40 = vunpack.c.l.bf16 %v4143_v10  ;;  %v4405_v10 = vld [vmem:[%s5157_s2 + $0x2e8] sm:$0xff]  }
  0xa4   :  { %2098 = vst.msk [vmem:[%s5163_s7 + $0x8] sm:$0xf] %vm2095_vm4, %v4189_v11  ;;  %v645_v26 = vadd.f32 %v4187_v38, %v577_v51  ;;  %v1573_v25 = vadd.f32 %v3942_v55, %v1505_v12  ;;  %v660_v11 = vadd.f32 %v4187_v38, %v592_v14  ;;  %1997 = vrot.lane.b32.xlu2 %v1822_v57, %s3216_s9  ;;  %v3044_v53 = vunpack.c.l.bf16 %v4148_v36  ;;  %v4412_v36 = vld [vmem:[%s5157_s2 + $0x3e8] sm:$0xff]  }
  0xa5   :  { %1729 = vst.msk [vmem:[%s5163_s7 + $0x48] sm:$0xf] %vm1710_vm3, %v1664_v34  ;;  %v614_v61 = vadd.f32 %v4187_v38, %v546_v17  ;;  %v630_v42 = vadd.f32 %v4187_v38, %v562_v60  ;;  %v4385_v47 = vpop.permute.xlu0 %1927  ;;  %v1507_v63 = vmul.f32 %v3932_v35, %v1439_v9  ;;  %v1046_v33 = vmax.f32 %v2660_v19, %v2788_v28  ;;  %v4427_v60 = vld [vmem:[%s5157_s2 + $0xf0] sm:$0xff]  }
  0xa6   :  { %v709_v24 = vmax.f32 %v645_v26, 0.0  ;;  %v1637_v54 = vmax.f32 %v1573_v25, 0.0  ;;  %v724_v16 = vmax.f32 %v660_v11, 0.0  ;;  %v1938_v56 = vpop.permute.xlu2 %1937  ;;  %v2676_v17 = vunpack.c.l.bf16 %v4393_v43  ;;  %v4441_v9 = vld [vmem:[%s5157_s2 + $0x1f0] sm:$0xff]  }
  0xa7   :  { %v678_v48 = vmax.f32 %v614_v61, 0.0  ;;  %v694_v41 = vmax.f32 %v630_v42, 0.0  ;;  %v1575_v46 = vadd.f32 %v3942_v55, %v1507_v63  ;;  %v1239_v52 = vmax.f32 %v1046_v33, %v2916_v40  ;;  %2113 = vst.msk [vmem:[%s5163_s7 + $0x44] sm:$0xf] %vm2095_vm4, %v1938_v56  ;;  %v4446_v28 = vld [vmem:[%s5157_s2 + $0x2f0] sm:$0xff]  }
  0xa8   :  { %v1680_v45 = vpack.c.bf16 %v709_v24, %v709_v24  ;;  %v1830_v4 = vpack.c.bf16 %v1637_v54, %v1637_v54  ;;  %v1695_v58 = vpack.c.bf16 %v724_v16, %v724_v16  ;;  %v2804_v26 = vunpack.c.l.bf16 %v4400_v39  ;;  %v4461_v63 = vld [vmem:[%s5157_s2 + $0x3f0] sm:$0xff]  }
  0xa9   :  { %v1649_v32 = vpack.c.bf16 %v678_v48, %v678_v48  ;;  %v1665_v34 = vpack.c.bf16 %v694_v41, %v694_v41  ;;  %v466_v5 = vpop.f32.mrf.mxu2  ;;  %v4407_v51 = vpop.permute.xlu1 %1929  ;;  %v1639_v2 = vmax.f32 %v1575_v46, 0.0  ;;  %v1432_v14 = vmax.f32 %v1239_v52, %v3044_v53 }
  0xaa   :  { %1745 = vst.msk [vmem:[%s5163_s7 + $0x88] sm:$0xf] %vm1710_vm3, %v1680_v45  ;;  %v578_v3 = vmul.f32 %v4165_v59, %v466_v5  ;;  %v389_v13 = vpop.f32.mrf.mxu0  ;;  %v429_v50 = vpop.f32.mrf.mxu1  ;;  %2013 = vrot.lane.b32.xlu1 %v1830_v4, %s3216_s9  ;;  %v2932_v57 = vunpack.c.l.bf16 %v4405_v10  ;;  %v3060_v24 = vunpack.c.l.bf16 %v4412_v36  ;;  %v1054_v40 = vmax.f32 %v2676_v17, %v2804_v26 }
  0xab   :  { %1714 = vst.msk [vmem:[%s5163_s7 + $0xc] sm:$0xf] %vm1710_vm3, %v1649_v32  ;;  %v547_v12 = vmul.f32 %v4165_v59, %v389_v13  ;;  %v563_v19 = vmul.f32 %v4165_v59, %v429_v50  ;;  %v4448_v61 = vpop.f32.mrf.mxu3  ;;  %v1832_v25 = vpack.c.bf16 %v1639_v2, %v1639_v2  ;;  %v1500_v11 = vmul.f32 %v3932_v35, %v1432_v14 }
  0xac   :  { %2099 = vst.msk [vmem:[%s5163_s7 + $0xc] sm:$0xf] %vm2095_vm4, %v4245_v49  ;;  %v646_v42 = vadd.f32 %v4187_v38, %v578_v3  ;;  %v2680_v48 = vunpack.c.l.bf16 %v4427_v60  ;;  %v2808_v45 = vunpack.c.l.bf16 %v4441_v9  ;;  %v2936_v46 = vunpack.c.l.bf16 %v4446_v28 }
  0xad   :  { %1730 = vst.msk [vmem:[%s5163_s7 + $0x4c] sm:$0xf] %vm1710_vm3, %v1665_v34  ;;  %v615_v33 = vadd.f32 %v4187_v38, %v547_v12  ;;  %v631_v49 = vadd.f32 %v4187_v38, %v563_v19  ;;  %2017 = vrot.lane.b32.xlu0 %v1832_v25, %s3216_s9  ;;  %v4475_v54 = vpop.permute.xlu0 %1933  ;;  %v1568_v16 = vadd.f32 %v3942_v55, %v1500_v11  ;;  %v3064_v32 = vunpack.c.l.bf16 %v4461_v63 }
  0xae   :  { %v710_v41 = vmax.f32 %v646_v42, 0.0  ;;  %1760 = vst.msk [vmem:[%s5163_s7 + $0xc4] sm:$0xf] %vm1710_vm3, %v1695_v58  ;;  %v1247_v56 = vmax.f32 %v1054_v40, %v2932_v57  ;;  %v1056_v4 = vmax.f32 %v2680_v48, %v2808_v45  ;;  %v593_v3 = vmul.f32 %v4165_v59, %v4367_v20  ;;  %v1944_v58 = vpop.permute.xlu2 %1943 }
  0xaf   :  { %v679_v52 = vmax.f32 %v615_v33, 0.0  ;;  %v695_v53 = vmax.f32 %v631_v49, 0.0  ;;  %v1632_v5 = vmax.f32 %v1568_v16, 0.0  ;;  %v2665_v12 = vunpack.c.h.bf16 %v4173_v1 }
  0xb0   :  { %v1681_v34 = vpack.c.bf16 %v710_v41, %v710_v41  ;;  %v1440_v14 = vmax.f32 %v1247_v56, %v3060_v24  ;;  %v1249_v57 = vmax.f32 %v1056_v4, %v2936_v46  ;;  %v661_v20 = vadd.f32 %v4187_v38, %v593_v3 }
  0xb1   :  { %v1650_v2 = vpack.c.bf16 %v679_v52, %v679_v52  ;;  %v1666_v13 = vpack.c.bf16 %v695_v53, %v695_v53  ;;  %v469_v50 = vpop.f32.mrf.mxu2  ;;  %v1936_v17 = vpop.permute.xlu1 %1935  ;;  %v1825_v26 = vpack.c.bf16 %v1632_v5, %v1632_v5  ;;  %v2793_v33 = vunpack.c.h.bf16 %v4178_v8 }
  0xb2   :  { %1746 = vst.msk [vmem:[%s5163_s7 + $0x8c] sm:$0xf] %vm1710_vm3, %v1681_v34  ;;  %v579_v19 = vmul.f32 %v4165_v59, %v469_v50  ;;  %v391_v42 = vpop.f32.mrf.mxu0  ;;  %v431_v25 = vpop.f32.mrf.mxu1  ;;  %v1508_v1 = vmul.f32 %v3932_v35, %v1440_v14  ;;  %v1442_v48 = vmax.f32 %v1249_v57, %v3064_v32  ;;  %v725_v41 = vmax.f32 %v661_v20, 0.0  ;;  %v4535_v50 = vld [vmem:[%s5157_s2 + $0xf8] sm:$0xff]  }
  0xb3   :  { %1715 = vst.msk [vmem:[%s5163_s7 + $0x10] sm:$0xf] %vm1710_vm3, %v1650_v2  ;;  %v548_v11 = vmul.f32 %v4165_v59, %v391_v42  ;;  %v564_v24 = vmul.f32 %v4165_v59, %v431_v25  ;;  %v4498_v49 = vpop.f32.mrf.mxu3  ;;  %2003 = vrot.lane.b32.xlu2 %v1825_v26, %s3216_s9  ;;  %v2921_v16 = vunpack.c.h.bf16 %v4197_v6  ;;  %v3049_v32 = vunpack.c.h.bf16 %v4207_v0  ;;  %v4540_v14 = vld [vmem:[%s5157_s2 + $0x1f8] sm:$0xff]  }
  0xb4   :  { %2100 = vst.msk [vmem:[%s5163_s7 + $0x10] sm:$0xf] %vm2095_vm4, %v4124_v18  ;;  %v647_v40 = vadd.f32 %v4187_v38, %v579_v19  ;;  %v1576_v8 = vadd.f32 %v3942_v55, %v1508_v1  ;;  %v1049_v18 = vmax.f32 %v2665_v12, %v2793_v33  ;;  %v1510_v53 = vmul.f32 %v3932_v35, %v1442_v48 }
  0xb5   :  { %1731 = vst.msk [vmem:[%s5163_s7 + $0x50] sm:$0xf] %vm1710_vm3, %v1666_v13  ;;  %v616_v45 = vadd.f32 %v4187_v38, %v548_v11  ;;  %v632_v46 = vadd.f32 %v4187_v38, %v564_v24  ;;  %v1696_v56 = vpack.c.bf16 %v725_v41, %v725_v41  ;;  %v1940_v6 = vpop.permute.xlu0 %1939  ;;  %v2681_v13 = vunpack.c.h.bf16 %v4427_v60  ;;  %v4547_v60 = vld [vmem:[%s5157_s2 + $0x2f8] sm:$0xff]  }
  0xb6   :  { %v711_v52 = vmax.f32 %v647_v40, 0.0  ;;  %2112 = vst.msk [vmem:[%s5163_s7 + $0x40] sm:$0xf] %vm2095_vm4, %v1936_v17  ;;  %v1640_v34 = vmax.f32 %v1576_v8, 0.0  ;;  %v1242_v3 = vmax.f32 %v1049_v18, %v2921_v16  ;;  %v1578_v35 = vadd.f32 %v3942_v55, %v1510_v53  ;;  %v4542_v55 = vpop.permute.xlu2 %1949  ;;  %v4562_v11 = vld [vmem:[%s5157_s2 + $0x3f8] sm:$0xff]  }
  0xb7   :  { %v680_v5 = vmax.f32 %v616_v45, 0.0  ;;  %v696_v4 = vmax.f32 %v632_v46, 0.0  ;;  %2114 = vst.msk [vmem:[%s5163_s7 + $0x48] sm:$0xf] %vm2095_vm4, %v1940_v6  ;;  %v2809_v0 = vunpack.c.h.bf16 %v4441_v9  ;;  %v2937_v1 = vunpack.c.h.bf16 %v4446_v28 }
  0xb8   :  { %v1682_v2 = vpack.c.bf16 %v711_v52, %v711_v52  ;;  %1761 = vst.msk [vmem:[%s5163_s7 + $0xc8] sm:$0xf] %vm1710_vm3, %v1696_v56  ;;  %v1833_v17 = vpack.c.bf16 %v1640_v34, %v1640_v34  ;;  %v1435_v57 = vmax.f32 %v1242_v3, %v3049_v32  ;;  %v1642_v42 = vmax.f32 %v1578_v35, 0.0 }
  0xb9   :  { %v1651_v12 = vpack.c.bf16 %v680_v5, %v680_v5  ;;  %v1667_v19 = vpack.c.bf16 %v696_v4, %v696_v4  ;;  %v471_v26 = vpop.f32.mrf.mxu2  ;;  %2116 = vst.msk [vmem:[%s5163_s7 + $0x50] sm:$0xf] %vm2095_vm4, %v1944_v58  ;;  %v1942_v9 = vpop.permute.xlu1 %1941  ;;  %v1057_v20 = vmax.f32 %v2681_v13, %v2809_v0  ;;  %v4572_v58 = vld [vmem:[%s5158_s5] ss:$0 sm:$0xff]  ;;  %v3065_v40 = vunpack.c.h.bf16 %v4461_v63 }
  0xba   :  { %1747 = vst.msk [vmem:[%s5163_s7 + $0x90] sm:$0xf] %vm1710_vm3, %v1682_v2  ;;  %v580_v25 = vmul.f32 %v4165_v59, %v471_v26  ;;  %v394_v24 = vpop.f32.mrf.mxu0  ;;  %v434_v33 = vpop.f32.mrf.mxu1  ;;  %2019 = vrot.lane.b32.xlu1 %v1833_v17, %s3216_s9  ;;  %v1503_v28 = vmul.f32 %v4572_v58, %v1435_v57  ;;  %v2685_v48 = vunpack.c.h.bf16 %v4535_v50  ;;  %v2813_v41 = vunpack.c.h.bf16 %v4540_v14  ;;  %v4594_v63 = vld [vmem:[%s5160_s6] ss:$0 sm:$0xff] }
  0xbb   :  { %1716 = vst.msk [vmem:[%s5163_s7 + $0x14] sm:$0xf] %vm1710_vm3, %v1651_v12  ;;  %v4578_v16 = vpop.f32.mrf.mxu3  ;;  %v1835_v8 = vpack.c.bf16 %v1642_v42, %v1642_v42  ;;  %v1250_v46 = vmax.f32 %v1057_v20, %v2937_v1  ;;  %v2941_v18 = vunpack.c.h.bf16 %v4547_v60  ;;  %v549_v56 = vmul.f32 %v4165_v59, %v394_v24 }
  0xbc   :  { %2101 = vst.msk [vmem:[%s5163_s7 + $0x14] sm:$0xf] %vm2095_vm4, %v4181_v7  ;;  %v648_v45 = vadd.f32 %v4187_v38, %v580_v25  ;;  %v1571_v52 = vadd.f32 %v4594_v63, %v1503_v28  ;;  %v1059_v53 = vmax.f32 %v2685_v48, %v2813_v41  ;;  %v3069_v7 = vunpack.c.h.bf16 %v4562_v11 }
  0xbd   :  { %1732 = vst.msk [vmem:[%s5163_s7 + $0x54] sm:$0xf] %vm1710_vm3, %v1667_v19  ;;  %2023 = vrot.lane.b32.xlu0 %v1835_v8, %s3216_s9  ;;  %v1443_v32 = vmax.f32 %v1250_v46, %v3065_v40  ;;  %v565_v34 = vmul.f32 %v4165_v59, %v434_v33  ;;  %v594_v5 = vmul.f32 %v4165_v59, %v4448_v61  ;;  %v1946_v4 = vpop.permute.xlu0 %1945  ;;  %v2672_v13 = vunpack.c.l.bf16 %v4304_v22 }
  0xbe   :  { %v712_v6 = vmax.f32 %v648_v45, 0.0  ;;  %2115 = vst.msk [vmem:[%s5163_s7 + $0x4c] sm:$0xf] %vm2095_vm4, %v1942_v9  ;;  %v1635_v3 = vmax.f32 %v1571_v52, 0.0  ;;  %v1252_v2 = vmax.f32 %v1059_v53, %v2941_v18  ;;  %v617_v35 = vadd.f32 %v4187_v38, %v549_v56  ;;  %v4616_v19 = vpop.permute.xlu2 %1955 }
  0xbf   :  { %2117 = vst.msk [vmem:[%s5163_s7 + $0x54] sm:$0xf] %vm2095_vm4, %v1946_v4  ;;  %v1511_v61 = vmul.f32 %v4572_v58, %v1443_v32  ;;  %v633_v17 = vadd.f32 %v4187_v38, %v565_v34  ;;  %v662_v12 = vadd.f32 %v4187_v38, %v594_v5  ;;  %v2800_v25 = vunpack.c.l.bf16 %v4309_v62 }
  0xc0   :  { %v1683_v0 = vpack.c.bf16 %v712_v6, %v712_v6  ;;  %v1828_v26 = vpack.c.bf16 %v1635_v3, %v1635_v3  ;;  %v1445_v57 = vmax.f32 %v1252_v2, %v3069_v7  ;;  %v681_v9 = vmax.f32 %v617_v35, 0.0 }
  0xc1   :  { %v474_v42 = vpop.f32.mrf.mxu2  ;;  %v1948_v20 = vpop.permute.xlu1 %1947  ;;  %v1579_v22 = vadd.f32 %v4594_v63, %v1511_v61  ;;  %v697_v1 = vmax.f32 %v633_v17, 0.0  ;;  %v726_v24 = vmax.f32 %v662_v12, 0.0  ;;  %v1052_v62 = vmax.f32 %v2672_v13, %v2800_v25 }
  0xc2   :  { %1748 = vst.msk [vmem:[%s5163_s7 + $0x94] sm:$0xf] %vm1710_vm3, %v1683_v0  ;;  %v581_v33 = vmul.f32 %v4165_v59, %v474_v42  ;;  %v396_v28 = vpop.f32.mrf.mxu0  ;;  %v436_v40 = vpop.f32.mrf.mxu1  ;;  %2009 = vrot.lane.b32.xlu2 %v1828_v26, %s3216_s9  ;;  %v1513_v48 = vmul.f32 %v4572_v58, %v1445_v57  ;;  %v1652_v41 = vpack.c.bf16 %v681_v9, %v681_v9  ;;  %v2928_v8 = vunpack.c.l.bf16 %v4329_v15 }
  0xc3   :  { %v4628_v45 = vpop.f32.mrf.mxu3  ;;  %v1643_v46 = vmax.f32 %v1579_v22, 0.0  ;;  %v1668_v18 = vpack.c.bf16 %v697_v1, %v697_v1  ;;  %v1697_v52 = vpack.c.bf16 %v726_v24, %v726_v24  ;;  %v3056_v6 = vunpack.c.l.bf16 %v4343_v37 }
  0xc4   :  { %v649_v53 = vadd.f32 %v4187_v38, %v581_v33  ;;  %v1581_v7 = vadd.f32 %v4594_v63, %v1513_v48  ;;  %1717 = vst.msk [vmem:[%s5163_s7 + $0x18] sm:$0xf] %vm1710_vm3, %v1652_v41  ;;  %v1245_v56 = vmax.f32 %v1052_v62, %v2928_v8  ;;  %v550_v32 = vmul.f32 %v4165_v59, %v396_v28 }
  0xc5   :  { %v1836_v15 = vpack.c.bf16 %v1643_v46, %v1643_v46  ;;  %2102 = vst.msk [vmem:[%s5163_s7 + $0x18] sm:$0xf] %vm2095_vm4, %v4275_v31  ;;  %v566_v5 = vmul.f32 %v4165_v59, %v436_v40  ;;  %v595_v4 = vmul.f32 %v4165_v59, %v4498_v49  ;;  %v4646_v3 = vpop.permute.xlu0 %1951  ;;  %v2677_v13 = vunpack.c.h.bf16 %v4393_v43 }
  0xc6   :  { %v713_v34 = vmax.f32 %v649_v53, 0.0  ;;  %v1645_v2 = vmax.f32 %v1581_v7, 0.0  ;;  %1733 = vst.msk [vmem:[%s5163_s7 + $0x58] sm:$0xf] %vm1710_vm3, %v1668_v18  ;;  %v1438_v37 = vmax.f32 %v1245_v56, %v3056_v6  ;;  %v618_v35 = vadd.f32 %v4187_v38, %v550_v32  ;;  %v4662_v17 = vpop.permute.xlu2 %1961 }
  0xc7   :  { %2025 = vrot.lane.b32.xlu1 %v1836_v15, %s3216_s9  ;;  %1762 = vst.msk [vmem:[%s5163_s7 + $0xcc] sm:$0xf] %vm1710_vm3, %v1697_v52  ;;  %v634_v49 = vadd.f32 %v4187_v38, %v566_v5  ;;  %v663_v0 = vadd.f32 %v4187_v38, %v595_v4  ;;  %v2805_v61 = vunpack.c.h.bf16 %v4400_v39  ;;  %v2933_v9 = vunpack.c.h.bf16 %v4405_v10 }
  0xc8   :  { %v1684_v31 = vpack.c.bf16 %v713_v34, %v713_v34  ;;  %v1838_v12 = vpack.c.bf16 %v1645_v2, %v1645_v2  ;;  %v1506_v26 = vmul.f32 %v4572_v58, %v1438_v37  ;;  %v682_v43 = vmax.f32 %v618_v35, 0.0  ;;  %2118 = vst.msk [vmem:[%s5163_s7 + $0x58] sm:$0xf] %vm2095_vm4, %v1948_v20 }
  0xc9   :  { %v476_v57 = vpop.f32.mrf.mxu2  ;;  %v4670_v42 = vpop.permute.xlu1 %1953  ;;  %v698_v39 = vmax.f32 %v634_v49, 0.0  ;;  %v727_v25 = vmax.f32 %v663_v0, 0.0  ;;  %v1055_v1 = vmax.f32 %v2677_v13, %v2805_v61  ;;  %v3061_v10 = vunpack.c.h.bf16 %v4412_v36 }
  0xca   :  { %1749 = vst.msk [vmem:[%s5163_s7 + $0x98] sm:$0xf] %vm1710_vm3, %v1684_v31  ;;  %v582_v22 = vmul.f32 %v4165_v59, %v476_v57  ;;  %v399_v24 = vpop.f32.mrf.mxu0  ;;  %v439_v33 = vpop.f32.mrf.mxu1  ;;  %2029 = vrot.lane.b32.xlu0 %v1838_v12, %s3216_s9  ;;  %v1574_v20 = vadd.f32 %v4594_v63, %v1506_v26  ;;  %v1653_v28 = vpack.c.bf16 %v682_v43, %v682_v43  ;;  %v2684_v32 = vunpack.c.l.bf16 %v4535_v50 }
  0xcb   :  { %v551_v40 = vmul.f32 %v4165_v59, %v399_v24  ;;  %v516_v48 = vpop.f32.mrf.mxu3  ;;  %v1669_v41 = vpack.c.bf16 %v698_v39, %v698_v39  ;;  %v1698_v62 = vpack.c.bf16 %v727_v25, %v727_v25  ;;  %v1248_v46 = vmax.f32 %v1055_v1, %v2933_v9 }
  0xcc   :  { %v650_v8 = vadd.f32 %v4187_v38, %v582_v22  ;;  %v1638_v18 = vmax.f32 %v1574_v20, 0.0  ;;  %1718 = vst.msk [vmem:[%s5163_s7 + $0x1c] sm:$0xf] %vm1710_vm3, %v1653_v28  ;;  %v567_v53 = vmul.f32 %v4165_v59, %v439_v33  ;;  %v596_v36 = vmul.f32 %v4165_v59, %v4578_v16 }
  0xcd   :  { %v619_v52 = vadd.f32 %v4187_v38, %v551_v40  ;;  %2103 = vst.msk [vmem:[%s5163_s7 + $0x1c] sm:$0xf] %vm2095_vm4, %v4283_v21  ;;  %v1441_v56 = vmax.f32 %v1248_v46, %v3061_v10  ;;  %v4695_v6 = vpop.permute.xlu0 %1957  ;;  %v2812_v15 = vunpack.c.l.bf16 %v4540_v14  ;;  %v2940_v2 = vunpack.c.l.bf16 %v4547_v60 }
  0xce   :  { %v714_v7 = vmax.f32 %v650_v8, 0.0  ;;  %v1831_v34 = vpack.c.bf16 %v1638_v18, %v1638_v18  ;;  %1734 = vst.msk [vmem:[%s5163_s7 + $0x5c] sm:$0xf] %vm1710_vm3, %v1669_v41  ;;  %v635_v5 = vadd.f32 %v4187_v38, %v567_v53  ;;  %v664_v4 = vadd.f32 %v4187_v38, %v596_v36  ;;  %v1968_v37 = vpop.permute.xlu2 %1967 }
  0xcf   :  { %v683_v16 = vmax.f32 %v619_v52, 0.0  ;;  %1763 = vst.msk [vmem:[%s5163_s7 + $0xd0] sm:$0xf] %vm1710_vm3, %v1698_v62  ;;  %v1509_v50 = vmul.f32 %v4572_v58, %v1441_v56  ;;  %v1058_v14 = vmax.f32 %v2684_v32, %v2812_v15  ;;  %v3068_v0 = vunpack.c.l.bf16 %v4562_v11 }
  0xd0   :  { %v1685_v21 = vpack.c.bf16 %v714_v7, %v714_v7  ;;  %2015 = vrot.lane.b32.xlu2 %v1831_v34, %s3216_s9  ;;  %2119 = vst.msk [vmem:[%s5163_s7 + $0x5c] sm:$0xf] %vm2095_vm4, %v4542_v55  ;;  %v699_v13 = vmax.f32 %v635_v5, 0.0  ;;  %v728_v31 = vmax.f32 %v664_v4, 0.0  ;;  %v597_v57 = vmul.f32 %v4165_v59, %v4628_v45 }
  0xd1   :  { %v1654_v35 = vpack.c.bf16 %v683_v16, %v683_v16  ;;  %v479_v49 = vpop.f32.mrf.mxu2  ;;  %v4718_v61 = vpop.permute.xlu1 %1959  ;;  %v1577_v60 = vadd.f32 %v4594_v63, %v1509_v50  ;;  %v1251_v26 = vmax.f32 %v1058_v14, %v2940_v2  ;;  %v598_v10 = vmul.f32 %v4165_v59, %v516_v48  ;;  %2128 = vst.msk [vmem:[%s5163_s7 + $0x80] sm:$0xf] %vm2095_vm4, %v1968_v37 }
  0xd2   :  { %1750 = vst.msk [vmem:[%s5163_s7 + $0x9c] sm:$0xf] %vm1710_vm3, %v1685_v21  ;;  %v583_v12 = vmul.f32 %v4165_v59, %v479_v49  ;;  %v401_v43 = vpop.f32.mrf.mxu0  ;;  %v441_v55 = vpop.f32.mrf.mxu1  ;;  %v1670_v11 = vpack.c.bf16 %v699_v13, %v699_v13  ;;  %v1699_v9 = vpack.c.bf16 %v728_v31, %v728_v31  ;;  %v665_v33 = vadd.f32 %v4187_v38, %v597_v57 }
  0xd3   :  { %1719 = vst.msk [vmem:[%s5163_s7 + $0x20] sm:$0xf] %vm1710_vm3, %v1654_v35  ;;  %v552_v39 = vmul.f32 %v4165_v59, %v401_v43  ;;  %v568_v25 = vmul.f32 %v4165_v59, %v441_v55  ;;  %v519_v22 = vpop.f32.mrf.mxu3  ;;  %v1641_v1 = vmax.f32 %v1577_v60, 0.0  ;;  %v1444_v24 = vmax.f32 %v1251_v26, %v3068_v0 }
  0xd4   :  { %2104 = vst.msk [vmem:[%s5163_s7 + $0x20] sm:$0xf] %vm2095_vm4, %v4241_v27  ;;  %v651_v45 = vadd.f32 %v4187_v38, %v583_v12  ;;  %v599_v8 = vmul.f32 %v4165_v59, %v519_v22  ;;  %v729_v18 = vmax.f32 %v665_v33, 0.0  ;;  %v666_v52 = vadd.f32 %v4187_v38, %v598_v10 }
  0xd5   :  { %1735 = vst.msk [vmem:[%s5163_s7 + $0x60] sm:$0xf] %vm1710_vm3, %v1670_v11  ;;  %v620_v20 = vadd.f32 %v4187_v38, %v552_v39  ;;  %v636_v28 = vadd.f32 %v4187_v38, %v568_v25  ;;  %v1834_v40 = vpack.c.bf16 %v1641_v1, %v1641_v1  ;;  %v1512_v41 = vmul.f32 %v4572_v58, %v1444_v24  ;;  %v4754_v62 = vpop.permute.xlu0 %1963  ;;  %v4836_v24 = vld [vmem:[%s5162_s4] ss:$0 sm:$0xff] }
  0xd6   :  { %2120 = vst.msk [vmem:[%s5163_s7 + $0x60] sm:$0xf] %vm2095_vm4, %v4646_v3  ;;  %v715_v27 = vmax.f32 %v651_v45, 0.0  ;;  %v1974_v58 = vpop.permute.xlu2 %1973  ;;  %v730_v32 = vmax.f32 %v666_v52, 0.0  ;;  %v1700_v4 = vpack.c.bf16 %v729_v18, %v729_v18  ;;  %v667_v14 = vadd.f32 %v4187_v38, %v599_v8 }
  0xd7   :  { %1764 = vst.msk [vmem:[%s5163_s7 + $0xd4] sm:$0xf] %vm1710_vm3, %v1699_v9  ;;  %v684_v48 = vmax.f32 %v620_v20, 0.0  ;;  %v700_v46 = vmax.f32 %v636_v28, 0.0  ;;  %v1580_v3 = vadd.f32 %v4594_v63, %v1512_v41 }
  0xd8   :  { %v1686_v53 = vpack.c.bf16 %v715_v27, %v715_v27  ;;  %2021 = vrot.lane.b32.xlu2 %v1834_v40, %s3216_s9  ;;  %2131 = vst.msk [vmem:[%s5163_s7 + $0x8c] sm:$0xf] %vm2095_vm4, %v1974_v58  ;;  %v1701_v35 = vpack.c.bf16 %v730_v32, %v730_v32  ;;  %v731_v12 = vmax.f32 %v667_v14, 0.0 }
  0xd9   :  { %v1655_v36 = vpack.c.bf16 %v684_v48, %v684_v48  ;;  %v1671_v7 = vpack.c.bf16 %v700_v46, %v700_v46  ;;  %v481_v56 = vpop.f32.mrf.mxu2  ;;  %v4768_v15 = vpop.permute.xlu1 %1965  ;;  %v1644_v63 = vmax.f32 %v1580_v3, 0.0  ;;  %1765 = vst.msk [vmem:[%s5163_s7 + $0xd8] sm:$0xf] %vm1710_vm3, %v1700_v4 }
  0xda   :  { %1751 = vst.msk [vmem:[%s5163_s7 + $0xa0] sm:$0xf] %vm1710_vm3, %v1686_v53  ;;  %v584_v34 = vmul.f32 %v4165_v59, %v481_v56  ;;  %v404_v16 = vpop.f32.mrf.mxu0  ;;  %v444_v5 = vpop.f32.mrf.mxu1  ;;  %v1702_v45 = vpack.c.bf16 %v731_v12, %v731_v12 }
  0xdb   :  { %1720 = vst.msk [vmem:[%s5163_s7 + $0x24] sm:$0xf] %vm1710_vm3, %v1655_v36  ;;  %v553_v21 = vmul.f32 %v4165_v59, %v404_v16  ;;  %v569_v50 = vmul.f32 %v4165_v59, %v444_v5  ;;  %v521_v2 = vpop.f32.mrf.mxu3  ;;  %v1837_v13 = vpack.c.bf16 %v1644_v63, %v1644_v63 }
  0xdc   :  { %2105 = vst.msk [vmem:[%s5163_s7 + $0x24] sm:$0xf] %vm2095_vm4, %v4331_v29  ;;  %v652_v37 = vadd.f32 %v4187_v38, %v584_v34 }
  0xdd   :  { %1736 = vst.msk [vmem:[%s5163_s7 + $0x64] sm:$0xf] %vm1710_vm3, %v1671_v7  ;;  %v621_v59 = vadd.f32 %v4187_v38, %v553_v21  ;;  %v637_v31 = vadd.f32 %v4187_v38, %v569_v50  ;;  %v1970_v49 = vpop.permute.xlu0 %1969  ;;  %v4810_v38 = vld [vmem:[%s5161_s3] ss:$0 sm:$0xff] }
  0xde   :  { %2121 = vst.msk [vmem:[%s5163_s7 + $0x64] sm:$0xf] %vm2095_vm4, %v4670_v42  ;;  %v716_v29 = vmax.f32 %v652_v37, 0.0  ;;  %v600_v26 = vmul.f32 %v4810_v38, %v521_v2 }
  0xdf   :  { %v685_v0 = vmax.f32 %v621_v59, 0.0  ;;  %v701_v60 = vmax.f32 %v637_v31, 0.0  ;;  %1766 = vst.msk [vmem:[%s5163_s7 + $0xdc] sm:$0xf] %vm1710_vm3, %v1701_v35 }
  0xe0   :  { %v1687_v43 = vpack.c.bf16 %v716_v29, %v716_v29  ;;  %2027 = vrot.lane.b32.xlu2 %v1837_v13, %s3216_s9  ;;  %2129 = vst.msk [vmem:[%s5163_s7 + $0x84] sm:$0xf] %vm2095_vm4, %v1970_v49  ;;  %v668_v33 = vadd.f32 %v4836_v24, %v600_v26  ;;  %v1980_v18 = vpop.permute.xlu2 %1979 }
  0xe1   :  { %v1656_v42 = vpack.c.bf16 %v685_v0, %v685_v0  ;;  %v1672_v55 = vpack.c.bf16 %v701_v60, %v701_v60  ;;  %v484_v57 = vpop.f32.mrf.mxu2  ;;  %v1972_v11 = vpop.permute.xlu1 %1971  ;;  %1767 = vst.msk [vmem:[%s5163_s7 + $0xe0] sm:$0xf] %vm1710_vm3, %v1702_v45 }
  0xe2   :  { %1752 = vst.msk [vmem:[%s5163_s7 + $0xa4] sm:$0xf] %vm1710_vm3, %v1687_v43  ;;  %v585_v9 = vmul.f32 %v4810_v38, %v484_v57  ;;  %v406_v39 = vpop.f32.mrf.mxu0  ;;  %v446_v25 = vpop.f32.mrf.mxu1  ;;  %v732_v48 = vmax.f32 %v668_v33, 0.0 }
  0xe3   :  { %1721 = vst.msk [vmem:[%s5163_s7 + $0x28] sm:$0xf] %vm1710_vm3, %v1656_v42  ;;  %v554_v22 = vmul.f32 %v4810_v38, %v406_v39  ;;  %v570_v1 = vmul.f32 %v4810_v38, %v446_v25  ;;  %v524_v20 = vpop.f32.mrf.mxu3 }
  0xe4   :  { %2106 = vst.msk [vmem:[%s5163_s7 + $0x28] sm:$0xf] %vm2095_vm4, %v4350_v30  ;;  %v653_v28 = vadd.f32 %v4836_v24, %v585_v9  ;;  %v601_v52 = vmul.f32 %v4810_v38, %v524_v20  ;;  %v1703_v34 = vpack.c.bf16 %v732_v48, %v732_v48 }
  0xe5   :  { %1737 = vst.msk [vmem:[%s5163_s7 + $0x68] sm:$0xf] %vm1710_vm3, %v1672_v55  ;;  %v622_v10 = vadd.f32 %v4836_v24, %v554_v22  ;;  %v638_v40 = vadd.f32 %v4836_v24, %v570_v1  ;;  %v1976_v41 = vpop.permute.xlu0 %1975 }
  0xe6   :  { %2122 = vst.msk [vmem:[%s5163_s7 + $0x68] sm:$0xf] %vm2095_vm4, %v4616_v19  ;;  %v717_v27 = vmax.f32 %v653_v28, 0.0  ;;  %v669_v4 = vadd.f32 %v4836_v24, %v601_v52 }
  0xe7   :  { %v686_v30 = vmax.f32 %v622_v10, 0.0  ;;  %v702_v8 = vmax.f32 %v638_v40, 0.0  ;;  %2130 = vst.msk [vmem:[%s5163_s7 + $0x88] sm:$0xf] %vm2095_vm4, %v1972_v11 }
  0xe8   :  { %v1688_v46 = vpack.c.bf16 %v717_v27, %v717_v27  ;;  %2132 = vst.msk [vmem:[%s5163_s7 + $0x90] sm:$0xf] %vm2095_vm4, %v1976_v41  ;;  %v733_v13 = vmax.f32 %v669_v4, 0.0  ;;  %v1986_v11 = vpop.permute.xlu2 %1985 }
  0xe9   :  { %v1657_v19 = vpack.c.bf16 %v686_v30, %v686_v30  ;;  %v1673_v53 = vpack.c.bf16 %v702_v8, %v702_v8  ;;  %v486_v3 = vpop.f32.mrf.mxu2  ;;  %v1978_v58 = vpop.permute.xlu1 %1977  ;;  %1768 = vst.msk [vmem:[%s5163_s7 + $0xe4] sm:$0xf] %vm1710_vm3, %v1703_v34 }
  0xea   :  { %1753 = vst.msk [vmem:[%s5163_s7 + $0xa8] sm:$0xf] %vm1710_vm3, %v1688_v46  ;;  %v586_v36 = vmul.f32 %v4810_v38, %v486_v3  ;;  %v409_v7 = vpop.f32.mrf.mxu0  ;;  %v449_v56 = vpop.f32.mrf.mxu1  ;;  %v1704_v57 = vpack.c.bf16 %v733_v13, %v733_v13 }
  0xeb   :  { %1722 = vst.msk [vmem:[%s5163_s7 + $0x2c] sm:$0xf] %vm1710_vm3, %v1657_v19  ;;  %v555_v32 = vmul.f32 %v4810_v38, %v409_v7  ;;  %v571_v63 = vmul.f32 %v4810_v38, %v449_v56  ;;  %v526_v16 = vpop.f32.mrf.mxu3 }
  0xec   :  { %2107 = vst.msk [vmem:[%s5163_s7 + $0x2c] sm:$0xf] %vm2095_vm4, %v4280_v44  ;;  %v654_v5 = vadd.f32 %v4836_v24, %v586_v36  ;;  %v602_v49 = vmul.f32 %v4810_v38, %v526_v16 }
  0xed   :  { %1738 = vst.msk [vmem:[%s5163_s7 + $0x6c] sm:$0xf] %vm1710_vm3, %v1673_v53  ;;  %v623_v21 = vadd.f32 %v4836_v24, %v555_v32  ;;  %v639_v50 = vadd.f32 %v4836_v24, %v571_v63  ;;  %v1982_v14 = vpop.permute.xlu0 %1981 }
  0xee   :  { %2123 = vst.msk [vmem:[%s5163_s7 + $0x6c] sm:$0xf] %vm2095_vm4, %v4695_v6  ;;  %v718_v44 = vmax.f32 %v654_v5, 0.0  ;;  %v670_v25 = vadd.f32 %v4836_v24, %v602_v49 }
  0xef   :  { %v687_v2 = vmax.f32 %v623_v21, 0.0  ;;  %v703_v37 = vmax.f32 %v639_v50, 0.0  ;;  %2134 = vst.msk [vmem:[%s5163_s7 + $0x98] sm:$0xf] %vm2095_vm4, %v1980_v18 }
  0xf0   :  { %v1689_v35 = vpack.c.bf16 %v718_v44, %v718_v44  ;;  %2133 = vst.msk [vmem:[%s5163_s7 + $0x94] sm:$0xf] %vm2095_vm4, %v1978_v58  ;;  %v734_v10 = vmax.f32 %v670_v25, 0.0 }
  0xf1   :  { %v1658_v59 = vpack.c.bf16 %v687_v2, %v687_v2  ;;  %v1674_v31 = vpack.c.bf16 %v703_v37, %v703_v37  ;;  %v489_v6 = vpop.f32.mrf.mxu2  ;;  %v1984_v29 = vpop.permute.xlu1 %1983  ;;  %2135 = vst.msk [vmem:[%s5163_s7 + $0x9c] sm:$0xf] %vm2095_vm4, %v1982_v14 }
  0xf2   :  { %1754 = vst.msk [vmem:[%s5163_s7 + $0xac] sm:$0xf] %vm1710_vm3, %v1689_v35  ;;  %v587_v0 = vmul.f32 %v4810_v38, %v489_v6  ;;  %v411_v60 = vpop.f32.mrf.mxu0  ;;  %v451_v12 = vpop.f32.mrf.mxu1  ;;  %v1705_v53 = vpack.c.bf16 %v734_v10, %v734_v10 }
  0xf3   :  { %1723 = vst.msk [vmem:[%s5163_s7 + $0x30] sm:$0xf] %vm1710_vm3, %v1658_v59  ;;  %v556_v26 = vmul.f32 %v4810_v38, %v411_v60  ;;  %v572_v43 = vmul.f32 %v4810_v38, %v451_v12  ;;  %v529_v42 = vpop.f32.mrf.mxu3 }
  0xf4   :  { %2108 = vst.msk [vmem:[%s5163_s7 + $0x30] sm:$0xf] %vm2095_vm4, %v4385_v47  ;;  %v655_v55 = vadd.f32 %v4836_v24, %v587_v0  ;;  %v603_v56 = vmul.f32 %v4810_v38, %v529_v42 }
  0xf5   :  { %1739 = vst.msk [vmem:[%s5163_s7 + $0x70] sm:$0xf] %vm1710_vm3, %v1674_v31  ;;  %v624_v9 = vadd.f32 %v4836_v24, %v556_v26  ;;  %v640_v39 = vadd.f32 %v4836_v24, %v572_v43  ;;  %v1988_v22 = vpop.permute.xlu0 %1987 }
  0xf6   :  { %2124 = vst.msk [vmem:[%s5163_s7 + $0x70] sm:$0xf] %vm2095_vm4, %v4718_v61  ;;  %v719_v47 = vmax.f32 %v655_v55, 0.0  ;;  %v671_v14 = vadd.f32 %v4836_v24, %v603_v56 }
  0xf7   :  { %v688_v1 = vmax.f32 %v624_v9, 0.0  ;;  %v704_v45 = vmax.f32 %v640_v39, 0.0  ;;  %1769 = vst.msk [vmem:[%s5163_s7 + $0xe8] sm:$0xf] %vm1710_vm3, %v1704_v57 }
  0xf8   :  { %v1690_v33 = vpack.c.bf16 %v719_v47, %v719_v47  ;;  %2137 = vst.msk [vmem:[%s5163_s7 + $0xa4] sm:$0xf] %vm2095_vm4, %v1986_v11  ;;  %v735_v49 = vmax.f32 %v671_v14, 0.0 }
  0xf9   :  { %v1659_v20 = vpack.c.bf16 %v688_v1, %v688_v1  ;;  %v1675_v28 = vpack.c.bf16 %v704_v45, %v704_v45  ;;  %v491_v61 = vpop.f32.mrf.mxu2  ;;  %v1990_v40 = vpop.permute.xlu1 %1989  ;;  %2136 = vst.msk [vmem:[%s5163_s7 + $0xa0] sm:$0xf] %vm2095_vm4, %v1984_v29 }
  0xfa   :  { %1755 = vst.msk [vmem:[%s5163_s7 + $0xb0] sm:$0xf] %vm1710_vm3, %v1690_v33  ;;  %v588_v27 = vmul.f32 %v4810_v38, %v491_v61  ;;  %v414_v41 = vpop.f32.mrf.mxu0  ;;  %v454_v30 = vpop.f32.mrf.mxu1  ;;  %v1706_v11 = vpack.c.bf16 %v735_v49, %v735_v49 }
  0xfb   :  { %1724 = vst.msk [vmem:[%s5163_s7 + $0x34] sm:$0xf] %vm1710_vm3, %v1659_v20  ;;  %v557_v8 = vmul.f32 %v4810_v38, %v414_v41  ;;  %v573_v48 = vmul.f32 %v4810_v38, %v454_v30  ;;  %v531_v46 = vpop.f32.mrf.mxu3 }
  0xfc   :  { %2109 = vst.msk [vmem:[%s5163_s7 + $0x34] sm:$0xf] %vm2095_vm4, %v4407_v51  ;;  %v656_v18 = vadd.f32 %v4836_v24, %v588_v27  ;;  %v1992_v51 = vpop.permute.xlu2 %1991  ;;  %v604_v35 = vmul.f32 %v4810_v38, %v531_v46 }
  0xfd   :  { %1740 = vst.msk [vmem:[%s5163_s7 + $0x74] sm:$0xf] %vm1710_vm3, %v1675_v28  ;;  %v625_v52 = vadd.f32 %v4836_v24, %v557_v8  ;;  %v641_v19 = vadd.f32 %v4836_v24, %v573_v48  ;;  %v1994_v58 = vpop.permute.xlu0 %1993 }
  0xfe   :  { %2125 = vst.msk [vmem:[%s5163_s7 + $0x74] sm:$0xf] %vm2095_vm4, %v4662_v17  ;;  %v720_v3 = vmax.f32 %v656_v18, 0.0  ;;  %v672_v12 = vadd.f32 %v4836_v24, %v604_v35 }
  0xff   :  { %v689_v36 = vmax.f32 %v625_v52, 0.0  ;;  %v705_v7 = vmax.f32 %v641_v19, 0.0  ;;  %2138 = vst.msk [vmem:[%s5163_s7 + $0xa8] sm:$0xf] %vm2095_vm4, %v1988_v22 }
 0x100   :  { %v1691_v32 = vpack.c.bf16 %v720_v3, %v720_v3  ;;  %1770 = vst.msk [vmem:[%s5163_s7 + $0xec] sm:$0xf] %vm1710_vm3, %v1705_v53  ;;  %v736_v25 = vmax.f32 %v672_v12, 0.0 }
 0x101   :  { %v1660_v63 = vpack.c.bf16 %v689_v36, %v689_v36  ;;  %v1676_v17 = vpack.c.bf16 %v705_v7, %v705_v7  ;;  %v494_v34 = vpop.f32.mrf.mxu2  ;;  %v1996_v16 = vpop.permute.xlu1 %1995  ;;  %2140 = vst.msk [vmem:[%s5163_s7 + $0xb0] sm:$0xf] %vm2095_vm4, %v1992_v51 }
 0x102   :  { %1756 = vst.msk [vmem:[%s5163_s7 + $0xb4] sm:$0xf] %vm1710_vm3, %v1691_v32  ;;  %v589_v5 = vmul.f32 %v4810_v38, %v494_v34  ;;  %v416_v4 = vpop.f32.mrf.mxu0  ;;  %v456_v21 = vpop.f32.mrf.mxu1  ;;  %v1707_v33 = vpack.c.bf16 %v736_v25, %v736_v25 }
 0x103   :  { %1725 = vst.msk [vmem:[%s5163_s7 + $0x38] sm:$0xf] %vm1710_vm3, %v1660_v63  ;;  %v558_v50 = vmul.f32 %v4810_v38, %v416_v4  ;;  %v574_v44 = vmul.f32 %v4810_v38, %v456_v21  ;;  %v534_v2 = vpop.f32.mrf.mxu3 }
 0x104   :  { %2110 = vst.msk [vmem:[%s5163_s7 + $0x38] sm:$0xf] %vm2095_vm4, %v4348_v23  ;;  %v657_v37 = vadd.f32 %v4836_v24, %v589_v5  ;;  %v1998_v60 = vpop.permute.xlu2 %1997 }
 0x105   :  { %1741 = vst.msk [vmem:[%s5163_s7 + $0x78] sm:$0xf] %vm1710_vm3, %v1676_v17  ;;  %v626_v13 = vadd.f32 %v4836_v24, %v558_v50  ;;  %v642_v59 = vadd.f32 %v4836_v24, %v574_v44  ;;  %v2000_v31 = vpop.permute.xlu0 %1999 }
 0x106   :  { %2126 = vst.msk [vmem:[%s5163_s7 + $0x78] sm:$0xf] %vm2095_vm4, %v4754_v62  ;;  %v721_v23 = vmax.f32 %v657_v37, 0.0  ;;  %v605_v62 = vmul.f32 %v4810_v38, %v534_v2 }
 0x107   :  { %v690_v6 = vmax.f32 %v626_v13, 0.0  ;;  %v706_v29 = vmax.f32 %v642_v59, 0.0  ;;  %2139 = vst.msk [vmem:[%s5163_s7 + $0xac] sm:$0xf] %vm2095_vm4, %v1990_v40 }
 0x108   :  { %v1692_v0 = vpack.c.bf16 %v721_v23, %v721_v23  ;;  %2141 = vst.msk [vmem:[%s5163_s7 + $0xb4] sm:$0xf] %vm2095_vm4, %v1994_v58  ;;  %v673_v47 = vadd.f32 %v4836_v24, %v605_v62 }
 0x109   :  { %v1661_v26 = vpack.c.bf16 %v690_v6, %v690_v6  ;;  %v1677_v43 = vpack.c.bf16 %v706_v29, %v706_v29  ;;  %v496_v42 = vpop.f32.mrf.mxu2  ;;  %v2002_v55 = vpop.permute.xlu1 %2001  ;;  %1771 = vst.msk [vmem:[%s5163_s7 + $0xf0] sm:$0xf] %vm1710_vm3, %v1706_v11 }
 0x10a   :  { %1757 = vst.msk [vmem:[%s5163_s7 + $0xb8] sm:$0xf] %vm1710_vm3, %v1692_v0  ;;  %v590_v57 = vmul.f32 %v4810_v38, %v496_v42  ;;  %v737_v20 = vmax.f32 %v673_v47, 0.0 }
 0x10b   :  { %1726 = vst.msk [vmem:[%s5163_s7 + $0x3c] sm:$0xf] %vm1710_vm3, %v1661_v26  ;;  %v536_v9 = vpop.f32.mrf.mxu3 }
 0x10c   :  { %2111 = vst.msk [vmem:[%s5163_s7 + $0x3c] sm:$0xf] %vm2095_vm4, %v4475_v54  ;;  %v658_v39 = vadd.f32 %v4836_v24, %v590_v57  ;;  %v606_v22 = vmul.f32 %v4810_v38, %v536_v9  ;;  %v1708_v61 = vpack.c.bf16 %v737_v20, %v737_v20 }
 0x10d   :  { %1742 = vst.msk [vmem:[%s5163_s7 + $0x7c] sm:$0xf] %vm1710_vm3, %v1677_v43  ;;  %v2006_v54 = vpop.permute.xlu0 %2005 }
 0x10e   :  { %2127 = vst.msk [vmem:[%s5163_s7 + $0x7c] sm:$0xf] %vm2095_vm4, %v4768_v15  ;;  %v722_v1 = vmax.f32 %v658_v39, 0.0  ;;  %v674_v38 = vadd.f32 %v4836_v24, %v606_v22  ;;  %v2004_v15 = vpop.permute.xlu2 %2003 }
 0x10f   :  { %2142 = vst.msk [vmem:[%s5163_s7 + $0xb8] sm:$0xf] %vm2095_vm4, %v1996_v16 }
 0x110   :  { %v1693_v45 = vpack.c.bf16 %v722_v1, %v722_v1  ;;  %2144 = vst.msk [vmem:[%s5163_s7 + $0xc0] sm:$0xf] %vm2095_vm4, %v2000_v31  ;;  %v738_v28 = vmax.f32 %v674_v38, 0.0 }
 0x111   :  { %v2008_v24 = vpop.permute.xlu1 %2007  ;;  %1772 = vst.msk [vmem:[%s5163_s7 + $0xf4] sm:$0xf] %vm1710_vm3, %v1707_v33 }
 0x112   :  { %1758 = vst.msk [vmem:[%s5163_s7 + $0xbc] sm:$0xf] %vm1710_vm3, %v1693_v45  ;;  %v1709_v40 = vpack.c.bf16 %v738_v28, %v738_v28 }
 0x113   :  { %2143 = vst.msk [vmem:[%s5163_s7 + $0xbc] sm:$0xf] %vm2095_vm4, %v1998_v60 }
 0x114   :  { %2146 = vst.msk [vmem:[%s5163_s7 + $0xc8] sm:$0xf] %vm2095_vm4, %v2004_v15 }
 0x115   :  { %2145 = vst.msk [vmem:[%s5163_s7 + $0xc4] sm:$0xf] %vm2095_vm4, %v2002_v55  ;;  %v2012_v10 = vpop.permute.xlu0 %2011 }
 0x116   :  { %2147 = vst.msk [vmem:[%s5163_s7 + $0xcc] sm:$0xf] %vm2095_vm4, %v2006_v54 }
 0x117   :  { %1773 = vst.msk [vmem:[%s5163_s7 + $0xf8] sm:$0xf] %vm1710_vm3, %v1708_v61 }
 0x118   :  { %2148 = vst.msk [vmem:[%s5163_s7 + $0xd0] sm:$0xf] %vm2095_vm4, %v2008_v24 }
 0x119   :  { %2150 = vst.msk [vmem:[%s5163_s7 + $0xd8] sm:$0xf] %vm2095_vm4, %v2012_v10 }
 0x11a   :  { %1774 = vst.msk [vmem:[%s5163_s7 + $0xfc] sm:$0xf] %vm1710_vm3, %v1709_v40 }
 0x11c   :  { %v2010_v27 = vpop.permute.xlu2 %2009  ;;  %v2014_v41 = vpop.permute.xlu1 %2013 }
 0x11d   :  { %2149 = vst.msk [vmem:[%s5163_s7 + $0xd4] sm:$0xf] %vm2095_vm4, %v2010_v27 }
 0x11e   :  { %2151 = vst.msk [vmem:[%s5163_s7 + $0xdc] sm:$0xf] %vm2095_vm4, %v2014_v41 }
 0x11f   :  { %v2018_v30 = vpop.permute.xlu0 %2017 }
 0x120   :  { %2153 = vst.msk [vmem:[%s5163_s7 + $0xe4] sm:$0xf] %vm2095_vm4, %v2018_v30 }
 0x12a   :  { %v2016_v8 = vpop.permute.xlu2 %2015 }
 0x12b   :  { %2152 = vst.msk [vmem:[%s5163_s7 + $0xe0] sm:$0xf] %vm2095_vm4, %v2016_v8 }
 0x12c   :  { %v2020_v48 = vpop.permute.xlu1 %2019 }
 0x12d   :  { %2154 = vst.msk [vmem:[%s5163_s7 + $0xe8] sm:$0xf] %vm2095_vm4, %v2020_v48 }
 0x12f   :  { %v2024_v46 = vpop.permute.xlu0 %2023 }
 0x130   :  { %2156 = vst.msk [vmem:[%s5163_s7 + $0xf0] sm:$0xf] %vm2095_vm4, %v2024_v46 }
 0x132   :  { %v2022_v18 = vpop.permute.xlu2 %2021 }
 0x133   :  { %2155 = vst.msk [vmem:[%s5163_s7 + $0xec] sm:$0xf] %vm2095_vm4, %v2022_v18 }
 0x139   :  { %v2026_v52 = vpop.permute.xlu1 %2025 }
 0x13a   :  { %v2028_v19 = vpop.permute.xlu2 %2027  ;;  %2157 = vst.msk [vmem:[%s5163_s7 + $0xf4] sm:$0xf] %vm2095_vm4, %v2026_v52 }
 0x13b   :  { %2158 = vst.msk [vmem:[%s5163_s7 + $0xf8] sm:$0xf] %vm2095_vm4, %v2028_v19 }
 0x13c   :  { %v2030_v53 = vpop.permute.xlu0 %2029 }
 0x13d   :  { %2159 = vst.msk [vmem:[%s5163_s7 + $0xfc] sm:$0xf] %vm2095_vm4, %v2030_v53 }

// kernel: _lambda_.57
= control target key start
LH: loop header
LB: loop body
LE: loop exit
PB: predicated region body
PF: predicated region fallthrough
CT: control target
= control target key end

     0   :  { %vm203_vm0 = vcmask 523264   ;;  %vm358_vm1 = vcmask 519168   ;;  %s788_s1 = inlined_call_operand.vmem [shape: bf16[192,64], index: 1, kind: input, shape index: {}]   ;;  %s789_s0 = inlined_call_operand.vmem [shape: bf16[128,192], index: 0, kind: input, shape index: {}]   ;;  %s790_s2 = inlined_call_operand.vmem [shape: f32[1,64], index: 2, kind: input, shape index: {}]   ;;  %s791_s3 = inlined_call_operand.vmem [shape: bf16[128,64], index: 3, kind: output, shape index: {}]  }
   0x1   :  { %v522_v0 = vld [vmem:[%s788_s1 + $0x38] sm:$0xff]  ;;  %v521_v2 = vld [vmem:[%s788_s1 + $0x30] sm:$0xff]  ;;  %v520_v4 = vld [vmem:[%s788_s1 + $0x28] sm:$0xff] }
   0x2   :  { %v526_v1 = vld [vmem:[%s788_s1 + $0x58] sm:$0xff]  ;;  %228 = vmatpush.bf16.msra.mxu0 %v522_v0  ;;  %527 = vmatpush.bf16.msra.mxu2 %v522_v0  ;;  %v525_v3 = vld [vmem:[%s788_s1 + $0x50] sm:$0xff]  ;;  %v524_v5 = vld [vmem:[%s788_s1 + $0x48] sm:$0xff] }
   0x3   :  { %281 = vmatpush.bf16.msra.mxu1 %v526_v1  ;;  %535 = vmatpush.bf16.msra.mxu3 %v526_v1  ;;  %v519_v6 = vld [vmem:[%s788_s1 + $0x20] sm:$0xff]  ;;  %v383_v9 = vld [vmem:[%s789_s0 + $0x8] sm:$0xf0]  ;;  %v509_v10 = vld [vmem:[%s789_s0 + $0x54] sm:$0xf] }
   0x4   :  { %v523_v7 = vld [vmem:[%s788_s1 + $0x40] sm:$0xff]  ;;  %v423_v11 = vld [vmem:[%s789_s0 + $0x58] sm:$0xf0]  ;;  %v517_v15 = vld [vmem:[%s788_s1 + $0x10] sm:$0xff] }
   0x5   :  { %v499_v8 = vld [vmem:[%s789_s0 + $0x4] sm:$0xf]  ;;  %v518_v13 = vld [vmem:[%s788_s1 + $0x18] sm:$0xff]  ;;  %v426_v14 = vor.u32 %v509_v10, %v423_v11  ;;  %v516_v16 = vld [vmem:[%s788_s1 + $0x8] sm:$0xff] }
   0x6   :  { %229 = vmatpush.bf16.msra.mxu0 %v521_v2  ;;  %528 = vmatpush.bf16.msra.mxu2 %v521_v2  ;;  %v386_v12 = vor.u32 %v499_v8, %v383_v9  ;;  %v515_v17 = vld [vmem:[%s788_s1] sm:$0xff]  ;;  %v500_v19 = vld [vmem:[%s789_s0 + $0x4] sm:$0xf0]  ;;  %v501_v22 = vld [vmem:[%s789_s0 + $0x14] sm:$0xf] }
   0x7   :  { %282 = vmatpush.bf16.msra.mxu1 %v525_v3  ;;  %536 = vmatpush.bf16.msra.mxu3 %v525_v3  ;;  %v381_v18 = vld [vmem:[%s789_s0] sm:$0xf]  ;;  %v508_v21 = vld [vmem:[%s789_s0 + $0x44] sm:$0xf0]  ;;  %v391_v23 = vld [vmem:[%s789_s0 + $0x18] sm:$0xf0] }
   0x8   :  { %v413_v20 = vld [vmem:[%s789_s0 + $0x40] sm:$0xf]  ;;  %v511_v24 = vld [vmem:[%s789_s0 + $0x64] sm:$0xf]  ;;  %v431_v25 = vld [vmem:[%s789_s0 + $0x68] sm:$0xf0]  ;;  %v382_v26 = vor.u32 %v500_v19, %v381_v18  ;;  %v394_v28 = vor.u32 %v501_v22, %v391_v23 }
   0x9   :  { %v414_v27 = vor.u32 %v508_v21, %v413_v20  ;;  %v434_v29 = vor.u32 %v511_v24, %v431_v25  ;;  %v389_v30 = vld [vmem:[%s789_s0 + $0x10] sm:$0xf]  ;;  %v502_v31 = vld [vmem:[%s789_s0 + $0x14] sm:$0xf0]  ;;  %v503_v34 = vld [vmem:[%s789_s0 + $0x24] sm:$0xf] }
   0xa   :  { %230 = vmatpush.bf16.msra.mxu0 %v520_v4  ;;  %529 = vmatpush.bf16.msra.mxu2 %v520_v4  ;;  %v421_v32 = vld [vmem:[%s789_s0 + $0x50] sm:$0xf]  ;;  %v510_v33 = vld [vmem:[%s789_s0 + $0x54] sm:$0xf0]  ;;  %v399_v35 = vld [vmem:[%s789_s0 + $0x28] sm:$0xf0]  ;;  %v390_v38 = vor.u32 %v502_v31, %v389_v30 }
   0xb   :  { %283 = vmatpush.bf16.msra.mxu1 %v524_v5  ;;  %537 = vmatpush.bf16.msra.mxu3 %v524_v5  ;;  %v513_v36 = vld [vmem:[%s789_s0 + $0x74] sm:$0xf]  ;;  %v439_v37 = vld [vmem:[%s789_s0 + $0x78] sm:$0xf0]  ;;  %v422_v39 = vor.u32 %v510_v33, %v421_v32  ;;  %v402_v40 = vor.u32 %v503_v34, %v399_v35  ;;  %v397_v42 = vld [vmem:[%s789_s0 + $0x20] sm:$0xf] }
   0xc   :  { %v442_v41 = vor.u32 %v513_v36, %v439_v37  ;;  %v504_v43 = vld [vmem:[%s789_s0 + $0x24] sm:$0xf0]  ;;  %v429_v44 = vld [vmem:[%s789_s0 + $0x60] sm:$0xf]  ;;  %v505_v46 = vld [vmem:[%s789_s0 + $0x34] sm:$0xf] }
   0xd   :  { %v512_v45 = vld [vmem:[%s789_s0 + $0x64] sm:$0xf0]  ;;  %v407_v47 = vld [vmem:[%s789_s0 + $0x38] sm:$0xf0]  ;;  %v398_v48 = vor.u32 %v504_v43, %v397_v42  ;;  %v405_v51 = vld [vmem:[%s789_s0 + $0x30] sm:$0xf] }
   0xe   :  { %231 = vmatpush.bf16.msra.mxu0 %v519_v6  ;;  %530 = vmatpush.bf16.msra.mxu2 %v519_v6  ;;  %v430_v49 = vor.u32 %v512_v45, %v429_v44  ;;  %v410_v50 = vor.u32 %v505_v46, %v407_v47  ;;  %v506_v52 = vld [vmem:[%s789_s0 + $0x34] sm:$0xf0]  ;;  %v437_v53 = vld [vmem:[%s789_s0 + $0x70] sm:$0xf]  ;;  %v507_v55 = vld [vmem:[%s789_s0 + $0x44] sm:$0xf] }
   0xf   :  { %284 = vmatpush.bf16.msra.mxu1 %v523_v7  ;;  %538 = vmatpush.bf16.msra.mxu3 %v523_v7  ;;  %v514_v54 = vld [vmem:[%s789_s0 + $0x74] sm:$0xf0]  ;;  %v415_v56 = vld [vmem:[%s789_s0 + $0x48] sm:$0xf0]  ;;  %v406_v57 = vor.u32 %v506_v52, %v405_v51  ;;  %v703_v62 = vld [vmem:[%s790_s2] ss:$0 sm:$0xff] }
  0x10   :  { %v438_v58 = vor.u32 %v514_v54, %v437_v53  ;;  %v418_v59 = vor.u32 %v507_v55, %v415_v56 }
  0x12   :  { %491 = vmatmul.msk.bf16.vlgmr.msra.gmra.mxu1 %vm203_vm0, %v386_v12  ;;  %232 = vmatpush.bf16.msra.mxu0 %v518_v13 }
  0x13   :  { %531 = vmatpush.bf16.msra.mxu2 %v518_v13  ;;  %496 = vmatmul.msk.bf16.vlgmr.msra.gmra.mxu3 %vm203_vm0, %v426_v14 }
  0x16   :  { %233 = vmatpush.bf16.msra.mxu0 %v517_v15 }
  0x17   :  { %532 = vmatpush.bf16.msra.mxu2 %v517_v15 }
  0x1a   :  { %234 = vmatpush.bf16.msra.mxu0 %v516_v16 }
  0x1b   :  { %533 = vmatpush.bf16.msra.mxu2 %v516_v16 }
  0x1e   :  { %235 = vmatpush.bf16.msra.mxu0 %v515_v17 }
  0x1f   :  { %534 = vmatpush.bf16.msra.mxu2 %v515_v17 }
  0x21   :  { %236 = vmatmul.bf16.vlgmr.msra.gmra.mxu0 %v382_v26 }
  0x22   :  { %256 = vmatmul.bf16.vlgmr.msra.gmra.mxu2 %v414_v27  ;;  %492 = vmatmul.msk.bf16.gmra.mxu1 %vm203_vm0, %v394_v28 }
  0x23   :  { %497 = vmatmul.msk.bf16.gmra.mxu3 %vm203_vm0, %v434_v29 }
  0x31   :  { %241 = vmatmul.bf16.gmra.mxu0 %v390_v38 }
  0x32   :  { %261 = vmatmul.bf16.gmra.mxu2 %v422_v39  ;;  %493 = vmatmul.msk.bf16.gmra.mxu1 %vm203_vm0, %v402_v40 }
  0x33   :  { %498 = vmatmul.msk.bf16.gmra.mxu3 %vm203_vm0, %v442_v41 }
  0x41   :  { %246 = vmatmul.bf16.gmra.mxu0 %v398_v48 }
  0x42   :  { %266 = vmatmul.bf16.gmra.mxu2 %v430_v49  ;;  %494 = vmatmul.msk.bf16.gmra.mxu1 %vm203_vm0, %v410_v50 }
  0x51   :  { %251 = vmatmul.bf16.gmra.mxu0 %v406_v57 }
  0x52   :  { %271 = vmatmul.bf16.gmra.mxu2 %v438_v58  ;;  %495 = vmatmul.msk.bf16.gmra.mxu1 %vm203_vm0, %v418_v59 }
  0x8f   :  { %v286_v60 = vpop.f32.mrf.mxu1 }
  0x96   :  { %v311_v13 = vpop.f32.mrf.mxu3 }
  0x97   :  { %v288_v61 = vpop.f32.mrf.mxu1 }
  0x9e   :  { %v237_v63 = vpop.f32.mrf.mxu0  ;;  %v313_v25 = vpop.f32.mrf.mxu3 }
  0x9f   :  { %v238_v0 = vadd.f32 %v703_v62, %v237_v63  ;;  %v291_v1 = vpop.f32.mrf.mxu1 }
  0xa1   :  { %v287_v2 = vadd.f32 %v286_v60, %v238_v0 }
  0xa3   :  { %v326_v3 = vmax.f32 %v287_v2, 0.0 }
  0xa5   :  { %v342_v4 = vpack.c.bf16 %v326_v3, %v326_v3  ;;  %v257_v5 = vpop.f32.mrf.mxu2 }
  0xa6   :  { %v239_v6 = vpop.f32.mrf.mxu0  ;;  %v316_v39 = vpop.f32.mrf.mxu3  ;;  %v258_v57 = vadd.f32 %v703_v62, %v257_v5 }
  0xa7   :  { %359 = vst.msk [vmem:[%s791_s3] sm:$0xf] %vm358_vm1, %v342_v4  ;;  %v240_v7 = vadd.f32 %v703_v62, %v239_v6  ;;  %v293_v8 = vpop.f32.mrf.mxu1 }
  0xa9   :  { %v289_v9 = vadd.f32 %v288_v61, %v240_v7 }
  0xab   :  { %v327_v10 = vmax.f32 %v289_v9, 0.0 }
  0xad   :  { %v343_v11 = vpack.c.bf16 %v327_v10, %v327_v10  ;;  %v711_v12 = vpop.f32.mrf.mxu2 }
  0xae   :  { %v242_v14 = vpop.f32.mrf.mxu0  ;;  %v318_v53 = vpop.f32.mrf.mxu3  ;;  %v260_v10 = vadd.f32 %v703_v62, %v711_v12 }
  0xaf   :  { %360 = vst.msk [vmem:[%s791_s3 + $0x4] sm:$0xf] %vm358_vm1, %v343_v11  ;;  %v243_v15 = vadd.f32 %v703_v62, %v242_v14  ;;  %v296_v16 = vpop.f32.mrf.mxu1 }
  0xb1   :  { %v292_v17 = vadd.f32 %v291_v1, %v243_v15 }
  0xb3   :  { %v328_v18 = vmax.f32 %v292_v17, 0.0 }
  0xb5   :  { %v344_v19 = vpack.c.bf16 %v328_v18, %v328_v18  ;;  %v262_v20 = vpop.f32.mrf.mxu2 }
  0xb6   :  { %v263_v21 = vadd.f32 %v703_v62, %v262_v20  ;;  %v244_v22 = vpop.f32.mrf.mxu0 }
  0xb7   :  { %361 = vst.msk [vmem:[%s791_s3 + $0x8] sm:$0xf] %vm358_vm1, %v344_v19  ;;  %v245_v23 = vadd.f32 %v703_v62, %v244_v22  ;;  %v298_v24 = vpop.f32.mrf.mxu1 }
  0xb8   :  { %v312_v26 = vadd.f32 %v311_v13, %v263_v21 }
  0xb9   :  { %v294_v27 = vadd.f32 %v293_v8, %v245_v23  ;;  %v321_v8 = vpop.f32.mrf.mxu3 }
  0xba   :  { %v336_v28 = vmax.f32 %v312_v26, 0.0 }
  0xbb   :  { %v329_v29 = vmax.f32 %v294_v27, 0.0 }
  0xbc   :  { %v352_v30 = vpack.c.bf16 %v336_v28, %v336_v28 }
  0xbd   :  { %v345_v31 = vpack.c.bf16 %v329_v29, %v329_v29  ;;  %v264_v32 = vpop.f32.mrf.mxu2 }
  0xbe   :  { %369 = vst.msk [vmem:[%s791_s3 + $0x28] sm:$0xf] %vm358_vm1, %v352_v30  ;;  %v265_v33 = vadd.f32 %v703_v62, %v264_v32  ;;  %v247_v34 = vpop.f32.mrf.mxu0 }
  0xbf   :  { %362 = vst.msk [vmem:[%s791_s3 + $0xc] sm:$0xf] %vm358_vm1, %v345_v31  ;;  %v248_v35 = vadd.f32 %v703_v62, %v247_v34  ;;  %v301_v36 = vpop.f32.mrf.mxu1 }
  0xc0   :  { %v314_v37 = vadd.f32 %v313_v25, %v265_v33 }
  0xc1   :  { %v297_v38 = vadd.f32 %v296_v16, %v248_v35  ;;  %v323_v26 = vpop.f32.mrf.mxu3 }
  0xc2   :  { %v337_v40 = vmax.f32 %v314_v37, 0.0 }
  0xc3   :  { %v330_v41 = vmax.f32 %v297_v38, 0.0 }
  0xc4   :  { %v353_v42 = vpack.c.bf16 %v337_v40, %v337_v40 }
  0xc5   :  { %v346_v43 = vpack.c.bf16 %v330_v41, %v330_v41  ;;  %v267_v44 = vpop.f32.mrf.mxu2 }
  0xc6   :  { %370 = vst.msk [vmem:[%s791_s3 + $0x2c] sm:$0xf] %vm358_vm1, %v353_v42  ;;  %v268_v45 = vadd.f32 %v703_v62, %v267_v44  ;;  %v249_v46 = vpop.f32.mrf.mxu0 }
  0xc7   :  { %363 = vst.msk [vmem:[%s791_s3 + $0x10] sm:$0xf] %vm358_vm1, %v346_v43  ;;  %v250_v47 = vadd.f32 %v703_v62, %v249_v46  ;;  %v303_v48 = vpop.f32.mrf.mxu1 }
  0xc8   :  { %v317_v49 = vadd.f32 %v316_v39, %v268_v45 }
  0xc9   :  { %v299_v50 = vadd.f32 %v298_v24, %v250_v47 }
  0xca   :  { %v338_v51 = vmax.f32 %v317_v49, 0.0 }
  0xcb   :  { %v331_v52 = vmax.f32 %v299_v50, 0.0 }
  0xcc   :  { %v354_v54 = vpack.c.bf16 %v338_v51, %v338_v51 }
  0xcd   :  { %v347_v55 = vpack.c.bf16 %v331_v52, %v331_v52  ;;  %v269_v56 = vpop.f32.mrf.mxu2 }
  0xce   :  { %371 = vst.msk [vmem:[%s791_s3 + $0x30] sm:$0xf] %vm358_vm1, %v354_v54  ;;  %v270_v58 = vadd.f32 %v703_v62, %v269_v56  ;;  %v252_v59 = vpop.f32.mrf.mxu0 }
  0xcf   :  { %364 = vst.msk [vmem:[%s791_s3 + $0x14] sm:$0xf] %vm358_vm1, %v347_v55  ;;  %v253_v60 = vadd.f32 %v703_v62, %v252_v59  ;;  %v306_v61 = vpop.f32.mrf.mxu1 }
  0xd0   :  { %v319_v63 = vadd.f32 %v318_v53, %v270_v58  ;;  %v307_v0 = vadd.f32 %v306_v61, %v258_v57 }
  0xd1   :  { %v302_v1 = vadd.f32 %v301_v36, %v253_v60 }
  0xd2   :  { %v339_v2 = vmax.f32 %v319_v63, 0.0  ;;  %v334_v3 = vmax.f32 %v307_v0, 0.0 }
  0xd3   :  { %v332_v4 = vmax.f32 %v302_v1, 0.0 }
  0xd4   :  { %v355_v5 = vpack.c.bf16 %v339_v2, %v339_v2  ;;  %v350_v6 = vpack.c.bf16 %v334_v3, %v334_v3 }
  0xd5   :  { %v348_v7 = vpack.c.bf16 %v332_v4, %v332_v4  ;;  %v272_v9 = vpop.f32.mrf.mxu2 }
  0xd6   :  { %372 = vst.msk [vmem:[%s791_s3 + $0x34] sm:$0xf] %vm358_vm1, %v355_v5  ;;  %v273_v11 = vadd.f32 %v703_v62, %v272_v9  ;;  %v254_v13 = vpop.f32.mrf.mxu0 }
  0xd7   :  { %365 = vst.msk [vmem:[%s791_s3 + $0x18] sm:$0xf] %vm358_vm1, %v348_v7  ;;  %v255_v14 = vadd.f32 %v703_v62, %v254_v13  ;;  %v308_v15 = vpop.f32.mrf.mxu1 }
  0xd8   :  { %367 = vst.msk [vmem:[%s791_s3 + $0x20] sm:$0xf] %vm358_vm1, %v350_v6  ;;  %v322_v12 = vadd.f32 %v321_v8, %v273_v11  ;;  %v309_v16 = vadd.f32 %v308_v15, %v260_v10 }
  0xd9   :  { %v304_v17 = vadd.f32 %v303_v48, %v255_v14 }
  0xda   :  { %v340_v18 = vmax.f32 %v322_v12, 0.0  ;;  %v335_v19 = vmax.f32 %v309_v16, 0.0 }
  0xdb   :  { %v333_v20 = vmax.f32 %v304_v17, 0.0 }
  0xdc   :  { %v356_v21 = vpack.c.bf16 %v340_v18, %v340_v18  ;;  %v351_v22 = vpack.c.bf16 %v335_v19, %v335_v19 }
  0xdd   :  { %v349_v23 = vpack.c.bf16 %v333_v20, %v333_v20  ;;  %v274_v24 = vpop.f32.mrf.mxu2 }
  0xde   :  { %373 = vst.msk [vmem:[%s791_s3 + $0x38] sm:$0xf] %vm358_vm1, %v356_v21  ;;  %v275_v25 = vadd.f32 %v703_v62, %v274_v24 }
  0xdf   :  { %366 = vst.msk [vmem:[%s791_s3 + $0x1c] sm:$0xf] %vm358_vm1, %v349_v23 }
  0xe0   :  { %368 = vst.msk [vmem:[%s791_s3 + $0x24] sm:$0xf] %vm358_vm1, %v351_v22  ;;  %v324_v27 = vadd.f32 %v323_v26, %v275_v25 }
  0xe2   :  { %v341_v28 = vmax.f32 %v324_v27, 0.0 }
  0xe4   :  { %v357_v29 = vpack.c.bf16 %v341_v28, %v341_v28 }
  0xe6   :  { %374 = vst.msk [vmem:[%s791_s3 + $0x3c] sm:$0xf] %vm358_vm1, %v357_v29 }

// kernel: _lambda_.58
= control target key start
LH: loop header
LB: loop body
LE: loop exit
PB: predicated region body
PF: predicated region fallthrough
CT: control target
= control target key end

     0   :  { %vm202_vm0 = vcmask 523264   ;;  %vm397_vm1 = vcmask 519168   ;;  %s857_s1 = inlined_call_operand.vmem [shape: bf16[192,64], index: 1, kind: input, shape index: {}]   ;;  %s858_s0 = inlined_call_operand.vmem [shape: bf16[128,192], index: 0, kind: input, shape index: {}]   ;;  %s859_s2 = inlined_call_operand.vmem [shape: f32[1,64], index: 2, kind: input, shape index: {}]   ;;  %s860_s3 = inlined_call_operand.vmem [shape: f32[1,64], index: 3, kind: input, shape index: {}]   ;;  %s861_s4 = inlined_call_operand.vmem [shape: bf16[128,64], index: 4, kind: output, shape index: {}]  }
   0x1   :  { %v561_v0 = vld [vmem:[%s857_s1 + $0x38] sm:$0xff]  ;;  %v560_v2 = vld [vmem:[%s857_s1 + $0x30] sm:$0xff]  ;;  %v559_v4 = vld [vmem:[%s857_s1 + $0x28] sm:$0xff] }
   0x2   :  { %v565_v1 = vld [vmem:[%s857_s1 + $0x58] sm:$0xff]  ;;  %227 = vmatpush.bf16.msra.mxu0 %v561_v0  ;;  %566 = vmatpush.bf16.msra.mxu2 %v561_v0  ;;  %v564_v3 = vld [vmem:[%s857_s1 + $0x50] sm:$0xff]  ;;  %v563_v5 = vld [vmem:[%s857_s1 + $0x48] sm:$0xff] }
   0x3   :  { %280 = vmatpush.bf16.msra.mxu1 %v565_v1  ;;  %574 = vmatpush.bf16.msra.mxu3 %v565_v1  ;;  %v558_v6 = vld [vmem:[%s857_s1 + $0x20] sm:$0xff]  ;;  %v422_v9 = vld [vmem:[%s858_s0 + $0x8] sm:$0xf0]  ;;  %v548_v10 = vld [vmem:[%s858_s0 + $0x54] sm:$0xf] }
   0x4   :  { %v562_v7 = vld [vmem:[%s857_s1 + $0x40] sm:$0xff]  ;;  %v462_v11 = vld [vmem:[%s858_s0 + $0x58] sm:$0xf0]  ;;  %v556_v15 = vld [vmem:[%s857_s1 + $0x10] sm:$0xff] }
   0x5   :  { %v538_v8 = vld [vmem:[%s858_s0 + $0x4] sm:$0xf]  ;;  %v557_v13 = vld [vmem:[%s857_s1 + $0x18] sm:$0xff]  ;;  %v465_v14 = vor.u32 %v548_v10, %v462_v11  ;;  %v555_v16 = vld [vmem:[%s857_s1 + $0x8] sm:$0xff] }
   0x6   :  { %228 = vmatpush.bf16.msra.mxu0 %v560_v2  ;;  %567 = vmatpush.bf16.msra.mxu2 %v560_v2  ;;  %v425_v12 = vor.u32 %v538_v8, %v422_v9  ;;  %v554_v17 = vld [vmem:[%s857_s1] sm:$0xff]  ;;  %v539_v19 = vld [vmem:[%s858_s0 + $0x4] sm:$0xf0]  ;;  %v540_v22 = vld [vmem:[%s858_s0 + $0x14] sm:$0xf] }
   0x7   :  { %281 = vmatpush.bf16.msra.mxu1 %v564_v3  ;;  %575 = vmatpush.bf16.msra.mxu3 %v564_v3  ;;  %v420_v18 = vld [vmem:[%s858_s0] sm:$0xf]  ;;  %v547_v21 = vld [vmem:[%s858_s0 + $0x44] sm:$0xf0]  ;;  %v430_v23 = vld [vmem:[%s858_s0 + $0x18] sm:$0xf0] }
   0x8   :  { %v452_v20 = vld [vmem:[%s858_s0 + $0x40] sm:$0xf]  ;;  %v550_v24 = vld [vmem:[%s858_s0 + $0x64] sm:$0xf]  ;;  %v470_v25 = vld [vmem:[%s858_s0 + $0x68] sm:$0xf0]  ;;  %v421_v26 = vor.u32 %v539_v19, %v420_v18  ;;  %v433_v28 = vor.u32 %v540_v22, %v430_v23 }
   0x9   :  { %v453_v27 = vor.u32 %v547_v21, %v452_v20  ;;  %v473_v29 = vor.u32 %v550_v24, %v470_v25  ;;  %v428_v30 = vld [vmem:[%s858_s0 + $0x10] sm:$0xf]  ;;  %v541_v31 = vld [vmem:[%s858_s0 + $0x14] sm:$0xf0]  ;;  %v542_v34 = vld [vmem:[%s858_s0 + $0x24] sm:$0xf] }
   0xa   :  { %229 = vmatpush.bf16.msra.mxu0 %v559_v4  ;;  %568 = vmatpush.bf16.msra.mxu2 %v559_v4  ;;  %v460_v32 = vld [vmem:[%s858_s0 + $0x50] sm:$0xf]  ;;  %v549_v33 = vld [vmem:[%s858_s0 + $0x54] sm:$0xf0]  ;;  %v438_v35 = vld [vmem:[%s858_s0 + $0x28] sm:$0xf0]  ;;  %v429_v38 = vor.u32 %v541_v31, %v428_v30 }
   0xb   :  { %282 = vmatpush.bf16.msra.mxu1 %v563_v5  ;;  %576 = vmatpush.bf16.msra.mxu3 %v563_v5  ;;  %v552_v36 = vld [vmem:[%s858_s0 + $0x74] sm:$0xf]  ;;  %v478_v37 = vld [vmem:[%s858_s0 + $0x78] sm:$0xf0]  ;;  %v461_v39 = vor.u32 %v549_v33, %v460_v32  ;;  %v441_v40 = vor.u32 %v542_v34, %v438_v35  ;;  %v436_v42 = vld [vmem:[%s858_s0 + $0x20] sm:$0xf] }
   0xc   :  { %v481_v41 = vor.u32 %v552_v36, %v478_v37  ;;  %v543_v43 = vld [vmem:[%s858_s0 + $0x24] sm:$0xf0]  ;;  %v468_v44 = vld [vmem:[%s858_s0 + $0x60] sm:$0xf]  ;;  %v544_v46 = vld [vmem:[%s858_s0 + $0x34] sm:$0xf] }
   0xd   :  { %v551_v45 = vld [vmem:[%s858_s0 + $0x64] sm:$0xf0]  ;;  %v446_v47 = vld [vmem:[%s858_s0 + $0x38] sm:$0xf0]  ;;  %v437_v48 = vor.u32 %v543_v43, %v436_v42  ;;  %v444_v51 = vld [vmem:[%s858_s0 + $0x30] sm:$0xf] }
   0xe   :  { %230 = vmatpush.bf16.msra.mxu0 %v558_v6  ;;  %569 = vmatpush.bf16.msra.mxu2 %v558_v6  ;;  %v469_v49 = vor.u32 %v551_v45, %v468_v44  ;;  %v449_v50 = vor.u32 %v544_v46, %v446_v47  ;;  %v545_v52 = vld [vmem:[%s858_s0 + $0x34] sm:$0xf0]  ;;  %v476_v53 = vld [vmem:[%s858_s0 + $0x70] sm:$0xf]  ;;  %v546_v55 = vld [vmem:[%s858_s0 + $0x44] sm:$0xf] }
   0xf   :  { %283 = vmatpush.bf16.msra.mxu1 %v562_v7  ;;  %577 = vmatpush.bf16.msra.mxu3 %v562_v7  ;;  %v553_v54 = vld [vmem:[%s858_s0 + $0x74] sm:$0xf0]  ;;  %v454_v56 = vld [vmem:[%s858_s0 + $0x48] sm:$0xf0]  ;;  %v445_v57 = vor.u32 %v545_v52, %v444_v51  ;;  %v748_v62 = vld [vmem:[%s860_s3] ss:$0 sm:$0xff] }
  0x10   :  { %v477_v58 = vor.u32 %v553_v54, %v476_v53  ;;  %v457_v59 = vor.u32 %v546_v55, %v454_v56  ;;  %v753_v1 = vld [vmem:[%s859_s2] ss:$0 sm:$0xff] }
  0x12   :  { %530 = vmatmul.msk.bf16.vlgmr.msra.gmra.mxu1 %vm202_vm0, %v425_v12  ;;  %231 = vmatpush.bf16.msra.mxu0 %v557_v13 }
  0x13   :  { %570 = vmatpush.bf16.msra.mxu2 %v557_v13  ;;  %535 = vmatmul.msk.bf16.vlgmr.msra.gmra.mxu3 %vm202_vm0, %v465_v14 }
  0x16   :  { %232 = vmatpush.bf16.msra.mxu0 %v556_v15 }
  0x17   :  { %571 = vmatpush.bf16.msra.mxu2 %v556_v15 }
  0x1a   :  { %233 = vmatpush.bf16.msra.mxu0 %v555_v16 }
  0x1b   :  { %572 = vmatpush.bf16.msra.mxu2 %v555_v16 }
  0x1e   :  { %234 = vmatpush.bf16.msra.mxu0 %v554_v17 }
  0x1f   :  { %573 = vmatpush.bf16.msra.mxu2 %v554_v17 }
  0x21   :  { %235 = vmatmul.bf16.vlgmr.msra.gmra.mxu0 %v421_v26 }
  0x22   :  { %255 = vmatmul.bf16.vlgmr.msra.gmra.mxu2 %v453_v27  ;;  %531 = vmatmul.msk.bf16.gmra.mxu1 %vm202_vm0, %v433_v28 }
  0x23   :  { %536 = vmatmul.msk.bf16.gmra.mxu3 %vm202_vm0, %v473_v29 }
  0x31   :  { %240 = vmatmul.bf16.gmra.mxu0 %v429_v38 }
  0x32   :  { %260 = vmatmul.bf16.gmra.mxu2 %v461_v39  ;;  %532 = vmatmul.msk.bf16.gmra.mxu1 %vm202_vm0, %v441_v40 }
  0x33   :  { %537 = vmatmul.msk.bf16.gmra.mxu3 %vm202_vm0, %v481_v41 }
  0x41   :  { %245 = vmatmul.bf16.gmra.mxu0 %v437_v48 }
  0x42   :  { %265 = vmatmul.bf16.gmra.mxu2 %v469_v49  ;;  %533 = vmatmul.msk.bf16.gmra.mxu1 %vm202_vm0, %v449_v50 }
  0x51   :  { %250 = vmatmul.bf16.gmra.mxu0 %v445_v57 }
  0x52   :  { %270 = vmatmul.bf16.gmra.mxu2 %v477_v58  ;;  %534 = vmatmul.msk.bf16.gmra.mxu1 %vm202_vm0, %v457_v59 }
  0x8f   :  { %v285_v60 = vpop.f32.mrf.mxu1 }
  0x96   :  { %v310_v13 = vpop.f32.mrf.mxu3 }
  0x97   :  { %v287_v61 = vpop.f32.mrf.mxu1 }
  0x9e   :  { %v236_v63 = vpop.f32.mrf.mxu0  ;;  %v312_v24 = vpop.f32.mrf.mxu3 }
  0x9f   :  { %v286_v0 = vadd.f32 %v285_v60, %v236_v63  ;;  %v290_v2 = vpop.f32.mrf.mxu1 }
  0xa1   :  { %v329_v3 = vmul.f32 %v748_v62, %v286_v0 }
  0xa3   :  { %v349_v4 = vadd.f32 %v753_v1, %v329_v3 }
  0xa5   :  { %v365_v5 = vmax.f32 %v349_v4, 0.0  ;;  %v757_v6 = vpop.f32.mrf.mxu2 }
  0xa6   :  { %v238_v7 = vpop.f32.mrf.mxu0  ;;  %v315_v41 = vpop.f32.mrf.mxu3 }
  0xa7   :  { %v381_v8 = vpack.c.bf16 %v365_v5, %v365_v5  ;;  %v288_v9 = vadd.f32 %v287_v61, %v238_v7  ;;  %v292_v10 = vpop.f32.mrf.mxu1 }
  0xa9   :  { %398 = vst.msk [vmem:[%s861_s4] sm:$0xf] %vm397_vm1, %v381_v8  ;;  %v330_v11 = vmul.f32 %v748_v62, %v288_v9 }
  0xab   :  { %v350_v12 = vadd.f32 %v753_v1, %v330_v11 }
  0xad   :  { %v366_v14 = vmax.f32 %v350_v12, 0.0  ;;  %v765_v15 = vpop.f32.mrf.mxu2 }
  0xae   :  { %v241_v16 = vpop.f32.mrf.mxu0  ;;  %v317_v58 = vpop.f32.mrf.mxu3 }
  0xaf   :  { %v382_v17 = vpack.c.bf16 %v366_v14, %v366_v14  ;;  %v291_v18 = vadd.f32 %v290_v2, %v241_v16  ;;  %v295_v19 = vpop.f32.mrf.mxu1 }
  0xb1   :  { %399 = vst.msk [vmem:[%s861_s4 + $0x4] sm:$0xf] %vm397_vm1, %v382_v17  ;;  %v331_v20 = vmul.f32 %v748_v62, %v291_v18 }
  0xb3   :  { %v351_v21 = vadd.f32 %v753_v1, %v331_v20 }
  0xb5   :  { %v367_v22 = vmax.f32 %v351_v21, 0.0  ;;  %v261_v23 = vpop.f32.mrf.mxu2 }
  0xb6   :  { %v311_v25 = vadd.f32 %v310_v13, %v261_v23  ;;  %v243_v26 = vpop.f32.mrf.mxu0  ;;  %v320_v16 = vpop.f32.mrf.mxu3 }
  0xb7   :  { %v383_v27 = vpack.c.bf16 %v367_v22, %v367_v22  ;;  %v293_v28 = vadd.f32 %v292_v10, %v243_v26  ;;  %v297_v29 = vpop.f32.mrf.mxu1 }
  0xb8   :  { %v339_v30 = vmul.f32 %v748_v62, %v311_v25 }
  0xb9   :  { %400 = vst.msk [vmem:[%s861_s4 + $0x8] sm:$0xf] %vm397_vm1, %v383_v27  ;;  %v332_v31 = vmul.f32 %v748_v62, %v293_v28 }
  0xba   :  { %v359_v32 = vadd.f32 %v753_v1, %v339_v30 }
  0xbb   :  { %v352_v33 = vadd.f32 %v753_v1, %v332_v31 }
  0xbc   :  { %v375_v34 = vmax.f32 %v359_v32, 0.0 }
  0xbd   :  { %v368_v35 = vmax.f32 %v352_v33, 0.0  ;;  %v263_v36 = vpop.f32.mrf.mxu2 }
  0xbe   :  { %v391_v37 = vpack.c.bf16 %v375_v34, %v375_v34  ;;  %v313_v38 = vadd.f32 %v312_v24, %v263_v36  ;;  %v246_v39 = vpop.f32.mrf.mxu0  ;;  %v322_v36 = vpop.f32.mrf.mxu3 }
  0xbf   :  { %v384_v40 = vpack.c.bf16 %v368_v35, %v368_v35  ;;  %v296_v42 = vadd.f32 %v295_v19, %v246_v39  ;;  %v300_v43 = vpop.f32.mrf.mxu1 }
  0xc0   :  { %408 = vst.msk [vmem:[%s861_s4 + $0x28] sm:$0xf] %vm397_vm1, %v391_v37  ;;  %v340_v44 = vmul.f32 %v748_v62, %v313_v38 }
  0xc1   :  { %401 = vst.msk [vmem:[%s861_s4 + $0xc] sm:$0xf] %vm397_vm1, %v384_v40  ;;  %v333_v45 = vmul.f32 %v748_v62, %v296_v42 }
  0xc2   :  { %v360_v46 = vadd.f32 %v753_v1, %v340_v44 }
  0xc3   :  { %v353_v47 = vadd.f32 %v753_v1, %v333_v45 }
  0xc4   :  { %v376_v48 = vmax.f32 %v360_v46, 0.0 }
  0xc5   :  { %v369_v49 = vmax.f32 %v353_v47, 0.0  ;;  %v266_v50 = vpop.f32.mrf.mxu2 }
  0xc6   :  { %v392_v51 = vpack.c.bf16 %v376_v48, %v376_v48  ;;  %v316_v52 = vadd.f32 %v315_v41, %v266_v50  ;;  %v248_v53 = vpop.f32.mrf.mxu0 }
  0xc7   :  { %v385_v54 = vpack.c.bf16 %v369_v49, %v369_v49  ;;  %v298_v55 = vadd.f32 %v297_v29, %v248_v53  ;;  %v302_v56 = vpop.f32.mrf.mxu1 }
  0xc8   :  { %409 = vst.msk [vmem:[%s861_s4 + $0x2c] sm:$0xf] %vm397_vm1, %v392_v51  ;;  %v341_v57 = vmul.f32 %v748_v62, %v316_v52 }
  0xc9   :  { %402 = vst.msk [vmem:[%s861_s4 + $0x10] sm:$0xf] %vm397_vm1, %v385_v54  ;;  %v334_v59 = vmul.f32 %v748_v62, %v298_v55 }
  0xca   :  { %v361_v60 = vadd.f32 %v753_v1, %v341_v57 }
  0xcb   :  { %v354_v61 = vadd.f32 %v753_v1, %v334_v59 }
  0xcc   :  { %v377_v63 = vmax.f32 %v361_v60, 0.0 }
  0xcd   :  { %v370_v0 = vmax.f32 %v354_v61, 0.0  ;;  %v268_v2 = vpop.f32.mrf.mxu2 }
  0xce   :  { %v393_v3 = vpack.c.bf16 %v377_v63, %v377_v63  ;;  %v318_v4 = vadd.f32 %v317_v58, %v268_v2  ;;  %v251_v5 = vpop.f32.mrf.mxu0 }
  0xcf   :  { %v386_v7 = vpack.c.bf16 %v370_v0, %v370_v0  ;;  %v301_v8 = vadd.f32 %v300_v43, %v251_v5  ;;  %v305_v9 = vpop.f32.mrf.mxu1 }
  0xd0   :  { %410 = vst.msk [vmem:[%s861_s4 + $0x30] sm:$0xf] %vm397_vm1, %v393_v3  ;;  %v342_v10 = vmul.f32 %v748_v62, %v318_v4  ;;  %v306_v11 = vadd.f32 %v305_v9, %v757_v6 }
  0xd1   :  { %403 = vst.msk [vmem:[%s861_s4 + $0x14] sm:$0xf] %vm397_vm1, %v386_v7  ;;  %v335_v12 = vmul.f32 %v748_v62, %v301_v8 }
  0xd2   :  { %v362_v13 = vadd.f32 %v753_v1, %v342_v10  ;;  %v337_v14 = vmul.f32 %v748_v62, %v306_v11 }
  0xd3   :  { %v355_v17 = vadd.f32 %v753_v1, %v335_v12 }
  0xd4   :  { %v378_v18 = vmax.f32 %v362_v13, 0.0  ;;  %v357_v19 = vadd.f32 %v753_v1, %v337_v14 }
  0xd5   :  { %v371_v20 = vmax.f32 %v355_v17, 0.0  ;;  %v271_v21 = vpop.f32.mrf.mxu2 }
  0xd6   :  { %v394_v6 = vpack.c.bf16 %v378_v18, %v378_v18  ;;  %v373_v22 = vmax.f32 %v357_v19, 0.0  ;;  %v321_v23 = vadd.f32 %v320_v16, %v271_v21  ;;  %v253_v24 = vpop.f32.mrf.mxu0 }
  0xd7   :  { %v387_v25 = vpack.c.bf16 %v371_v20, %v371_v20  ;;  %v303_v26 = vadd.f32 %v302_v56, %v253_v24  ;;  %v307_v27 = vpop.f32.mrf.mxu1 }
  0xd8   :  { %411 = vst.msk [vmem:[%s861_s4 + $0x34] sm:$0xf] %vm397_vm1, %v394_v6  ;;  %v389_v28 = vpack.c.bf16 %v373_v22, %v373_v22  ;;  %v343_v29 = vmul.f32 %v748_v62, %v321_v23  ;;  %v308_v30 = vadd.f32 %v307_v27, %v765_v15 }
  0xd9   :  { %404 = vst.msk [vmem:[%s861_s4 + $0x18] sm:$0xf] %vm397_vm1, %v387_v25  ;;  %v336_v31 = vmul.f32 %v748_v62, %v303_v26 }
  0xda   :  { %406 = vst.msk [vmem:[%s861_s4 + $0x20] sm:$0xf] %vm397_vm1, %v389_v28  ;;  %v363_v32 = vadd.f32 %v753_v1, %v343_v29  ;;  %v338_v33 = vmul.f32 %v748_v62, %v308_v30 }
  0xdb   :  { %v356_v34 = vadd.f32 %v753_v1, %v336_v31 }
  0xdc   :  { %v379_v35 = vmax.f32 %v363_v32, 0.0  ;;  %v358_v15 = vadd.f32 %v753_v1, %v338_v33 }
  0xdd   :  { %v372_v37 = vmax.f32 %v356_v34, 0.0  ;;  %v273_v38 = vpop.f32.mrf.mxu2 }
  0xde   :  { %v395_v39 = vpack.c.bf16 %v379_v35, %v379_v35  ;;  %v374_v40 = vmax.f32 %v358_v15, 0.0  ;;  %v323_v41 = vadd.f32 %v322_v36, %v273_v38 }
  0xdf   :  { %v388_v42 = vpack.c.bf16 %v372_v37, %v372_v37 }
  0xe0   :  { %412 = vst.msk [vmem:[%s861_s4 + $0x38] sm:$0xf] %vm397_vm1, %v395_v39  ;;  %v390_v43 = vpack.c.bf16 %v374_v40, %v374_v40  ;;  %v344_v44 = vmul.f32 %v748_v62, %v323_v41 }
  0xe1   :  { %405 = vst.msk [vmem:[%s861_s4 + $0x1c] sm:$0xf] %vm397_vm1, %v388_v42 }
  0xe2   :  { %407 = vst.msk [vmem:[%s861_s4 + $0x24] sm:$0xf] %vm397_vm1, %v390_v43  ;;  %v364_v45 = vadd.f32 %v753_v1, %v344_v44 }
  0xe4   :  { %v380_v46 = vmax.f32 %v364_v45, 0.0 }
  0xe6   :  { %v396_v47 = vpack.c.bf16 %v380_v46, %v380_v46 }
  0xe8   :  { %413 = vst.msk [vmem:[%s861_s4 + $0x3c] sm:$0xf] %vm397_vm1, %v396_v47 }

// kernel: _lambda_.60
= control target key start
LH: loop header
LB: loop body
LE: loop exit
PB: predicated region body
PF: predicated region fallthrough
CT: control target
= control target key end

     0   :  { %vm205_vm0 = vcmask 523264   ;;  %vm448_vm1 = vcmask 519168   ;;  %s976_s1 = inlined_call_operand.vmem [shape: bf16[192,64], index: 1, kind: input, shape index: {}]   ;;  %s977_s0 = inlined_call_operand.vmem [shape: bf16[128,192], index: 0, kind: input, shape index: {}]   ;;  %s978_s2 = inlined_call_operand.vmem [shape: f32[1,64], index: 2, kind: input, shape index: {}]   ;;  %s979_s3 = inlined_call_operand.vmem [shape: f32[1,64], index: 3, kind: input, shape index: {}]   ;;  %s980_s4 = inlined_call_operand.vmem [shape: bf16[128,64], index: 4, kind: input, shape index: {}]   ;;  %s981_s5 = inlined_call_operand.vmem [shape: bf16[128,64], index: 5, kind: output, shape index: {}]  }
   0x1   :  { %v612_v0 = vld [vmem:[%s976_s1 + $0x38] sm:$0xff]  ;;  %v611_v2 = vld [vmem:[%s976_s1 + $0x30] sm:$0xff]  ;;  %v610_v4 = vld [vmem:[%s976_s1 + $0x28] sm:$0xff] }
   0x2   :  { %v616_v1 = vld [vmem:[%s976_s1 + $0x58] sm:$0xff]  ;;  %230 = vmatpush.bf16.msra.mxu0 %v612_v0  ;;  %656 = vmatpush.bf16.msra.mxu2 %v612_v0  ;;  %v615_v3 = vld [vmem:[%s976_s1 + $0x50] sm:$0xff]  ;;  %v614_v5 = vld [vmem:[%s976_s1 + $0x48] sm:$0xff] }
   0x3   :  { %283 = vmatpush.bf16.msra.mxu1 %v616_v1  ;;  %664 = vmatpush.bf16.msra.mxu3 %v616_v1  ;;  %v609_v6 = vld [vmem:[%s976_s1 + $0x20] sm:$0xff]  ;;  %v473_v9 = vld [vmem:[%s977_s0 + $0x8] sm:$0xf0]  ;;  %v599_v10 = vld [vmem:[%s977_s0 + $0x54] sm:$0xf] }
   0x4   :  { %v613_v7 = vld [vmem:[%s976_s1 + $0x40] sm:$0xff]  ;;  %v513_v11 = vld [vmem:[%s977_s0 + $0x58] sm:$0xf0]  ;;  %v607_v15 = vld [vmem:[%s976_s1 + $0x10] sm:$0xff] }
   0x5   :  { %v589_v8 = vld [vmem:[%s977_s0 + $0x4] sm:$0xf]  ;;  %v608_v13 = vld [vmem:[%s976_s1 + $0x18] sm:$0xff]  ;;  %v516_v14 = vor.u32 %v599_v10, %v513_v11  ;;  %v606_v16 = vld [vmem:[%s976_s1 + $0x8] sm:$0xff] }
   0x6   :  { %231 = vmatpush.bf16.msra.mxu0 %v611_v2  ;;  %657 = vmatpush.bf16.msra.mxu2 %v611_v2  ;;  %v476_v12 = vor.u32 %v589_v8, %v473_v9  ;;  %v605_v17 = vld [vmem:[%s976_s1] sm:$0xff]  ;;  %v590_v19 = vld [vmem:[%s977_s0 + $0x4] sm:$0xf0]  ;;  %v591_v22 = vld [vmem:[%s977_s0 + $0x14] sm:$0xf] }
   0x7   :  { %284 = vmatpush.bf16.msra.mxu1 %v615_v3  ;;  %665 = vmatpush.bf16.msra.mxu3 %v615_v3  ;;  %v471_v18 = vld [vmem:[%s977_s0] sm:$0xf]  ;;  %v598_v21 = vld [vmem:[%s977_s0 + $0x44] sm:$0xf0]  ;;  %v481_v23 = vld [vmem:[%s977_s0 + $0x18] sm:$0xf0] }
   0x8   :  { %v503_v20 = vld [vmem:[%s977_s0 + $0x40] sm:$0xf]  ;;  %v601_v24 = vld [vmem:[%s977_s0 + $0x64] sm:$0xf]  ;;  %v521_v25 = vld [vmem:[%s977_s0 + $0x68] sm:$0xf0]  ;;  %v472_v26 = vor.u32 %v590_v19, %v471_v18  ;;  %v484_v28 = vor.u32 %v591_v22, %v481_v23 }
   0x9   :  { %v504_v27 = vor.u32 %v598_v21, %v503_v20  ;;  %v524_v29 = vor.u32 %v601_v24, %v521_v25  ;;  %v479_v30 = vld [vmem:[%s977_s0 + $0x10] sm:$0xf]  ;;  %v592_v31 = vld [vmem:[%s977_s0 + $0x14] sm:$0xf0]  ;;  %v593_v34 = vld [vmem:[%s977_s0 + $0x24] sm:$0xf] }
   0xa   :  { %232 = vmatpush.bf16.msra.mxu0 %v610_v4  ;;  %658 = vmatpush.bf16.msra.mxu2 %v610_v4  ;;  %v511_v32 = vld [vmem:[%s977_s0 + $0x50] sm:$0xf]  ;;  %v600_v33 = vld [vmem:[%s977_s0 + $0x54] sm:$0xf0]  ;;  %v489_v35 = vld [vmem:[%s977_s0 + $0x28] sm:$0xf0]  ;;  %v480_v38 = vor.u32 %v592_v31, %v479_v30 }
   0xb   :  { %285 = vmatpush.bf16.msra.mxu1 %v614_v5  ;;  %666 = vmatpush.bf16.msra.mxu3 %v614_v5  ;;  %v603_v36 = vld [vmem:[%s977_s0 + $0x74] sm:$0xf]  ;;  %v529_v37 = vld [vmem:[%s977_s0 + $0x78] sm:$0xf0]  ;;  %v512_v39 = vor.u32 %v600_v33, %v511_v32  ;;  %v492_v40 = vor.u32 %v593_v34, %v489_v35  ;;  %v487_v42 = vld [vmem:[%s977_s0 + $0x20] sm:$0xf] }
   0xc   :  { %v532_v41 = vor.u32 %v603_v36, %v529_v37  ;;  %v594_v43 = vld [vmem:[%s977_s0 + $0x24] sm:$0xf0]  ;;  %v519_v44 = vld [vmem:[%s977_s0 + $0x60] sm:$0xf]  ;;  %v595_v46 = vld [vmem:[%s977_s0 + $0x34] sm:$0xf] }
   0xd   :  { %v602_v45 = vld [vmem:[%s977_s0 + $0x64] sm:$0xf0]  ;;  %v497_v47 = vld [vmem:[%s977_s0 + $0x38] sm:$0xf0]  ;;  %v488_v48 = vor.u32 %v594_v43, %v487_v42  ;;  %v495_v51 = vld [vmem:[%s977_s0 + $0x30] sm:$0xf] }
   0xe   :  { %233 = vmatpush.bf16.msra.mxu0 %v609_v6  ;;  %659 = vmatpush.bf16.msra.mxu2 %v609_v6  ;;  %v520_v49 = vor.u32 %v602_v45, %v519_v44  ;;  %v500_v50 = vor.u32 %v595_v46, %v497_v47  ;;  %v596_v52 = vld [vmem:[%s977_s0 + $0x34] sm:$0xf0]  ;;  %v527_v53 = vld [vmem:[%s977_s0 + $0x70] sm:$0xf]  ;;  %v597_v55 = vld [vmem:[%s977_s0 + $0x44] sm:$0xf] }
   0xf   :  { %286 = vmatpush.bf16.msra.mxu1 %v613_v7  ;;  %667 = vmatpush.bf16.msra.mxu3 %v613_v7  ;;  %v604_v54 = vld [vmem:[%s977_s0 + $0x74] sm:$0xf0]  ;;  %v505_v56 = vld [vmem:[%s977_s0 + $0x48] sm:$0xf0]  ;;  %v496_v57 = vor.u32 %v596_v52, %v495_v51  ;;  %v843_v62 = vld [vmem:[%s979_s3] ss:$0 sm:$0xff] }
  0x10   :  { %v528_v58 = vor.u32 %v604_v54, %v527_v53  ;;  %v508_v59 = vor.u32 %v597_v55, %v505_v56  ;;  %v618_v0 = vld [vmem:[%s980_s4] sm:$0xff]   ;;  %v649_v21 = vld [vmem:[%s980_s4 + $0x8] sm:$0xff]   ;;  %v650_v51 = vld [vmem:[%s980_s4 + $0x10] sm:$0xff]  }
  0x11   :  { %v851_v2 = vld [vmem:[%s978_s2] ss:$0 sm:$0xff]  ;;  %v619_v5 = vunpack.c.l.bf16 %v618_v0  ;;  %v653_v31 = vld [vmem:[%s980_s4 + $0x28] sm:$0xff]   ;;  %v624_v42 = vunpack.c.h.bf16 %v649_v21 }
  0x12   :  { %581 = vmatmul.msk.bf16.vlgmr.msra.gmra.mxu1 %vm205_vm0, %v476_v12  ;;  %234 = vmatpush.bf16.msra.mxu0 %v608_v13 }
  0x13   :  { %660 = vmatpush.bf16.msra.mxu2 %v608_v13  ;;  %586 = vmatmul.msk.bf16.vlgmr.msra.gmra.mxu3 %vm205_vm0, %v516_v14 }
  0x16   :  { %235 = vmatpush.bf16.msra.mxu0 %v607_v15 }
  0x17   :  { %661 = vmatpush.bf16.msra.mxu2 %v607_v15  ;;  %v620_v15 = vunpack.c.h.bf16 %v618_v0 }
  0x1a   :  { %236 = vmatpush.bf16.msra.mxu0 %v606_v16 }
  0x1b   :  { %662 = vmatpush.bf16.msra.mxu2 %v606_v16 }
  0x1e   :  { %237 = vmatpush.bf16.msra.mxu0 %v605_v17 }
  0x1f   :  { %663 = vmatpush.bf16.msra.mxu2 %v605_v17 }
  0x21   :  { %238 = vmatmul.bf16.vlgmr.msra.gmra.mxu0 %v472_v26 }
  0x22   :  { %258 = vmatmul.bf16.vlgmr.msra.gmra.mxu2 %v504_v27  ;;  %582 = vmatmul.msk.bf16.gmra.mxu1 %vm205_vm0, %v484_v28  ;;  %v623_v27 = vunpack.c.l.bf16 %v649_v21 }
  0x23   :  { %587 = vmatmul.msk.bf16.gmra.mxu3 %vm205_vm0, %v524_v29 }
  0x31   :  { %243 = vmatmul.bf16.gmra.mxu0 %v480_v38 }
  0x32   :  { %263 = vmatmul.bf16.gmra.mxu2 %v512_v39  ;;  %583 = vmatmul.msk.bf16.gmra.mxu1 %vm205_vm0, %v492_v40  ;;  %v639_v39 = vunpack.c.l.bf16 %v653_v31 }
  0x33   :  { %588 = vmatmul.msk.bf16.gmra.mxu3 %vm205_vm0, %v532_v41 }
  0x41   :  { %248 = vmatmul.bf16.gmra.mxu0 %v488_v48 }
  0x42   :  { %268 = vmatmul.bf16.gmra.mxu2 %v520_v49  ;;  %584 = vmatmul.msk.bf16.gmra.mxu1 %vm205_vm0, %v500_v50 }
  0x51   :  { %253 = vmatmul.bf16.gmra.mxu0 %v496_v57 }
  0x52   :  { %273 = vmatmul.bf16.gmra.mxu2 %v528_v58  ;;  %585 = vmatmul.msk.bf16.gmra.mxu1 %vm205_vm0, %v508_v59  ;;  %v640_v58 = vunpack.c.h.bf16 %v653_v31 }
  0x8f   :  { %v288_v60 = vpop.f32.mrf.mxu1 }
  0x96   :  { %v313_v17 = vpop.f32.mrf.mxu3 }
  0x97   :  { %v290_v61 = vpop.f32.mrf.mxu1 }
  0x9e   :  { %v239_v63 = vpop.f32.mrf.mxu0  ;;  %v315_v32 = vpop.f32.mrf.mxu3 }
  0x9f   :  { %v289_v1 = vadd.f32 %v288_v60, %v239_v63  ;;  %v293_v3 = vpop.f32.mrf.mxu1 }
  0xa1   :  { %v332_v4 = vmul.f32 %v843_v62, %v289_v1 }
  0xa3   :  { %v352_v6 = vadd.f32 %v851_v2, %v332_v4 }
  0xa5   :  { %v400_v7 = vadd.f32 %v619_v5, %v352_v6  ;;  %v855_v8 = vpop.f32.mrf.mxu2  ;;  %v654_v5 = vld [vmem:[%s980_s4 + $0x30] sm:$0xff]  }
  0xa6   :  { %v241_v9 = vpop.f32.mrf.mxu0  ;;  %v318_v53 = vpop.f32.mrf.mxu3 }
  0xa7   :  { %v416_v10 = vmax.f32 %v400_v7, 0.0  ;;  %v291_v11 = vadd.f32 %v290_v61, %v241_v9  ;;  %v295_v12 = vpop.f32.mrf.mxu1  ;;  %v627_v61 = vunpack.c.l.bf16 %v650_v51 }
  0xa9   :  { %v432_v13 = vpack.c.bf16 %v416_v10, %v416_v10  ;;  %v333_v14 = vmul.f32 %v843_v62, %v291_v11 }
  0xab   :  { %449 = vst.msk [vmem:[%s981_s5] sm:$0xf] %vm448_vm1, %v432_v13  ;;  %v353_v16 = vadd.f32 %v851_v2, %v333_v14 }
  0xad   :  { %v401_v18 = vadd.f32 %v620_v15, %v353_v16  ;;  %v863_v19 = vpop.f32.mrf.mxu2  ;;  %v643_v15 = vunpack.c.l.bf16 %v654_v5 }
  0xae   :  { %v244_v20 = vpop.f32.mrf.mxu0 }
  0xaf   :  { %v417_v22 = vmax.f32 %v401_v18, 0.0  ;;  %v294_v23 = vadd.f32 %v293_v3, %v244_v20  ;;  %v298_v24 = vpop.f32.mrf.mxu1  ;;  %v628_v20 = vunpack.c.h.bf16 %v650_v51 }
  0xb1   :  { %v433_v25 = vpack.c.bf16 %v417_v22, %v417_v22  ;;  %v334_v26 = vmul.f32 %v843_v62, %v294_v23 }
  0xb3   :  { %450 = vst.msk [vmem:[%s981_s5 + $0x4] sm:$0xf] %vm448_vm1, %v433_v25  ;;  %v354_v28 = vadd.f32 %v851_v2, %v334_v26 }
  0xb5   :  { %v402_v29 = vadd.f32 %v623_v27, %v354_v28  ;;  %v264_v30 = vpop.f32.mrf.mxu2 }
  0xb6   :  { %v314_v33 = vadd.f32 %v313_v17, %v264_v30  ;;  %v246_v34 = vpop.f32.mrf.mxu0  ;;  %v320_v17 = vpop.f32.mrf.mxu3 }
  0xb7   :  { %v418_v35 = vmax.f32 %v402_v29, 0.0  ;;  %v296_v36 = vadd.f32 %v295_v12, %v246_v34  ;;  %v300_v37 = vpop.f32.mrf.mxu1  ;;  %v651_v29 = vld [vmem:[%s980_s4 + $0x18] sm:$0xff]  }
  0xb8   :  { %v342_v38 = vmul.f32 %v843_v62, %v314_v33  ;;  %v652_v33 = vld [vmem:[%s980_s4 + $0x20] sm:$0xff]  }
  0xb9   :  { %v434_v40 = vpack.c.bf16 %v418_v35, %v418_v35  ;;  %v335_v41 = vmul.f32 %v843_v62, %v296_v36  ;;  %v644_v36 = vunpack.c.h.bf16 %v654_v5 }
  0xba   :  { %v362_v43 = vadd.f32 %v851_v2, %v342_v38 }
  0xbb   :  { %451 = vst.msk [vmem:[%s981_s5 + $0x8] sm:$0xf] %vm448_vm1, %v434_v40  ;;  %v355_v44 = vadd.f32 %v851_v2, %v335_v41  ;;  %v631_v40 = vunpack.c.l.bf16 %v651_v29 }
  0xbc   :  { %v410_v45 = vadd.f32 %v639_v39, %v362_v43  ;;  %v635_v43 = vunpack.c.l.bf16 %v652_v33 }
  0xbd   :  { %v403_v46 = vadd.f32 %v624_v42, %v355_v44  ;;  %v266_v47 = vpop.f32.mrf.mxu2 }
  0xbe   :  { %v426_v48 = vmax.f32 %v410_v45, 0.0  ;;  %v316_v49 = vadd.f32 %v315_v32, %v266_v47  ;;  %v249_v50 = vpop.f32.mrf.mxu0  ;;  %v655_v47 = vld [vmem:[%s980_s4 + $0x38] sm:$0xff]  }
  0xbf   :  { %v419_v52 = vmax.f32 %v403_v46, 0.0  ;;  %v299_v54 = vadd.f32 %v298_v24, %v249_v50  ;;  %v303_v55 = vpop.f32.mrf.mxu1 }
  0xc0   :  { %v442_v56 = vpack.c.bf16 %v426_v48, %v426_v48  ;;  %v343_v57 = vmul.f32 %v843_v62, %v316_v49 }
  0xc1   :  { %v435_v59 = vpack.c.bf16 %v419_v52, %v419_v52  ;;  %v336_v60 = vmul.f32 %v843_v62, %v299_v54 }
  0xc2   :  { %459 = vst.msk [vmem:[%s981_s5 + $0x28] sm:$0xf] %vm448_vm1, %v442_v56  ;;  %v363_v63 = vadd.f32 %v851_v2, %v343_v57 }
  0xc3   :  { %452 = vst.msk [vmem:[%s981_s5 + $0xc] sm:$0xf] %vm448_vm1, %v435_v59  ;;  %v356_v0 = vadd.f32 %v851_v2, %v336_v60 }
  0xc4   :  { %v411_v1 = vadd.f32 %v640_v58, %v363_v63 }
  0xc5   :  { %v404_v3 = vadd.f32 %v627_v61, %v356_v0  ;;  %v269_v4 = vpop.f32.mrf.mxu2 }
  0xc6   :  { %v427_v6 = vmax.f32 %v411_v1, 0.0  ;;  %v319_v7 = vadd.f32 %v318_v53, %v269_v4  ;;  %v251_v9 = vpop.f32.mrf.mxu0  ;;  %v632_v1 = vunpack.c.h.bf16 %v651_v29 }
  0xc7   :  { %v420_v10 = vmax.f32 %v404_v3, 0.0  ;;  %v301_v11 = vadd.f32 %v300_v37, %v251_v9  ;;  %v305_v12 = vpop.f32.mrf.mxu1 }
  0xc8   :  { %v443_v13 = vpack.c.bf16 %v427_v6, %v427_v6  ;;  %v344_v14 = vmul.f32 %v843_v62, %v319_v7  ;;  %v636_v6 = vunpack.c.h.bf16 %v652_v33 }
  0xc9   :  { %v436_v16 = vpack.c.bf16 %v420_v10, %v420_v10  ;;  %v337_v18 = vmul.f32 %v843_v62, %v301_v11 }
  0xca   :  { %460 = vst.msk [vmem:[%s981_s5 + $0x2c] sm:$0xf] %vm448_vm1, %v443_v13  ;;  %v364_v21 = vadd.f32 %v851_v2, %v344_v14 }
  0xcb   :  { %453 = vst.msk [vmem:[%s981_s5 + $0x10] sm:$0xf] %vm448_vm1, %v436_v16  ;;  %v357_v22 = vadd.f32 %v851_v2, %v337_v18 }
  0xcc   :  { %v412_v23 = vadd.f32 %v643_v15, %v364_v21  ;;  %v648_v21 = vunpack.c.h.bf16 %v655_v47 }
  0xcd   :  { %v405_v24 = vadd.f32 %v628_v20, %v357_v22  ;;  %v271_v25 = vpop.f32.mrf.mxu2 }
  0xce   :  { %v428_v26 = vmax.f32 %v412_v23, 0.0  ;;  %v321_v27 = vadd.f32 %v320_v17, %v271_v25  ;;  %v254_v28 = vpop.f32.mrf.mxu0 }
  0xcf   :  { %v421_v30 = vmax.f32 %v405_v24, 0.0  ;;  %v304_v31 = vadd.f32 %v303_v55, %v254_v28  ;;  %v308_v32 = vpop.f32.mrf.mxu1  ;;  %v647_v55 = vunpack.c.l.bf16 %v655_v47 }
  0xd0   :  { %v444_v34 = vpack.c.bf16 %v428_v26, %v428_v26  ;;  %v345_v35 = vmul.f32 %v843_v62, %v321_v27  ;;  %v309_v37 = vadd.f32 %v308_v32, %v855_v8  ;;  %v323_v8 = vpop.f32.mrf.mxu3 }
  0xd1   :  { %v437_v38 = vpack.c.bf16 %v421_v30, %v421_v30  ;;  %v338_v39 = vmul.f32 %v843_v62, %v304_v31 }
  0xd2   :  { %461 = vst.msk [vmem:[%s981_s5 + $0x30] sm:$0xf] %vm448_vm1, %v444_v34  ;;  %v365_v41 = vadd.f32 %v851_v2, %v345_v35  ;;  %v340_v42 = vmul.f32 %v843_v62, %v309_v37 }
  0xd3   :  { %454 = vst.msk [vmem:[%s981_s5 + $0x14] sm:$0xf] %vm448_vm1, %v437_v38  ;;  %v358_v44 = vadd.f32 %v851_v2, %v338_v39 }
  0xd4   :  { %v413_v45 = vadd.f32 %v644_v36, %v365_v41  ;;  %v360_v46 = vadd.f32 %v851_v2, %v340_v42 }
  0xd5   :  { %v406_v48 = vadd.f32 %v631_v40, %v358_v44  ;;  %v274_v49 = vpop.f32.mrf.mxu2 }
  0xd6   :  { %v429_v50 = vmax.f32 %v413_v45, 0.0  ;;  %v408_v51 = vadd.f32 %v635_v43, %v360_v46  ;;  %v324_v52 = vadd.f32 %v323_v8, %v274_v49  ;;  %v256_v53 = vpop.f32.mrf.mxu0 }
  0xd7   :  { %v422_v54 = vmax.f32 %v406_v48, 0.0  ;;  %v306_v56 = vadd.f32 %v305_v12, %v256_v53  ;;  %v310_v57 = vpop.f32.mrf.mxu1 }
  0xd8   :  { %v445_v58 = vpack.c.bf16 %v429_v50, %v429_v50  ;;  %v424_v59 = vmax.f32 %v408_v51, 0.0  ;;  %v346_v60 = vmul.f32 %v843_v62, %v324_v52  ;;  %v311_v61 = vadd.f32 %v310_v57, %v863_v19  ;;  %v325_v10 = vpop.f32.mrf.mxu3 }
  0xd9   :  { %v438_v63 = vpack.c.bf16 %v422_v54, %v422_v54  ;;  %v339_v0 = vmul.f32 %v843_v62, %v306_v56 }
  0xda   :  { %462 = vst.msk [vmem:[%s981_s5 + $0x34] sm:$0xf] %vm448_vm1, %v445_v58  ;;  %v440_v3 = vpack.c.bf16 %v424_v59, %v424_v59  ;;  %v366_v4 = vadd.f32 %v851_v2, %v346_v60  ;;  %v341_v5 = vmul.f32 %v843_v62, %v311_v61 }
  0xdb   :  { %455 = vst.msk [vmem:[%s981_s5 + $0x18] sm:$0xf] %vm448_vm1, %v438_v63  ;;  %v359_v19 = vadd.f32 %v851_v2, %v339_v0 }
  0xdc   :  { %457 = vst.msk [vmem:[%s981_s5 + $0x20] sm:$0xf] %vm448_vm1, %v440_v3  ;;  %v414_v7 = vadd.f32 %v647_v55, %v366_v4  ;;  %v361_v9 = vadd.f32 %v851_v2, %v341_v5 }
  0xdd   :  { %v407_v11 = vadd.f32 %v632_v1, %v359_v19  ;;  %v276_v12 = vpop.f32.mrf.mxu2 }
  0xde   :  { %v430_v13 = vmax.f32 %v414_v7, 0.0  ;;  %v409_v14 = vadd.f32 %v636_v6, %v361_v9  ;;  %v326_v15 = vadd.f32 %v325_v10, %v276_v12 }
  0xdf   :  { %v423_v16 = vmax.f32 %v407_v11, 0.0 }
  0xe0   :  { %v446_v17 = vpack.c.bf16 %v430_v13, %v430_v13  ;;  %v425_v18 = vmax.f32 %v409_v14, 0.0  ;;  %v347_v20 = vmul.f32 %v843_v62, %v326_v15 }
  0xe1   :  { %v439_v22 = vpack.c.bf16 %v423_v16, %v423_v16 }
  0xe2   :  { %463 = vst.msk [vmem:[%s981_s5 + $0x38] sm:$0xf] %vm448_vm1, %v446_v17  ;;  %v441_v23 = vpack.c.bf16 %v425_v18, %v425_v18  ;;  %v367_v24 = vadd.f32 %v851_v2, %v347_v20 }
  0xe3   :  { %456 = vst.msk [vmem:[%s981_s5 + $0x1c] sm:$0xf] %vm448_vm1, %v439_v22 }
  0xe4   :  { %458 = vst.msk [vmem:[%s981_s5 + $0x24] sm:$0xf] %vm448_vm1, %v441_v23  ;;  %v415_v62 = vadd.f32 %v648_v21, %v367_v24 }
  0xe6   :  { %v431_v25 = vmax.f32 %v415_v62, 0.0 }
  0xe8   :  { %v447_v26 = vpack.c.bf16 %v431_v25, %v431_v25 }
  0xea   :  { %464 = vst.msk [vmem:[%s981_s5 + $0x3c] sm:$0xf] %vm448_vm1, %v447_v26 }

// kernel: _lambda_.78
= control target key start
LH: loop header
LB: loop body
LE: loop exit
PB: predicated region body
PF: predicated region fallthrough
CT: control target
= control target key end

     0   :  { %s630_s1 = inlined_call_operand.vmem [shape: bf16[384,128], index: 1, kind: input, shape index: {}]   ;;  %s631_s2 = inlined_call_operand.vmem [shape: f32[1,128], index: 2, kind: input, shape index: {}]   ;;  %s632_s0 = inlined_call_operand.vmem [shape: bf16[32,384], index: 0, kind: input, shape index: {}]   ;;  %s633_s3 = inlined_call_operand.vmem [shape: bf16[32,128], index: 3, kind: output, shape index: {}]  }
   0x1   :  { %v456_v0 = vld [vmem:[%s630_s1 + $0x38] sm:$0xff]  ;;  %v455_v3 = vld [vmem:[%s630_s1 + $0x30] sm:$0xff]  ;;  %v454_v6 = vld [vmem:[%s630_s1 + $0x28] sm:$0xff] }
   0x2   :  { %v464_v1 = vld [vmem:[%s630_s1 + $0x78] sm:$0xff]  ;;  %250 = vmatpush.bf16.msra.mxu0 %v456_v0  ;;  %v463_v4 = vld [vmem:[%s630_s1 + $0x70] sm:$0xff]  ;;  %484 = vmatpush.bf16.msra.mxu3 %v456_v0  ;;  %v462_v7 = vld [vmem:[%s630_s1 + $0x68] sm:$0xff] }
   0x3   :  { %v472_v2 = vld [vmem:[%s630_s1 + $0xb8] sm:$0xff]  ;;  %269 = vmatpush.bf16.msra.mxu1 %v464_v1  ;;  %v471_v5 = vld [vmem:[%s630_s1 + $0xb0] sm:$0xff]  ;;  %v470_v8 = vld [vmem:[%s630_s1 + $0xa8] sm:$0xff] }
   0x4   :  { %288 = vmatpush.bf16.msra.mxu2 %v472_v2  ;;  %v453_v9 = vld [vmem:[%s630_s1 + $0x20] sm:$0xff]  ;;  %v452_v12 = vld [vmem:[%s630_s1 + $0x18] sm:$0xff]  ;;  %v451_v15 = vld [vmem:[%s630_s1 + $0x10] sm:$0xff] }
   0x5   :  { %v461_v10 = vld [vmem:[%s630_s1 + $0x60] sm:$0xff]  ;;  %v460_v13 = vld [vmem:[%s630_s1 + $0x58] sm:$0xff]  ;;  %v459_v16 = vld [vmem:[%s630_s1 + $0x50] sm:$0xff] }
   0x6   :  { %251 = vmatpush.bf16.msra.mxu0 %v455_v3  ;;  %485 = vmatpush.bf16.msra.mxu3 %v455_v3  ;;  %v469_v11 = vld [vmem:[%s630_s1 + $0xa0] sm:$0xff]  ;;  %v468_v14 = vld [vmem:[%s630_s1 + $0x98] sm:$0xff]  ;;  %v467_v17 = vld [vmem:[%s630_s1 + $0x90] sm:$0xff] }
   0x7   :  { %270 = vmatpush.bf16.msra.mxu1 %v463_v4  ;;  %v450_v18 = vld [vmem:[%s630_s1 + $0x8] sm:$0xff]  ;;  %v449_v21 = vld [vmem:[%s630_s1] sm:$0xff]  ;;  %v327_v27 = vld [vmem:[%s632_s0 + $0xc] sm:$0xf0] }
   0x8   :  { %289 = vmatpush.bf16.msra.mxu2 %v471_v5  ;;  %v458_v19 = vld [vmem:[%s630_s1 + $0x48] sm:$0xff]  ;;  %v457_v22 = vld [vmem:[%s630_s1 + $0x40] sm:$0xff]  ;;  %v445_v29 = vld [vmem:[%s632_s0 + $0x10] sm:$0xf0] }
   0x9   :  { %v466_v20 = vld [vmem:[%s630_s1 + $0x88] sm:$0xff]  ;;  %v465_v23 = vld [vmem:[%s630_s1 + $0x80] sm:$0xff]  ;;  %v337_v30 = vld [vmem:[%s632_s0 + $0x18] sm:$0xf] }
   0xa   :  { %252 = vmatpush.bf16.msra.mxu0 %v454_v6  ;;  %486 = vmatpush.bf16.msra.mxu3 %v454_v6  ;;  %v325_v24 = vld [vmem:[%s632_s0] sm:$0xf]  ;;  %v444_v25 = vld [vmem:[%s632_s0 + $0x8] sm:$0xf0]  ;;  %v443_v26 = vld [vmem:[%s632_s0 + $0x4] sm:$0xf] }
   0xb   :  { %271 = vmatpush.bf16.msra.mxu1 %v462_v7  ;;  %v333_v28 = vld [vmem:[%s632_s0 + $0x8] sm:$0xf]  ;;  %v447_v31 = vld [vmem:[%s632_s0 + $0x20] sm:$0xf0]  ;;  %v326_v32 = vor.u32 %v444_v25, %v325_v24  ;;  %v330_v33 = vor.u32 %v443_v26, %v327_v27  ;;  %v446_v36 = vld [vmem:[%s632_s0 + $0x1c] sm:$0xf] }
   0xc   :  { %290 = vmatpush.bf16.msra.mxu2 %v470_v8  ;;  %v334_v34 = vor.u32 %v445_v29, %v333_v28  ;;  %v338_v35 = vor.u32 %v447_v31, %v337_v30  ;;  %v339_v37 = vld [vmem:[%s632_s0 + $0x24] sm:$0xf0]  ;;  %v345_v38 = vld [vmem:[%s632_s0 + $0x20] sm:$0xf]  ;;  %v448_v39 = vld [vmem:[%s632_s0 + $0x28] sm:$0xf0] }
   0xd   :  { %v342_v40 = vor.u32 %v446_v36, %v339_v37  ;;  %v346_v41 = vor.u32 %v448_v39, %v345_v38  ;;  %v492_v44 = vld [vmem:[%s631_s2] ss:$0 sm:$0xff] }
   0xe   :  { %253 = vmatpush.bf16.msra.mxu0 %v453_v9  ;;  %487 = vmatpush.bf16.msra.mxu3 %v453_v9 }
   0xf   :  { %272 = vmatpush.bf16.msra.mxu1 %v461_v10 }
  0x10   :  { %291 = vmatpush.bf16.msra.mxu2 %v469_v11 }
  0x12   :  { %254 = vmatpush.bf16.msra.mxu0 %v452_v12  ;;  %488 = vmatpush.bf16.msra.mxu3 %v452_v12 }
  0x13   :  { %273 = vmatpush.bf16.msra.mxu1 %v460_v13 }
  0x14   :  { %292 = vmatpush.bf16.msra.mxu2 %v468_v14 }
  0x16   :  { %255 = vmatpush.bf16.msra.mxu0 %v451_v15  ;;  %489 = vmatpush.bf16.msra.mxu3 %v451_v15 }
  0x17   :  { %274 = vmatpush.bf16.msra.mxu1 %v459_v16 }
  0x18   :  { %293 = vmatpush.bf16.msra.mxu2 %v467_v17 }
  0x1a   :  { %256 = vmatpush.bf16.msra.mxu0 %v450_v18  ;;  %490 = vmatpush.bf16.msra.mxu3 %v450_v18 }
  0x1b   :  { %275 = vmatpush.bf16.msra.mxu1 %v458_v19 }
  0x1c   :  { %294 = vmatpush.bf16.msra.mxu2 %v466_v20 }
  0x1e   :  { %257 = vmatpush.bf16.msra.mxu0 %v449_v21  ;;  %491 = vmatpush.bf16.msra.mxu3 %v449_v21 }
  0x1f   :  { %276 = vmatpush.bf16.msra.mxu1 %v457_v22 }
  0x20   :  { %295 = vmatpush.bf16.msra.mxu2 %v465_v23 }
  0x21   :  { %258 = vmatmul.bf16.vlgmr.msra.gmra.mxu0 %v326_v32  ;;  %263 = vmatmul.bf16.vlgmr.msra.gmra.mxu3 %v338_v35 }
  0x22   :  { %277 = vmatmul.bf16.vlgmr.msra.gmra.mxu1 %v330_v33 }
  0x23   :  { %296 = vmatmul.bf16.vlgmr.msra.gmra.mxu2 %v334_v34 }
  0x32   :  { %282 = vmatmul.bf16.gmra.mxu1 %v342_v40 }
  0x33   :  { %301 = vmatmul.bf16.gmra.mxu2 %v346_v41 }
  0x9e   :  { %v259_v42 = vpop.f32.mrf.mxu0 }
  0x9f   :  { %v278_v43 = vpop.f32.mrf.mxu1  ;;  %v260_v45 = vadd.f32 %v492_v44, %v259_v42 }
  0xa1   :  { %v279_v49 = vadd.f32 %v278_v43, %v260_v45 }
  0xa4   :  { %v264_v53 = vpop.f32.mrf.mxu3 }
  0xa5   :  { %v265_v60 = vadd.f32 %v492_v44, %v264_v53 }
  0xa6   :  { %v297_v46 = vpop.f32.mrf.mxu2  ;;  %v261_v47 = vpop.f32.mrf.mxu0 }
  0xa7   :  { %v280_v48 = vpop.f32.mrf.mxu1  ;;  %v262_v50 = vadd.f32 %v492_v44, %v261_v47  ;;  %v298_v51 = vadd.f32 %v297_v46, %v279_v49 }
  0xa9   :  { %v281_v52 = vadd.f32 %v280_v48, %v262_v50  ;;  %v307_v57 = vmax.f32 %v298_v51, 0.0 }
  0xac   :  { %v266_v62 = vpop.f32.mrf.mxu3 }
  0xad   :  { %v267_v1 = vadd.f32 %v492_v44, %v266_v62 }
  0xae   :  { %v299_v54 = vpop.f32.mrf.mxu2 }
  0xaf   :  { %v300_v55 = vadd.f32 %v299_v54, %v281_v52  ;;  %v283_v56 = vpop.f32.mrf.mxu1 }
  0xb0   :  { %v284_v63 = vadd.f32 %v283_v56, %v265_v60 }
  0xb1   :  { %v308_v58 = vmax.f32 %v300_v55, 0.0 }
  0xb3   :  { %v476_v59 = vpack.c.bf16 %v308_v58, %v307_v57 }
  0xb5   :  { %477 = vst [vmem:[%s633_s3] sm:$0xff] %v476_v59  }
  0xb6   :  { %v302_v61 = vpop.f32.mrf.mxu2 }
  0xb7   :  { %v285_v0 = vpop.f32.mrf.mxu1  ;;  %v303_v2 = vadd.f32 %v302_v61, %v284_v63 }
  0xb8   :  { %v286_v3 = vadd.f32 %v285_v0, %v267_v1 }
  0xb9   :  { %v309_v6 = vmax.f32 %v303_v2, 0.0 }
  0xbe   :  { %v304_v4 = vpop.f32.mrf.mxu2 }
  0xbf   :  { %v305_v5 = vadd.f32 %v304_v4, %v286_v3 }
  0xc1   :  { %v310_v7 = vmax.f32 %v305_v5, 0.0 }
  0xc3   :  { %v481_v8 = vpack.c.bf16 %v310_v7, %v309_v6 }
  0xc5   :  { %483 = vst [vmem:[%s633_s3 + $0x8] sm:$0xff] %v481_v8  }

// kernel: _lambda_.79
= control target key start
LH: loop header
LB: loop body
LE: loop exit
PB: predicated region body
PF: predicated region fallthrough
CT: control target
= control target key end

     0   :  { %s654_s1 = inlined_call_operand.vmem [shape: bf16[384,128], index: 1, kind: input, shape index: {}]   ;;  %s655_s0 = inlined_call_operand.vmem [shape: bf16[32,384], index: 0, kind: input, shape index: {}]   ;;  %s656_s2 = inlined_call_operand.vmem [shape: f32[1,128], index: 2, kind: input, shape index: {}]   ;;  %s657_s3 = inlined_call_operand.vmem [shape: f32[1,128], index: 3, kind: input, shape index: {}]   ;;  %s658_s4 = inlined_call_operand.vmem [shape: bf16[32,128], index: 4, kind: output, shape index: {}]  }
   0x1   :  { %v471_v0 = vld [vmem:[%s654_s1 + $0x38] sm:$0xff]  ;;  %v470_v3 = vld [vmem:[%s654_s1 + $0x30] sm:$0xff]  ;;  %v469_v6 = vld [vmem:[%s654_s1 + $0x28] sm:$0xff] }
   0x2   :  { %v479_v1 = vld [vmem:[%s654_s1 + $0x78] sm:$0xff]  ;;  %249 = vmatpush.bf16.msra.mxu0 %v471_v0  ;;  %v478_v4 = vld [vmem:[%s654_s1 + $0x70] sm:$0xff]  ;;  %499 = vmatpush.bf16.msra.mxu3 %v471_v0  ;;  %v477_v7 = vld [vmem:[%s654_s1 + $0x68] sm:$0xff] }
   0x3   :  { %v487_v2 = vld [vmem:[%s654_s1 + $0xb8] sm:$0xff]  ;;  %268 = vmatpush.bf16.msra.mxu1 %v479_v1  ;;  %v486_v5 = vld [vmem:[%s654_s1 + $0xb0] sm:$0xff]  ;;  %v485_v8 = vld [vmem:[%s654_s1 + $0xa8] sm:$0xff] }
   0x4   :  { %287 = vmatpush.bf16.msra.mxu2 %v487_v2  ;;  %v468_v9 = vld [vmem:[%s654_s1 + $0x20] sm:$0xff]  ;;  %v467_v12 = vld [vmem:[%s654_s1 + $0x18] sm:$0xff]  ;;  %v466_v15 = vld [vmem:[%s654_s1 + $0x10] sm:$0xff] }
   0x5   :  { %v476_v10 = vld [vmem:[%s654_s1 + $0x60] sm:$0xff]  ;;  %v475_v13 = vld [vmem:[%s654_s1 + $0x58] sm:$0xff]  ;;  %v474_v16 = vld [vmem:[%s654_s1 + $0x50] sm:$0xff] }
   0x6   :  { %250 = vmatpush.bf16.msra.mxu0 %v470_v3  ;;  %500 = vmatpush.bf16.msra.mxu3 %v470_v3  ;;  %v484_v11 = vld [vmem:[%s654_s1 + $0xa0] sm:$0xff]  ;;  %v483_v14 = vld [vmem:[%s654_s1 + $0x98] sm:$0xff]  ;;  %v482_v17 = vld [vmem:[%s654_s1 + $0x90] sm:$0xff] }
   0x7   :  { %269 = vmatpush.bf16.msra.mxu1 %v478_v4  ;;  %v465_v18 = vld [vmem:[%s654_s1 + $0x8] sm:$0xff]  ;;  %v464_v21 = vld [vmem:[%s654_s1] sm:$0xff]  ;;  %v342_v27 = vld [vmem:[%s655_s0 + $0xc] sm:$0xf0] }
   0x8   :  { %288 = vmatpush.bf16.msra.mxu2 %v486_v5  ;;  %v473_v19 = vld [vmem:[%s654_s1 + $0x48] sm:$0xff]  ;;  %v472_v22 = vld [vmem:[%s654_s1 + $0x40] sm:$0xff]  ;;  %v460_v29 = vld [vmem:[%s655_s0 + $0x10] sm:$0xf0] }
   0x9   :  { %v481_v20 = vld [vmem:[%s654_s1 + $0x88] sm:$0xff]  ;;  %v480_v23 = vld [vmem:[%s654_s1 + $0x80] sm:$0xff]  ;;  %v352_v30 = vld [vmem:[%s655_s0 + $0x18] sm:$0xf] }
   0xa   :  { %251 = vmatpush.bf16.msra.mxu0 %v469_v6  ;;  %501 = vmatpush.bf16.msra.mxu3 %v469_v6  ;;  %v340_v24 = vld [vmem:[%s655_s0] sm:$0xf]  ;;  %v459_v25 = vld [vmem:[%s655_s0 + $0x8] sm:$0xf0]  ;;  %v458_v26 = vld [vmem:[%s655_s0 + $0x4] sm:$0xf] }
   0xb   :  { %270 = vmatpush.bf16.msra.mxu1 %v477_v7  ;;  %v348_v28 = vld [vmem:[%s655_s0 + $0x8] sm:$0xf]  ;;  %v462_v31 = vld [vmem:[%s655_s0 + $0x20] sm:$0xf0]  ;;  %v341_v32 = vor.u32 %v459_v25, %v340_v24  ;;  %v345_v33 = vor.u32 %v458_v26, %v342_v27  ;;  %v461_v36 = vld [vmem:[%s655_s0 + $0x1c] sm:$0xf] }
   0xc   :  { %289 = vmatpush.bf16.msra.mxu2 %v485_v8  ;;  %v349_v34 = vor.u32 %v460_v29, %v348_v28  ;;  %v353_v35 = vor.u32 %v462_v31, %v352_v30  ;;  %v354_v37 = vld [vmem:[%s655_s0 + $0x24] sm:$0xf0]  ;;  %v360_v38 = vld [vmem:[%s655_s0 + $0x20] sm:$0xf]  ;;  %v463_v39 = vld [vmem:[%s655_s0 + $0x28] sm:$0xf0] }
   0xd   :  { %v357_v40 = vor.u32 %v461_v36, %v354_v37  ;;  %v361_v41 = vor.u32 %v463_v39, %v360_v38  ;;  %v507_v48 = vld [vmem:[%s657_s3] ss:$0 sm:$0xff] }
   0xe   :  { %252 = vmatpush.bf16.msra.mxu0 %v468_v9  ;;  %502 = vmatpush.bf16.msra.mxu3 %v468_v9  ;;  %v508_v51 = vld [vmem:[%s656_s2] ss:$0 sm:$0xff] }
   0xf   :  { %271 = vmatpush.bf16.msra.mxu1 %v476_v10 }
  0x10   :  { %290 = vmatpush.bf16.msra.mxu2 %v484_v11 }
  0x12   :  { %253 = vmatpush.bf16.msra.mxu0 %v467_v12  ;;  %503 = vmatpush.bf16.msra.mxu3 %v467_v12 }
  0x13   :  { %272 = vmatpush.bf16.msra.mxu1 %v475_v13 }
  0x14   :  { %291 = vmatpush.bf16.msra.mxu2 %v483_v14 }
  0x16   :  { %254 = vmatpush.bf16.msra.mxu0 %v466_v15  ;;  %504 = vmatpush.bf16.msra.mxu3 %v466_v15 }
  0x17   :  { %273 = vmatpush.bf16.msra.mxu1 %v474_v16 }
  0x18   :  { %292 = vmatpush.bf16.msra.mxu2 %v482_v17 }
  0x1a   :  { %255 = vmatpush.bf16.msra.mxu0 %v465_v18  ;;  %505 = vmatpush.bf16.msra.mxu3 %v465_v18 }
  0x1b   :  { %274 = vmatpush.bf16.msra.mxu1 %v473_v19 }
  0x1c   :  { %293 = vmatpush.bf16.msra.mxu2 %v481_v20 }
  0x1e   :  { %256 = vmatpush.bf16.msra.mxu0 %v464_v21  ;;  %506 = vmatpush.bf16.msra.mxu3 %v464_v21 }
  0x1f   :  { %275 = vmatpush.bf16.msra.mxu1 %v472_v22 }
  0x20   :  { %294 = vmatpush.bf16.msra.mxu2 %v480_v23 }
  0x21   :  { %257 = vmatmul.bf16.vlgmr.msra.gmra.mxu0 %v341_v32  ;;  %262 = vmatmul.bf16.vlgmr.msra.gmra.mxu3 %v353_v35 }
  0x22   :  { %276 = vmatmul.bf16.vlgmr.msra.gmra.mxu1 %v345_v33 }
  0x23   :  { %295 = vmatmul.bf16.vlgmr.msra.gmra.mxu2 %v349_v34 }
  0x32   :  { %281 = vmatmul.bf16.gmra.mxu1 %v357_v40 }
  0x33   :  { %300 = vmatmul.bf16.gmra.mxu2 %v361_v41 }
  0x9e   :  { %v258_v43 = vpop.f32.mrf.mxu0 }
  0x9f   :  { %v277_v42 = vpop.f32.mrf.mxu1 }
  0xa0   :  { %v278_v44 = vadd.f32 %v277_v42, %v258_v43 }
  0xa4   :  { %v263_v58 = vpop.f32.mrf.mxu3 }
  0xa6   :  { %v296_v45 = vpop.f32.mrf.mxu2  ;;  %v260_v49 = vpop.f32.mrf.mxu0 }
  0xa7   :  { %v279_v46 = vpop.f32.mrf.mxu1  ;;  %v297_v47 = vadd.f32 %v296_v45, %v278_v44 }
  0xa8   :  { %v280_v52 = vadd.f32 %v279_v46, %v260_v49 }
  0xa9   :  { %v310_v50 = vmul.f32 %v507_v48, %v297_v47 }
  0xab   :  { %v318_v56 = vadd.f32 %v508_v51, %v310_v50 }
  0xac   :  { %v265_v3 = vpop.f32.mrf.mxu3 }
  0xad   :  { %v322_v60 = vmax.f32 %v318_v56, 0.0 }
  0xae   :  { %v298_v53 = vpop.f32.mrf.mxu2 }
  0xaf   :  { %v299_v54 = vadd.f32 %v298_v53, %v280_v52  ;;  %v282_v55 = vpop.f32.mrf.mxu1 }
  0xb0   :  { %v283_v62 = vadd.f32 %v282_v55, %v263_v58 }
  0xb1   :  { %v311_v57 = vmul.f32 %v507_v48, %v299_v54 }
  0xb3   :  { %v319_v59 = vadd.f32 %v508_v51, %v311_v57 }
  0xb5   :  { %v323_v61 = vmax.f32 %v319_v59, 0.0 }
  0xb6   :  { %v301_v63 = vpop.f32.mrf.mxu2 }
  0xb7   :  { %v491_v0 = vpack.c.bf16 %v323_v61, %v322_v60  ;;  %v302_v1 = vadd.f32 %v301_v63, %v283_v62  ;;  %v284_v2 = vpop.f32.mrf.mxu1 }
  0xb8   :  { %v285_v5 = vadd.f32 %v284_v2, %v265_v3 }
  0xb9   :  { %492 = vst [vmem:[%s658_s4] sm:$0xff] %v491_v0   ;;  %v312_v4 = vmul.f32 %v507_v48, %v302_v1 }
  0xbb   :  { %v320_v8 = vadd.f32 %v508_v51, %v312_v4 }
  0xbd   :  { %v324_v11 = vmax.f32 %v320_v8, 0.0 }
  0xbe   :  { %v303_v6 = vpop.f32.mrf.mxu2 }
  0xbf   :  { %v304_v7 = vadd.f32 %v303_v6, %v285_v5 }
  0xc1   :  { %v313_v9 = vmul.f32 %v507_v48, %v304_v7 }
  0xc3   :  { %v321_v10 = vadd.f32 %v508_v51, %v313_v9 }
  0xc5   :  { %v325_v12 = vmax.f32 %v321_v10, 0.0 }
  0xc7   :  { %v496_v13 = vpack.c.bf16 %v325_v12, %v324_v11 }
  0xc9   :  { %498 = vst [vmem:[%s658_s4 + $0x8] sm:$0xff] %v496_v13  }

// kernel: _lambda_.77
= control target key start
LH: loop header
LB: loop body
LE: loop exit
PB: predicated region body
PF: predicated region fallthrough
CT: control target
= control target key end

     0   :  { %s896_s29 = smov 64   ;;  %vm377_vm0 = vcmask 523264   ;;  %vm570_vm1 = vcmask 519168   ;;  %vm595_vm2 = vcmask 1043968   ;;  %s1173_s1 = inlined_call_operand.vmem [shape: bf16[576,64], index: 1, kind: input, shape index: {}]   ;;  %s1174_s5 = inlined_call_operand.vmem [shape: f32[1,64], index: 5, kind: input, shape index: {}]   ;;  %s1175_s6 = inlined_call_operand.vmem [shape: f32[1,64], index: 6, kind: input, shape index: {}]   ;;  %s1176_s0 = inlined_call_operand.vmem [shape: bf16[32,576], index: 0, kind: input, shape index: {}]   ;;  %s1177_s2 = inlined_call_operand.vmem [shape: bf16[4,32,64], index: 2, kind: input, shape index: {}]   ;;  %s1178_s3 = inlined_call_operand.vmem [shape: f32[1,64], index: 3, kind: input, shape index: {}]   ;;  %s1179_s4 = inlined_call_operand.vmem [shape: f32[1,64], index: 4, kind: input, shape index: {}]   ;;  %s1180_s7 = inlined_call_operand.vmem [shape: bf16[32,128], index: 7, kind: output, shape index: {}]  }
   0x1   :  { %v819_v0 = vld [vmem:[%s1173_s1 + $0x38] sm:$0xff]  ;;  %v818_v4 = vld [vmem:[%s1173_s1 + $0x30] sm:$0xff]  ;;  %v817_v8 = vld [vmem:[%s1173_s1 + $0x28] sm:$0xff] }
   0x2   :  { %v827_v1 = vld [vmem:[%s1173_s1 + $0x78] sm:$0xff]  ;;  %384 = vmatpush.bf16.msra.mxu0 %v819_v0  ;;  %v826_v5 = vld [vmem:[%s1173_s1 + $0x70] sm:$0xff]  ;;  %v825_v9 = vld [vmem:[%s1173_s1 + $0x68] sm:$0xff] }
   0x3   :  { %v835_v2 = vld [vmem:[%s1173_s1 + $0xb8] sm:$0xff]  ;;  %403 = vmatpush.bf16.msra.mxu1 %v827_v1  ;;  %v834_v6 = vld [vmem:[%s1173_s1 + $0xb0] sm:$0xff]  ;;  %v833_v10 = vld [vmem:[%s1173_s1 + $0xa8] sm:$0xff] }
   0x4   :  { %v843_v3 = vld [vmem:[%s1173_s1 + $0xf8] sm:$0xff]  ;;  %422 = vmatpush.bf16.msra.mxu2 %v835_v2  ;;  %v842_v7 = vld [vmem:[%s1173_s1 + $0xf0] sm:$0xff]  ;;  %v841_v11 = vld [vmem:[%s1173_s1 + $0xe8] sm:$0xff] }
   0x5   :  { %441 = vmatpush.bf16.msra.mxu3 %v843_v3  ;;  %v816_v12 = vld [vmem:[%s1173_s1 + $0x20] sm:$0xff]  ;;  %v815_v16 = vld [vmem:[%s1173_s1 + $0x18] sm:$0xff]  ;;  %v814_v20 = vld [vmem:[%s1173_s1 + $0x10] sm:$0xff] }
   0x6   :  { %385 = vmatpush.bf16.msra.mxu0 %v818_v4  ;;  %v824_v13 = vld [vmem:[%s1173_s1 + $0x60] sm:$0xff]  ;;  %v823_v17 = vld [vmem:[%s1173_s1 + $0x58] sm:$0xff]  ;;  %v822_v21 = vld [vmem:[%s1173_s1 + $0x50] sm:$0xff] }
   0x7   :  { %404 = vmatpush.bf16.msra.mxu1 %v826_v5  ;;  %v832_v14 = vld [vmem:[%s1173_s1 + $0xa0] sm:$0xff]  ;;  %v831_v18 = vld [vmem:[%s1173_s1 + $0x98] sm:$0xff]  ;;  %v830_v22 = vld [vmem:[%s1173_s1 + $0x90] sm:$0xff] }
   0x8   :  { %423 = vmatpush.bf16.msra.mxu2 %v834_v6  ;;  %v840_v15 = vld [vmem:[%s1173_s1 + $0xe0] sm:$0xff]  ;;  %v839_v19 = vld [vmem:[%s1173_s1 + $0xd8] sm:$0xff]  ;;  %v838_v23 = vld [vmem:[%s1173_s1 + $0xd0] sm:$0xff] }
   0x9   :  { %442 = vmatpush.bf16.msra.mxu3 %v842_v7  ;;  %v813_v24 = vld [vmem:[%s1173_s1 + $0x8] sm:$0xff]  ;;  %v812_v28 = vld [vmem:[%s1173_s1] sm:$0xff]  ;;  %v804_v33 = vld [vmem:[%s1176_s0 + $0x10] sm:$0xf0] }
   0xa   :  { %386 = vmatpush.bf16.msra.mxu0 %v817_v8  ;;  %v821_v25 = vld [vmem:[%s1173_s1 + $0x48] sm:$0xff]  ;;  %v820_v29 = vld [vmem:[%s1173_s1 + $0x40] sm:$0xff]  ;;  %v608_v35 = vld [vmem:[%s1176_s0 + $0x14] sm:$0xf0] }
   0xb   :  { %405 = vmatpush.bf16.msra.mxu1 %v825_v9  ;;  %v829_v26 = vld [vmem:[%s1173_s1 + $0x88] sm:$0xff]  ;;  %v828_v30 = vld [vmem:[%s1173_s1 + $0x80] sm:$0xff]  ;;  %v805_v37 = vld [vmem:[%s1176_s0 + $0x18] sm:$0xf0] }
   0xc   :  { %424 = vmatpush.bf16.msra.mxu2 %v833_v10  ;;  %v837_v27 = vld [vmem:[%s1173_s1 + $0xc8] sm:$0xff]  ;;  %v836_v31 = vld [vmem:[%s1173_s1 + $0xc0] sm:$0xff]  ;;  %v847_v40 = vld [vmem:[%s1173_s1 + $0x118] sm:$0xff] }
   0xd   :  { %443 = vmatpush.bf16.msra.mxu3 %v841_v11  ;;  %v606_v32 = vld [vmem:[%s1176_s0] sm:$0xf]  ;;  %v802_v34 = vld [vmem:[%s1176_s0 + $0x4] sm:$0xf]  ;;  %v614_v36 = vld [vmem:[%s1176_s0 + $0x8] sm:$0xf] }
   0xe   :  { %387 = vmatpush.bf16.msra.mxu0 %v816_v12  ;;  %v803_v38 = vld [vmem:[%s1176_s0 + $0xc] sm:$0xf]  ;;  %v616_v39 = vld [vmem:[%s1176_s0 + $0x1c] sm:$0xf0]  ;;  %v607_v41 = vor.u32 %v804_v33, %v606_v32  ;;  %v611_v42 = vor.u32 %v802_v34, %v608_v35  ;;  %v615_v43 = vor.u32 %v805_v37, %v614_v36  ;;  %v846_v45 = vld [vmem:[%s1173_s1 + $0x110] sm:$0xff] }
   0xf   :  { %406 = vmatpush.bf16.msra.mxu1 %v824_v13  ;;  %v619_v44 = vor.u32 %v803_v38, %v616_v39  ;;  %v880_v46 = vld [vmem:[%s1177_s2 + $0x8] sm:$0xff]   ;;  %v882_v47 = vld [vmem:[%s1177_s2 + $0x18] sm:$0xff]   ;;  %v849_v57 = vld [vmem:[%s1177_s2] sm:$0xff]  }
  0x10   :  { %425 = vmatpush.bf16.msra.mxu2 %v832_v14  ;;  %v884_v48 = vld [vmem:[%s1177_s2 + $0x28] sm:$0xff]   ;;  %v854_v49 = vunpack.c.l.bf16 %v880_v46  ;;  %v855_v50 = vunpack.c.h.bf16 %v880_v46  ;;  %v862_v51 = vunpack.c.l.bf16 %v882_v47  ;;  %v863_v52 = vunpack.c.h.bf16 %v882_v47  ;;  %v886_v53 = vld [vmem:[%s1177_s2 + $0x38] sm:$0xff]   ;;  %v881_v58 = vld [vmem:[%s1177_s2 + $0x10] sm:$0xff]  }
  0x11   :  { %444 = vmatpush.bf16.msra.mxu3 %v840_v15  ;;  %v870_v54 = vunpack.c.l.bf16 %v884_v48  ;;  %v871_v55 = vunpack.c.h.bf16 %v884_v48  ;;  %v878_v56 = vunpack.c.l.bf16 %v886_v53  ;;  %v883_v59 = vld [vmem:[%s1177_s2 + $0x20] sm:$0xff]   ;;  %v845_v60 = vld [vmem:[%s1173_s1 + $0x108] sm:$0xff]  ;;  %v850_v62 = vunpack.c.l.bf16 %v849_v57  ;;  %v885_v1 = vld [vmem:[%s1177_s2 + $0x30] sm:$0xff]  }
  0x12   :  { %388 = vmatpush.bf16.msra.mxu0 %v815_v16  ;;  %v518_v61 = vmax.f32 %v854_v49, %v862_v51  ;;  %v851_v63 = vunpack.c.h.bf16 %v849_v57  ;;  %v858_v0 = vunpack.c.l.bf16 %v881_v58  ;;  %v879_v2 = vunpack.c.h.bf16 %v886_v53  ;;  %v892_v7 = vld [vmem:[%s1174_s5] ss:$0 sm:$0xff]  ;;  %v806_v51 = vld [vmem:[%s1176_s0 + $0x20] sm:$0xf0]  ;;  %v811_v53 = vld [vmem:[%s1176_s0 + $0x48] sm:$0xf0] }
  0x13   :  { %407 = vmatpush.bf16.msra.mxu1 %v823_v17  ;;  %v859_v3 = vunpack.c.h.bf16 %v881_v58  ;;  %v866_v4 = vunpack.c.l.bf16 %v883_v59  ;;  %v867_v5 = vunpack.c.h.bf16 %v883_v59  ;;  %v874_v9 = vunpack.c.l.bf16 %v885_v1  ;;  %v844_v13 = vld [vmem:[%s1173_s1 + $0x100] sm:$0xff] }
  0x14   :  { %426 = vmatpush.bf16.msra.mxu2 %v831_v18  ;;  %v531_v6 = vmax.f32 %v518_v61, %v870_v54  ;;  %v516_v8 = vmax.f32 %v850_v62, %v858_v0  ;;  %v519_v10 = vmax.f32 %v855_v50, %v863_v52  ;;  %v875_v11 = vunpack.c.h.bf16 %v885_v1  ;;  %v893_v15 = vld [vmem:[%s1175_s6] ss:$0 sm:$0xff]  ;;  %v626_v18 = vld [vmem:[%s1176_s0 + $0x28] sm:$0xf]  ;;  %v622_v50 = vld [vmem:[%s1176_s0 + $0x10] sm:$0xf] }
  0x15   :  { %445 = vmatpush.bf16.msra.mxu3 %v839_v19  ;;  %v517_v12 = vmax.f32 %v851_v63, %v859_v3  ;;  %v809_v19 = vld [vmem:[%s1176_s0 + $0x38] sm:$0xf0]  ;;  %v642_v52 = vld [vmem:[%s1176_s0 + $0x38] sm:$0xf]  ;;  %v623_v54 = vor.u32 %v806_v51, %v622_v50 }
  0x16   :  { %389 = vmatpush.bf16.msra.mxu0 %v814_v20  ;;  %v544_v14 = vmax.f32 %v531_v6, %v878_v56  ;;  %v529_v16 = vmax.f32 %v516_v8, %v866_v4  ;;  %v532_v17 = vmax.f32 %v519_v10, %v871_v55  ;;  %v627_v34 = vor.u32 %v809_v19, %v626_v18  ;;  %v895_v19 = vld [vmem:[%s1179_s4] ss:$0 sm:$0xff] }
  0x17   :  { %408 = vmatpush.bf16.msra.mxu1 %v822_v21  ;;  %v530_v20 = vmax.f32 %v517_v12, %v867_v5  ;;  %v807_v21 = vld [vmem:[%s1176_s0 + $0x2c] sm:$0xf]  ;;  %v643_v55 = vor.u32 %v811_v53, %v642_v52 }
  0x18   :  { %427 = vmatpush.bf16.msra.mxu2 %v830_v22  ;;  %v628_v22 = vld [vmem:[%s1176_s0 + $0x3c] sm:$0xf0] }
  0x19   :  { %446 = vmatpush.bf16.msra.mxu3 %v838_v23  ;;  %v634_v23 = vld [vmem:[%s1176_s0 + $0x30] sm:$0xf]  ;;  %v631_v35 = vor.u32 %v807_v21, %v628_v22 }
  0x1a   :  { %390 = vmatpush.bf16.msra.mxu0 %v813_v24  ;;  %v552_v24 = vmul.f32 %v892_v7, %v544_v14 }
  0x1b   :  { %409 = vmatpush.bf16.msra.mxu1 %v821_v25  ;;  %v542_v25 = vmax.f32 %v529_v16, %v874_v9 }
  0x1c   :  { %428 = vmatpush.bf16.msra.mxu2 %v829_v26  ;;  %v545_v26 = vmax.f32 %v532_v17, %v879_v2 }
  0x1d   :  { %447 = vmatpush.bf16.msra.mxu3 %v837_v27  ;;  %v810_v27 = vld [vmem:[%s1176_s0 + $0x40] sm:$0xf0]  ;;  %v550_v32 = vmul.f32 %v892_v7, %v542_v25 }
  0x1e   :  { %391 = vmatpush.bf16.msra.mxu0 %v812_v28  ;;  %v808_v28 = vld [vmem:[%s1176_s0 + $0x34] sm:$0xf]  ;;  %v553_v33 = vmul.f32 %v892_v7, %v545_v26  ;;  %v635_v37 = vor.u32 %v810_v27, %v634_v23 }
  0x1f   :  { %410 = vmatpush.bf16.msra.mxu1 %v820_v29  ;;  %v636_v29 = vld [vmem:[%s1176_s0 + $0x44] sm:$0xf0] }
  0x20   :  { %429 = vmatpush.bf16.msra.mxu2 %v828_v30  ;;  %v543_v30 = vmax.f32 %v530_v20, %v875_v11  ;;  %v639_v38 = vor.u32 %v808_v28, %v636_v29 }
  0x21   :  { %448 = vmatpush.bf16.msra.mxu3 %v836_v31  ;;  %392 = vmatmul.bf16.vlgmr.msra.gmra.mxu0 %v607_v41  ;;  %v560_v31 = vadd.f32 %v893_v15, %v552_v24  ;;  %v561_v41 = vadd.f32 %v893_v15, %v553_v33 }
  0x22   :  { %464 = vmatpush.bf16.msrb.mxu0 %v847_v40  ;;  %411 = vmatmul.bf16.vlgmr.msra.gmra.mxu1 %v611_v42  ;;  %v551_v36 = vmul.f32 %v892_v7, %v543_v30 }
  0x23   :  { %887 = vmatpush.bf16.msrb.mxu1 %v847_v40  ;;  %430 = vmatmul.bf16.vlgmr.msra.gmra.mxu2 %v615_v43  ;;  %v564_v39 = vmax.f32 %v560_v31, 0.0  ;;  %v558_v40 = vadd.f32 %v893_v15, %v550_v32  ;;  %v565_v46 = vmax.f32 %v561_v41, 0.0 }
  0x24   :  { %449 = vmatmul.bf16.vlgmr.msra.gmra.mxu3 %v619_v44  ;;  %v559_v44 = vadd.f32 %v893_v15, %v551_v36 }
  0x25   :  { %v577_v42 = vpack.c.bf16 %v564_v39, %v564_v39  ;;  %v562_v43 = vmax.f32 %v558_v40, 0.0  ;;  %v578_v48 = vpack.c.bf16 %v565_v46, %v565_v46 }
  0x26   :  { %465 = vmatpush.bf16.msrb.mxu0 %v846_v45  ;;  %v563_v47 = vmax.f32 %v559_v44, 0.0 }
  0x27   :  { %888 = vmatpush.bf16.msrb.mxu1 %v846_v45  ;;  %v575_v45 = vpack.c.bf16 %v562_v43, %v562_v43  ;;  %587 = vrot.lane.b32.xlu1 %v577_v42, %s896_s29 }
  0x28   :  { %v576_v49 = vpack.c.bf16 %v563_v47, %v563_v47 }
  0x29   :  { %583 = vrot.lane.b32.xlu0 %v575_v45, %s896_s29 }
  0x2a   :  { %466 = vmatpush.bf16.msrb.mxu0 %v845_v60 }
  0x2b   :  { %889 = vmatpush.bf16.msrb.mxu1 %v845_v60 }
  0x2e   :  { %467 = vmatpush.bf16.msrb.mxu0 %v844_v13 }
  0x2f   :  { %890 = vmatpush.bf16.msrb.mxu1 %v844_v13  ;;  %589 = vrot.lane.b32.xlu1 %v578_v48, %s896_s29  ;;  %v894_v13 = vld [vmem:[%s1178_s3] ss:$0 sm:$0xff] }
  0x31   :  { %397 = vmatmul.bf16.gmra.mxu0 %v627_v34  ;;  %585 = vrot.lane.b32.xlu0 %v576_v49, %s896_s29 }
  0x32   :  { %416 = vmatmul.bf16.gmra.mxu1 %v631_v35 }
  0x33   :  { %435 = vmatmul.bf16.gmra.mxu2 %v635_v37 }
  0x34   :  { %454 = vmatmul.bf16.gmra.mxu3 %v639_v38 }
  0x41   :  { %788 = vmatmul.msk.bf16.vlgmr.msrb.gmra.mxu0 %vm377_vm0, %v623_v54 }
  0x42   :  { %789 = vmatmul.msk.bf16.vlgmr.msrb.gmra.mxu1 %vm377_vm0, %v643_v55 }
  0x99   :  { %v588_v32 = vpop.permute.xlu1 %587 }
  0x9b   :  { %v584_v39 = vpop.permute.xlu0 %583 }
  0x9e   :  { %v393_v56 = vpop.f32.mrf.mxu0 }
  0x9f   :  { %v412_v57 = vpop.f32.mrf.mxu1 }
  0xa0   :  { %v413_v5 = vadd.f32 %v412_v57, %v393_v56 }
  0xa1   :  { %v590_v48 = vpop.permute.xlu1 %589 }
  0xa3   :  { %v586_v49 = vpop.permute.xlu0 %585 }
  0xa6   :  { %v431_v58 = vpop.f32.mrf.mxu2  ;;  %v395_v60 = vpop.f32.mrf.mxu0 }
  0xa7   :  { %v450_v59 = vpop.f32.mrf.mxu3  ;;  %v414_v61 = vpop.f32.mrf.mxu1  ;;  %v432_v7 = vadd.f32 %v431_v58, %v413_v5 }
  0xa8   :  { %v415_v16 = vadd.f32 %v414_v61, %v395_v60 }
  0xa9   :  { %v451_v10 = vadd.f32 %v450_v59, %v432_v7 }
  0xae   :  { %v433_v62 = vpop.f32.mrf.mxu2  ;;  %v398_v63 = vpop.f32.mrf.mxu0 }
  0xaf   :  { %v417_v0 = vpop.f32.mrf.mxu1  ;;  %v452_v1 = vpop.f32.mrf.mxu3  ;;  %v434_v21 = vadd.f32 %v433_v62, %v415_v16 }
  0xb0   :  { %v418_v6 = vadd.f32 %v417_v0, %v398_v63 }
  0xb1   :  { %v453_v28 = vadd.f32 %v452_v1, %v434_v21 }
  0xb6   :  { %v436_v2 = vpop.f32.mrf.mxu2  ;;  %v400_v3 = vpop.f32.mrf.mxu0 }
  0xb7   :  { %v419_v4 = vpop.f32.mrf.mxu1  ;;  %v437_v8 = vadd.f32 %v436_v2, %v418_v6  ;;  %v455_v9 = vpop.f32.mrf.mxu3 }
  0xb8   :  { %v420_v17 = vadd.f32 %v419_v4, %v400_v3 }
  0xb9   :  { %v456_v11 = vadd.f32 %v455_v9, %v437_v8 }
  0xbe   :  { %v438_v12 = vpop.f32.mrf.mxu2  ;;  %v469_v14 = vpop.f32.mrf.mxu0 }
  0xbf   :  { %v474_v15 = vpop.f32.mrf.mxu1  ;;  %v470_v18 = vadd.f32 %v469_v14, %v451_v10  ;;  %v439_v22 = vadd.f32 %v438_v12, %v420_v17  ;;  %v457_v27 = vpop.f32.mrf.mxu3 }
  0xc0   :  { %v475_v20 = vadd.f32 %v474_v15, %v456_v11 }
  0xc1   :  { %v483_v23 = vmul.f32 %v894_v13, %v470_v18  ;;  %v458_v29 = vadd.f32 %v457_v27, %v439_v22 }
  0xc2   :  { %v485_v24 = vmul.f32 %v894_v13, %v475_v20 }
  0xc3   :  { %v491_v25 = vadd.f32 %v895_v19, %v483_v23 }
  0xc4   :  { %v493_v26 = vadd.f32 %v895_v19, %v485_v24 }
  0xc5   :  { %v495_v30 = vmax.f32 %v491_v25, 0.0 }
  0xc6   :  { %v497_v31 = vmax.f32 %v493_v26, 0.0  ;;  %v471_v33 = vpop.f32.mrf.mxu0 }
  0xc7   :  { %v476_v34 = vpop.f32.mrf.mxu1  ;;  %v566_v35 = vpack.c.bf16 %v495_v30, %v495_v30  ;;  %v472_v37 = vadd.f32 %v471_v33, %v453_v28 }
  0xc8   :  { %v568_v36 = vpack.c.bf16 %v497_v31, %v497_v31  ;;  %v477_v38 = vadd.f32 %v476_v34, %v458_v29 }
  0xc9   :  { %v484_v40 = vmul.f32 %v894_v13, %v472_v37  ;;  %571 = vst.msk [vmem:[%s1180_s7] sm:$0xf] %vm570_vm1, %v566_v35 }
  0xca   :  { %v486_v41 = vmul.f32 %v894_v13, %v477_v38  ;;  %573 = vst.msk [vmem:[%s1180_s7 + $0x8] sm:$0xf] %vm570_vm1, %v568_v36 }
  0xcb   :  { %598 = vst.msk [vmem:[%s1180_s7 + $0x8] sm:$0xf] %vm595_vm2, %v588_v32  ;;  %v492_v42 = vadd.f32 %v895_v19, %v484_v40 }
  0xcc   :  { %v494_v43 = vadd.f32 %v895_v19, %v486_v41  ;;  %596 = vst.msk [vmem:[%s1180_s7] sm:$0xf] %vm595_vm2, %v584_v39 }
  0xcd   :  { %v496_v44 = vmax.f32 %v492_v42, 0.0 }
  0xce   :  { %v498_v45 = vmax.f32 %v494_v43, 0.0 }
  0xcf   :  { %v567_v46 = vpack.c.bf16 %v496_v44, %v496_v44 }
  0xd0   :  { %v569_v47 = vpack.c.bf16 %v498_v45, %v498_v45 }
  0xd1   :  { %572 = vst.msk [vmem:[%s1180_s7 + $0x4] sm:$0xf] %vm570_vm1, %v567_v46 }
  0xd2   :  { %574 = vst.msk [vmem:[%s1180_s7 + $0xc] sm:$0xf] %vm570_vm1, %v569_v47 }
  0xd3   :  { %599 = vst.msk [vmem:[%s1180_s7 + $0xc] sm:$0xf] %vm595_vm2, %v590_v48 }
  0xd4   :  { %597 = vst.msk [vmem:[%s1180_s7 + $0x4] sm:$0xf] %vm595_vm2, %v586_v49 }

// kernel: _lambda_.81
= control target key start
LH: loop header
LB: loop body
LE: loop exit
PB: predicated region body
PF: predicated region fallthrough
CT: control target
= control target key end

     0   :  { %s689_s1 = inlined_call_operand.vmem [shape: bf16[384,128], index: 1, kind: input, shape index: {}]   ;;  %s690_s0 = inlined_call_operand.vmem [shape: bf16[32,384], index: 0, kind: input, shape index: {}]   ;;  %s691_s2 = inlined_call_operand.vmem [shape: f32[1,128], index: 2, kind: input, shape index: {}]   ;;  %s692_s3 = inlined_call_operand.vmem [shape: f32[1,128], index: 3, kind: input, shape index: {}]   ;;  %s693_s4 = inlined_call_operand.vmem [shape: bf16[32,128], index: 4, kind: input, shape index: {}]   ;;  %s694_s5 = inlined_call_operand.vmem [shape: bf16[32,128], index: 5, kind: output, shape index: {}]  }
   0x1   :  { %v486_v0 = vld [vmem:[%s689_s1 + $0x38] sm:$0xff]  ;;  %v485_v3 = vld [vmem:[%s689_s1 + $0x30] sm:$0xff]  ;;  %v484_v6 = vld [vmem:[%s689_s1 + $0x28] sm:$0xff] }
   0x2   :  { %v494_v1 = vld [vmem:[%s689_s1 + $0x78] sm:$0xff]  ;;  %252 = vmatpush.bf16.msra.mxu0 %v486_v0  ;;  %v493_v4 = vld [vmem:[%s689_s1 + $0x70] sm:$0xff]  ;;  %523 = vmatpush.bf16.msra.mxu3 %v486_v0  ;;  %v492_v7 = vld [vmem:[%s689_s1 + $0x68] sm:$0xff] }
   0x3   :  { %v502_v2 = vld [vmem:[%s689_s1 + $0xb8] sm:$0xff]  ;;  %271 = vmatpush.bf16.msra.mxu1 %v494_v1  ;;  %v501_v5 = vld [vmem:[%s689_s1 + $0xb0] sm:$0xff]  ;;  %v500_v8 = vld [vmem:[%s689_s1 + $0xa8] sm:$0xff] }
   0x4   :  { %290 = vmatpush.bf16.msra.mxu2 %v502_v2  ;;  %v483_v9 = vld [vmem:[%s689_s1 + $0x20] sm:$0xff]  ;;  %v482_v12 = vld [vmem:[%s689_s1 + $0x18] sm:$0xff]  ;;  %v481_v15 = vld [vmem:[%s689_s1 + $0x10] sm:$0xff] }
   0x5   :  { %v491_v10 = vld [vmem:[%s689_s1 + $0x60] sm:$0xff]  ;;  %v490_v13 = vld [vmem:[%s689_s1 + $0x58] sm:$0xff]  ;;  %v489_v16 = vld [vmem:[%s689_s1 + $0x50] sm:$0xff] }
   0x6   :  { %253 = vmatpush.bf16.msra.mxu0 %v485_v3  ;;  %524 = vmatpush.bf16.msra.mxu3 %v485_v3  ;;  %v499_v11 = vld [vmem:[%s689_s1 + $0xa0] sm:$0xff]  ;;  %v498_v14 = vld [vmem:[%s689_s1 + $0x98] sm:$0xff]  ;;  %v497_v17 = vld [vmem:[%s689_s1 + $0x90] sm:$0xff] }
   0x7   :  { %272 = vmatpush.bf16.msra.mxu1 %v493_v4  ;;  %v480_v18 = vld [vmem:[%s689_s1 + $0x8] sm:$0xff]  ;;  %v479_v21 = vld [vmem:[%s689_s1] sm:$0xff]  ;;  %v357_v27 = vld [vmem:[%s690_s0 + $0xc] sm:$0xf0] }
   0x8   :  { %291 = vmatpush.bf16.msra.mxu2 %v501_v5  ;;  %v488_v19 = vld [vmem:[%s689_s1 + $0x48] sm:$0xff]  ;;  %v487_v22 = vld [vmem:[%s689_s1 + $0x40] sm:$0xff]  ;;  %v475_v29 = vld [vmem:[%s690_s0 + $0x10] sm:$0xf0] }
   0x9   :  { %v496_v20 = vld [vmem:[%s689_s1 + $0x88] sm:$0xff]  ;;  %v495_v23 = vld [vmem:[%s689_s1 + $0x80] sm:$0xff]  ;;  %v367_v30 = vld [vmem:[%s690_s0 + $0x18] sm:$0xf] }
   0xa   :  { %254 = vmatpush.bf16.msra.mxu0 %v484_v6  ;;  %525 = vmatpush.bf16.msra.mxu3 %v484_v6  ;;  %v355_v24 = vld [vmem:[%s690_s0] sm:$0xf]  ;;  %v474_v25 = vld [vmem:[%s690_s0 + $0x8] sm:$0xf0]  ;;  %v473_v26 = vld [vmem:[%s690_s0 + $0x4] sm:$0xf] }
   0xb   :  { %273 = vmatpush.bf16.msra.mxu1 %v492_v7  ;;  %v363_v28 = vld [vmem:[%s690_s0 + $0x8] sm:$0xf]  ;;  %v477_v31 = vld [vmem:[%s690_s0 + $0x20] sm:$0xf0]  ;;  %v356_v32 = vor.u32 %v474_v25, %v355_v24  ;;  %v360_v33 = vor.u32 %v473_v26, %v357_v27  ;;  %v476_v36 = vld [vmem:[%s690_s0 + $0x1c] sm:$0xf] }
   0xc   :  { %292 = vmatpush.bf16.msra.mxu2 %v500_v8  ;;  %v364_v34 = vor.u32 %v475_v29, %v363_v28  ;;  %v368_v35 = vor.u32 %v477_v31, %v367_v30  ;;  %v369_v37 = vld [vmem:[%s690_s0 + $0x24] sm:$0xf0]  ;;  %v375_v38 = vld [vmem:[%s690_s0 + $0x20] sm:$0xf]  ;;  %v478_v39 = vld [vmem:[%s690_s0 + $0x28] sm:$0xf0] }
   0xd   :  { %v372_v40 = vor.u32 %v476_v36, %v369_v37  ;;  %v376_v41 = vor.u32 %v478_v39, %v375_v38  ;;  %v531_v47 = vld [vmem:[%s692_s3] ss:$0 sm:$0xff] }
   0xe   :  { %255 = vmatpush.bf16.msra.mxu0 %v483_v9  ;;  %526 = vmatpush.bf16.msra.mxu3 %v483_v9  ;;  %v532_v51 = vld [vmem:[%s691_s2] ss:$0 sm:$0xff] }
   0xf   :  { %274 = vmatpush.bf16.msra.mxu1 %v491_v10  ;;  %v504_v52 = vld [vmem:[%s693_s4] sm:$0xff]   ;;  %v521_v10 = vld [vmem:[%s693_s4 + $0x8] sm:$0xff]  }
  0x10   :  { %293 = vmatpush.bf16.msra.mxu2 %v499_v11  ;;  %v505_v56 = vunpack.c.l.bf16 %v504_v52  ;;  %v506_v60 = vunpack.c.h.bf16 %v504_v52 }
  0x12   :  { %256 = vmatpush.bf16.msra.mxu0 %v482_v12  ;;  %527 = vmatpush.bf16.msra.mxu3 %v482_v12 }
  0x13   :  { %275 = vmatpush.bf16.msra.mxu1 %v490_v13 }
  0x14   :  { %294 = vmatpush.bf16.msra.mxu2 %v498_v14  ;;  %v509_v14 = vunpack.c.l.bf16 %v521_v10 }
  0x16   :  { %257 = vmatpush.bf16.msra.mxu0 %v481_v15  ;;  %528 = vmatpush.bf16.msra.mxu3 %v481_v15 }
  0x17   :  { %276 = vmatpush.bf16.msra.mxu1 %v489_v16 }
  0x18   :  { %295 = vmatpush.bf16.msra.mxu2 %v497_v17  ;;  %v510_v17 = vunpack.c.h.bf16 %v521_v10 }
  0x1a   :  { %258 = vmatpush.bf16.msra.mxu0 %v480_v18  ;;  %529 = vmatpush.bf16.msra.mxu3 %v480_v18 }
  0x1b   :  { %277 = vmatpush.bf16.msra.mxu1 %v488_v19 }
  0x1c   :  { %296 = vmatpush.bf16.msra.mxu2 %v496_v20 }
  0x1e   :  { %259 = vmatpush.bf16.msra.mxu0 %v479_v21  ;;  %530 = vmatpush.bf16.msra.mxu3 %v479_v21 }
  0x1f   :  { %278 = vmatpush.bf16.msra.mxu1 %v487_v22 }
  0x20   :  { %297 = vmatpush.bf16.msra.mxu2 %v495_v23 }
  0x21   :  { %260 = vmatmul.bf16.vlgmr.msra.gmra.mxu0 %v356_v32  ;;  %265 = vmatmul.bf16.vlgmr.msra.gmra.mxu3 %v368_v35 }
  0x22   :  { %279 = vmatmul.bf16.vlgmr.msra.gmra.mxu1 %v360_v33 }
  0x23   :  { %298 = vmatmul.bf16.vlgmr.msra.gmra.mxu2 %v364_v34 }
  0x32   :  { %284 = vmatmul.bf16.gmra.mxu1 %v372_v40 }
  0x33   :  { %303 = vmatmul.bf16.gmra.mxu2 %v376_v41 }
  0x9e   :  { %v261_v43 = vpop.f32.mrf.mxu0 }
  0x9f   :  { %v280_v42 = vpop.f32.mrf.mxu1 }
  0xa0   :  { %v281_v44 = vadd.f32 %v280_v42, %v261_v43 }
  0xa4   :  { %v266_v61 = vpop.f32.mrf.mxu3 }
  0xa6   :  { %v299_v45 = vpop.f32.mrf.mxu2  ;;  %v263_v49 = vpop.f32.mrf.mxu0 }
  0xa7   :  { %v300_v46 = vadd.f32 %v299_v45, %v281_v44  ;;  %v282_v48 = vpop.f32.mrf.mxu1 }
  0xa8   :  { %v283_v53 = vadd.f32 %v282_v48, %v263_v49 }
  0xa9   :  { %v313_v50 = vmul.f32 %v531_v47, %v300_v46 }
  0xab   :  { %v321_v55 = vadd.f32 %v532_v51, %v313_v50 }
  0xac   :  { %v268_v9 = vpop.f32.mrf.mxu3 }
  0xad   :  { %v333_v62 = vadd.f32 %v505_v56, %v321_v55 }
  0xae   :  { %v301_v54 = vpop.f32.mrf.mxu2 }
  0xaf   :  { %v302_v57 = vadd.f32 %v301_v54, %v283_v53  ;;  %v285_v58 = vpop.f32.mrf.mxu1  ;;  %v337_v3 = vmax.f32 %v333_v62, 0.0 }
  0xb0   :  { %v286_v0 = vadd.f32 %v285_v58, %v266_v61 }
  0xb1   :  { %v314_v59 = vmul.f32 %v531_v47, %v302_v57 }
  0xb3   :  { %v322_v63 = vadd.f32 %v532_v51, %v314_v59 }
  0xb5   :  { %v334_v1 = vadd.f32 %v506_v60, %v322_v63 }
  0xb6   :  { %v304_v2 = vpop.f32.mrf.mxu2 }
  0xb7   :  { %v338_v4 = vmax.f32 %v334_v1, 0.0  ;;  %v305_v5 = vadd.f32 %v304_v2, %v286_v0  ;;  %v287_v7 = vpop.f32.mrf.mxu1 }
  0xb8   :  { %v288_v11 = vadd.f32 %v287_v7, %v268_v9 }
  0xb9   :  { %v514_v6 = vpack.c.bf16 %v338_v4, %v337_v3  ;;  %v315_v8 = vmul.f32 %v531_v47, %v305_v5 }
  0xbb   :  { %515 = vst [vmem:[%s694_s5] sm:$0xff] %v514_v6   ;;  %v323_v13 = vadd.f32 %v532_v51, %v315_v8 }
  0xbd   :  { %v335_v18 = vadd.f32 %v509_v14, %v323_v13 }
  0xbe   :  { %v306_v12 = vpop.f32.mrf.mxu2 }
  0xbf   :  { %v307_v15 = vadd.f32 %v306_v12, %v288_v11  ;;  %v339_v21 = vmax.f32 %v335_v18, 0.0 }
  0xc1   :  { %v316_v16 = vmul.f32 %v531_v47, %v307_v15 }
  0xc3   :  { %v324_v19 = vadd.f32 %v532_v51, %v316_v16 }
  0xc5   :  { %v336_v20 = vadd.f32 %v510_v17, %v324_v19 }
  0xc7   :  { %v340_v22 = vmax.f32 %v336_v20, 0.0 }
  0xc9   :  { %v519_v23 = vpack.c.bf16 %v340_v22, %v339_v21 }
  0xcb   :  { %522 = vst [vmem:[%s694_s5 + $0x8] sm:$0xff] %v519_v23  }

</bundles_post_ra>
